<compile_context>
chip_gen: v7x
topology: tpu7x:2x2x1
jax: 0.10.0
libtpu: 0.0.40
codegen_flags: <defaults>
</compile_context>

<pallas_src>
import functools
import math

import jax
import jax.numpy as jnp
from jax.experimental import pallas as pl
from jax.experimental.pallas import tpu as pltpu


def _round_up(x, m):
    return ((x + m - 1) // m) * m


def _nbytes(a):
    return math.prod(a.shape) * jnp.dtype(a.dtype).itemsize


def fused_gru_kernel(xd_ref, xw_ref, xm_ref, wih_ref, whh_ref, bi_ref,
                     bhn_ref, wfc_ref, bfc_ref, out_ref, gi_scr):
    """Single invocation: all 3 GRU branches + fused (pre-averaged) FC heads."""
    x_refs = (xd_ref, xw_ref, xm_ref)
    T_lens = tuple(r.shape[0] for r in x_refs)   # static per-branch seq lengths
    Bp = x_refs[0].shape[1]                      # sublane-padded batch (8)
    FP = x_refs[0].shape[2]                      # lane-padded features (128)
    HP = whh_ref.shape[1]                        # lane-padded hidden (128)
    B, C = out_ref.shape                         # real batch / classes

    # Hoisted input projection per branch (one bf16 MXU matmul each), staged in
    # VMEM so each unrolled step reads one tile-aligned (Bp, 3*HP) slab.
    # bi_ref already holds b_ih (+ b_hh folded in for the r/z gates).
    for br in range(3):
        T_b = T_lens[br]
        x2 = x_refs[br][...].reshape(T_b * Bp, FP).astype(jnp.bfloat16)
        gi = jnp.dot(x2, wih_ref[br], preferred_element_type=jnp.float32)
        gi_scr[br, :T_b * Bp, :] = gi + bi_ref[br]

    # Hoist the n-gate hidden-bias broadcasts out of the unrolled loop.
    bhn = [jnp.broadcast_to(bhn_ref[br], (Bp, HP)) for br in range(3)]

    # Recurrence: static trip count per branch; the independent recurrent
    # matmuls of the active branches are issued back-to-back each step.
    h = [jnp.zeros((Bp, HP), jnp.float32) for _ in range(3)]
    for t in range(max(T_lens)):
        active = [br for br in range(3) if t < T_lens[br]]
        gh = {br: jnp.dot(h[br].astype(jnp.bfloat16), whh_ref[br],
                          preferred_element_type=jnp.float32)
              for br in active}
        for br in active:
            gi_t = gi_scr[br, t * Bp:(t + 1) * Bp, :]        # one (8,384) tile
            r = jax.nn.sigmoid(gi_t[:, 0 * HP:1 * HP] + gh[br][:, 0 * HP:1 * HP])
            z = jax.nn.sigmoid(gi_t[:, 1 * HP:2 * HP] + gh[br][:, 1 * HP:2 * HP])
            n = jnp.tanh(gi_t[:, 2 * HP:3 * HP]
                         + r * (gh[br][:, 2 * HP:3 * HP] + bhn[br]))
            h[br] = (1.0 - z) * n + z * h[br]

    # Fused classifier heads; the 1/3 average is pre-folded into W_fc / b_fc.
    acc = jnp.dot(h[0].astype(jnp.bfloat16), wfc_ref[0],
                  preferred_element_type=jnp.float32)
    acc = acc + jnp.dot(h[1].astype(jnp.bfloat16), wfc_ref[1],
                        preferred_element_type=jnp.float32)
    acc = acc + jnp.dot(h[2].astype(jnp.bfloat16), wfc_ref[2],
                        preferred_element_type=jnp.float32)
    acc = acc + bfc_ref[...]
    out_ref[...] = acc[:B, :C]


def init_params(key, in_feats_d, in_feats_w, in_feats_m, hidden_size, num_classes):
    """PyTorch-style uniform(-1/sqrt(H), 1/sqrt(H)) init, gate order [r, z, n]."""
    bound = 1.0 / float(hidden_size) ** 0.5
    params = {}
    for name, f in (("d", in_feats_d), ("w", in_feats_w), ("m", in_feats_m)):
        key, *ks = jax.random.split(key, 7)
        u = lambda k, shape: jax.random.uniform(
            k, shape, jnp.float32, minval=-bound, maxval=bound)
        params[name] = dict(
            wih_t=u(ks[0], (f, 3 * hidden_size)),            # (F, 3H)
            whh_t=u(ks[1], (hidden_size, 3 * hidden_size)),  # (H, 3H)
            bih=u(ks[2], (1, 3 * hidden_size)),
            bhh=u(ks[3], (1, 3 * hidden_size)),
            wfc_t=u(ks[4], (hidden_size, num_classes)),      # (H, C)
            bfc=u(ks[5], (1, num_classes)),
        )
    return params


def pack_params(params, in_feats, hidden_size, num_classes):
    """One-time packing: lane-padded, bf16 matmul weights, 1/3 average folded in."""
    H = hidden_size
    HP = max(128, _round_up(H, 128))               # lane-padded hidden
    CP = max(128, _round_up(num_classes, 128))     # lane-padded classes
    FP = max(128, _round_up(max(in_feats), 128))   # lane-padded features

    WIH = jnp.zeros((3, FP, 3 * HP), jnp.float32)
    WHH = jnp.zeros((3, HP, 3 * HP), jnp.float32)
    BI = jnp.zeros((3, 1, 3 * HP), jnp.float32)
    BHN = jnp.zeros((3, 1, HP), jnp.float32)
    WFC = jnp.zeros((3, HP, CP), jnp.float32)
    BFC = jnp.zeros((1, CP), jnp.float32)

    for i, (name, F_b) in enumerate(zip(("d", "w", "m"), in_feats)):
        p = params[name]
        for g in range(3):                          # torch gate order [r, z, n]
            WIH = WIH.at[i, :F_b, g * HP:g * HP + H].set(
                p["wih_t"][:, g * H:(g + 1) * H])
            WHH = WHH.at[i, :H, g * HP:g * HP + H].set(
                p["whh_t"][:, g * H:(g + 1) * H])
            bi = p["bih"][0, g * H:(g + 1) * H]
            if g < 2:                               # fold b_hh of r/z gates
                bi = bi + p["bhh"][0, g * H:(g + 1) * H]
            BI = BI.at[i, 0, g * HP:g * HP + H].set(bi)
        BHN = BHN.at[i, 0, :H].set(p["bhh"][0, 2 * H:3 * H])
        WFC = WFC.at[i, :H, :num_classes].set(p["wfc_t"] / 3.0)   # fold 1/3 avg
        BFC = BFC.at[0, :num_classes].add(p["bfc"][0] / 3.0)

    return dict(WIH=WIH.astype(jnp.bfloat16), WHH=WHH.astype(jnp.bfloat16),
                BI=BI, BHN=BHN, WFC=WFC.astype(jnp.bfloat16), BFC=BFC)


@functools.partial(jax.jit, static_argnames=("num_classes",))
def multi_freq_gru_forward(packed, xd, xw, xm, *, num_classes):
    """xd/xw/xm are batch-first (B, T_b, F_b) like the PyTorch module."""
    xs = (xd, xw, xm)
    B = xd.shape[0]
    Bp = max(8, _round_up(B, 8))                    # sublane-padded batch
    FP = packed["WIH"].shape[1]
    HP = packed["WHH"].shape[1]
    CP = packed["WFC"].shape[2]
    T_lens = tuple(x.shape[1] for x in xs)
    T_max = max(T_lens)

    # Per-branch time-major layout + sublane/lane padding (tiny; no stacked-X
    # host packing, no dynamic-update-slice copies).
    xs_p = []
    for x in xs:
        x_tm = jnp.swapaxes(x.astype(jnp.float32), 0, 1)        # (T_b, B, F_b)
        xs_p.append(jnp.pad(
            x_tm, ((0, 0), (0, Bp - B), (0, FP - x.shape[2]))))  # (T_b, Bp, FP)

    # Advisory cost estimate for XLA's scheduler.
    flops, trans = 0, 0
    for T_b in T_lens:
        flops += 2 * T_b * Bp * FP * 3 * HP      # hoisted input projection
        flops += 2 * T_b * Bp * HP * 3 * HP      # recurrent matmuls
        trans += T_b * Bp * 3 * HP               # 2 sigmoids + 1 tanh per gate
    flops += 3 * 2 * Bp * HP * CP                # classifier heads
    bytes_accessed = (sum(_nbytes(a) for a in xs_p)
                      + sum(_nbytes(packed[k]) for k in
                            ("WIH", "WHH", "BI", "BHN", "WFC", "BFC"))
                      + B * num_classes * 4)

    in_specs = [
        pl.BlockSpec((T_lens[0], Bp, FP), lambda i: (0, 0, 0)),
        pl.BlockSpec((T_lens[1], Bp, FP), lambda i: (0, 0, 0)),
        pl.BlockSpec((T_lens[2], Bp, FP), lambda i: (0, 0, 0)),
        pl.BlockSpec((3, FP, 3 * HP), lambda i: (0, 0, 0)),
        pl.BlockSpec((3, HP, 3 * HP), lambda i: (0, 0, 0)),
        pl.BlockSpec((3, 1, 3 * HP), lambda i: (0, 0, 0)),
        pl.BlockSpec((3, 1, HP), lambda i: (0, 0, 0)),
        pl.BlockSpec((3, HP, CP), lambda i: (0, 0, 0)),
        pl.BlockSpec((1, CP), lambda i: (0, 0)),
    ]

    logits = pl.pallas_call(
        fused_gru_kernel,
        out_shape=jax.ShapeDtypeStruct((B, num_classes), jnp.float32),
        grid=(1,),
        in_specs=in_specs,
        out_specs=pl.BlockSpec((B, num_classes), lambda i: (0, 0)),
        scratch_shapes=[pltpu.VMEM((3, T_max * Bp, 3 * HP), jnp.float32)],
        compiler_params=pltpu.CompilerParams(
            dimension_semantics=("arbitrary",)),
        cost_estimate=pl.CostEstimate(
            flops=flops, transcendentals=trans, bytes_accessed=bytes_accessed),
    )(xs_p[0], xs_p[1], xs_p[2], packed["WIH"], packed["WHH"], packed["BI"],
      packed["BHN"], packed["WFC"], packed["BFC"])
    return logits


def reference_forward(params, xd, xw, xm):
    """Pure-JAX f32 reference of torch.nn.GRU + Linear for validation."""
    def branch(p, x):
        x_tm = jnp.transpose(x, (1, 0, 2)).astype(jnp.float32)
        B = x.shape[0]
        H = p["whh_t"].shape[0]
        h = jnp.zeros((B, H), jnp.float32)
        for t in range(x_tm.shape[0]):
            gi = x_tm[t] @ p["wih_t"] + p["bih"]
            gh = h @ p["whh_t"] + p["bhh"]
            r = jax.nn.sigmoid(gi[:, :H] + gh[:, :H])
            z = jax.nn.sigmoid(gi[:, H:2 * H] + gh[:, H:2 * H])
            n = jnp.tanh(gi[:, 2 * H:] + r * gh[:, 2 * H:])
            h = (1.0 - z) * n + z * h
        return h @ p["wfc_t"] + p["bfc"]
    return (branch(params["d"], xd) + branch(params["w"], xw)
            + branch(params["m"], xm)) / 3.0


if __name__ == "__main__":
    B = 2
    in_feats_d, in_feats_w, in_feats_m = 8, 6, 5
    Td, Tw, Tm = 8, 6, 4
    hidden_size, num_classes = 32, 4

    key = jax.random.PRNGKey(0)
    kp, kd, kw, km = jax.random.split(key, 4)

    params = init_params(kp, in_feats_d, in_feats_w, in_feats_m,
                         hidden_size, num_classes)
    packed = pack_params(params, (in_feats_d, in_feats_w, in_feats_m),
                         hidden_size, num_classes)

    xd = jax.random.normal(kd, (B, Td, in_feats_d), jnp.float32)
    xw = jax.random.normal(kw, (B, Tw, in_feats_w), jnp.float32)
    xm = jax.random.normal(km, (B, Tm, in_feats_m), jnp.float32)

    logits = multi_freq_gru_forward(packed, xd, xw, xm, num_classes=num_classes)
    logits = jax.block_until_ready(logits)

    ref = reference_forward(params, xd, xw, xm)
    assert logits.shape == (B, num_classes)
    # bf16 matmul weights (per perf review) -> validate with a looser tolerance.
    err = float(jnp.max(jnp.abs(logits - ref)))
    assert jnp.allclose(logits, ref, atol=2e-2, rtol=2e-2), (
        f"mismatch: max abs err {err}")

    print("KERNEL_OK")
</pallas_src>

<mosaic_0001>
module attributes {stable_mosaic.version = 11 : i64} {
  func.func @fused_gru_kernel(%arg0: i32, %arg1: memref<8x8x128xf32, #tpu.memory_space<vmem>>, %arg2: memref<6x8x128xf32, #tpu.memory_space<vmem>>, %arg3: memref<4x8x128xf32, #tpu.memory_space<vmem>>, %arg4: memref<3x128x384xbf16, #tpu.memory_space<vmem>>, %arg5: memref<3x128x384xbf16, #tpu.memory_space<vmem>>, %arg6: memref<3x1x384xf32, #tpu.memory_space<vmem>>, %arg7: memref<3x1x128xf32, #tpu.memory_space<vmem>>, %arg8: memref<3x128x128xbf16, #tpu.memory_space<vmem>>, %arg9: memref<1x128xf32, #tpu.memory_space<vmem>>, %arg10: memref<2x4xf32, #tpu.memory_space<vmem>>, %arg11: memref<3x64x384xf32, #tpu.memory_space<vmem>>) attributes {dimension_semantics = [#tpu.dimension_semantics<arbitrary>], iteration_bounds = array<i64: 1>, scalar_prefetch = 0 : i64, scratch_operands = 1 : i64, tpu.core_type = #tpu.core_type<tc>, window_params = [{pipeline_mode = #tpu.pipeline_mode<synchronous>, transform_indices = @transform_0, window_bounds = array<i64: 8, 8, 128>}, {pipeline_mode = #tpu.pipeline_mode<synchronous>, transform_indices = @transform_1, window_bounds = array<i64: 6, 8, 128>}, {pipeline_mode = #tpu.pipeline_mode<synchronous>, transform_indices = @transform_2, window_bounds = array<i64: 4, 8, 128>}, {pipeline_mode = #tpu.pipeline_mode<synchronous>, transform_indices = @transform_3, window_bounds = array<i64: 3, 128, 384>}, {pipeline_mode = #tpu.pipeline_mode<synchronous>, transform_indices = @transform_4, window_bounds = array<i64: 3, 128, 384>}, {pipeline_mode = #tpu.pipeline_mode<synchronous>, transform_indices = @transform_5, window_bounds = array<i64: 3, 1, 384>}, {pipeline_mode = #tpu.pipeline_mode<synchronous>, transform_indices = @transform_6, window_bounds = array<i64: 3, 1, 128>}, {pipeline_mode = #tpu.pipeline_mode<synchronous>, transform_indices = @transform_7, window_bounds = array<i64: 3, 128, 128>}, {pipeline_mode = #tpu.pipeline_mode<synchronous>, transform_indices = @transform_8, window_bounds = array<i64: 1, 128>}, {pipeline_mode = #tpu.pipeline_mode<synchronous>, transform_indices = @transform_9, window_bounds = array<i64: 2, 4>}]} {
    %c0 = arith.constant 0 : index
    %c0_0 = arith.constant 0 : index
    %c0_1 = arith.constant 0 : index
    %0 = vector.load %arg1[%c0, %c0_0, %c0_1] : memref<8x8x128xf32, #tpu.memory_space<vmem>>, vector<8x8x128xf32>
    %1 = vector.shape_cast %0 : vector<8x8x128xf32> to vector<64x128xf32>
    %2 = arith.truncf %1 : vector<64x128xf32> to vector<64x128xbf16>
    %c0_2 = arith.constant 0 : index
    %c0_3 = arith.constant 0 : index
    %c0_4 = arith.constant 0 : index
    %3 = vector.load %arg4[%c0_2, %c0_3, %c0_4] : memref<3x128x384xbf16, #tpu.memory_space<vmem>>, vector<1x128x384xbf16>
    %4 = vector.shape_cast %3 : vector<1x128x384xbf16> to vector<128x384xbf16>
    %cst = arith.constant dense<0.000000e+00> : vector<64x384xf32>
    %5 = tpu.matmul %2, %4, %cst {dimension_numbers = #tpu.dot_dimension_numbers<[1], [0], [0], [1], [0, 0, 1, 1], [], []>} : vector<64x128xbf16>, vector<128x384xbf16>, vector<64x384xf32> -> vector<64x384xf32>
    %c0_5 = arith.constant 0 : index
    %c0_6 = arith.constant 0 : index
    %c0_7 = arith.constant 0 : index
    %6 = vector.load %arg6[%c0_5, %c0_6, %c0_7] : memref<3x1x384xf32, #tpu.memory_space<vmem>>, vector<1x1x384xf32>
    %7 = vector.shape_cast %6 : vector<1x1x384xf32> to vector<1x384xf32>
    %8 = vector.broadcast %7 : vector<1x384xf32> to vector<64x384xf32>
    %9 = arith.addf %5, %8 : vector<64x384xf32>
    %c0_8 = arith.constant 0 : index
    %c0_9 = arith.constant 0 : index
    %c0_10 = arith.constant 0 : index
    %10 = vector.load %arg11[%c0_8, %c0_9, %c0_10] : memref<3x64x384xf32, #tpu.memory_space<vmem>>, vector<1x64x384xf32>
    %11 = vector.shape_cast %10 : vector<1x64x384xf32> to vector<64x384xf32>
    %12 = vector.shape_cast %9 : vector<64x384xf32> to vector<1x64x384xf32>
    tpu.vector_store %arg11[%c0_8, %c0_9, %c0_10], %12 {strides = array<i32>} : memref<3x64x384xf32, #tpu.memory_space<vmem>>, vector<1x64x384xf32>,
    %c0_11 = arith.constant 0 : index
    %c0_12 = arith.constant 0 : index
    %c0_13 = arith.constant 0 : index
    %13 = vector.load %arg2[%c0_11, %c0_12, %c0_13] : memref<6x8x128xf32, #tpu.memory_space<vmem>>, vector<6x8x128xf32>
    %14 = vector.shape_cast %13 : vector<6x8x128xf32> to vector<48x128xf32>
    %15 = arith.truncf %14 : vector<48x128xf32> to vector<48x128xbf16>
    %c1 = arith.constant 1 : index
    %c0_14 = arith.constant 0 : index
    %c0_15 = arith.constant 0 : index
    %16 = vector.load %arg4[%c1, %c0_14, %c0_15] : memref<3x128x384xbf16, #tpu.memory_space<vmem>>, vector<1x128x384xbf16>
    %17 = vector.shape_cast %16 : vector<1x128x384xbf16> to vector<128x384xbf16>
    %cst_16 = arith.constant dense<0.000000e+00> : vector<48x384xf32>
    %18 = tpu.matmul %15, %17, %cst_16 {dimension_numbers = #tpu.dot_dimension_numbers<[1], [0], [0], [1], [0, 0, 1, 1], [], []>} : vector<48x128xbf16>, vector<128x384xbf16>, vector<48x384xf32> -> vector<48x384xf32>
    %c1_17 = arith.constant 1 : index
    %c0_18 = arith.constant 0 : index
    %c0_19 = arith.constant 0 : index
    %19 = vector.load %arg6[%c1_17, %c0_18, %c0_19] : memref<3x1x384xf32, #tpu.memory_space<vmem>>, vector<1x1x384xf32>
    %20 = vector.shape_cast %19 : vector<1x1x384xf32> to vector<1x384xf32>
    %21 = vector.broadcast %20 : vector<1x384xf32> to vector<48x384xf32>
    %22 = arith.addf %18, %21 : vector<48x384xf32>
    %c1_20 = arith.constant 1 : index
    %c0_21 = arith.constant 0 : index
    %c0_22 = arith.constant 0 : index
    %23 = vector.load %arg11[%c1_20, %c0_21, %c0_22] : memref<3x64x384xf32, #tpu.memory_space<vmem>>, vector<1x48x384xf32>
    %24 = vector.shape_cast %23 : vector<1x48x384xf32> to vector<48x384xf32>
    %25 = vector.shape_cast %22 : vector<48x384xf32> to vector<1x48x384xf32>
    tpu.vector_store %arg11[%c1_20, %c0_21, %c0_22], %25 {strides = array<i32>} : memref<3x64x384xf32, #tpu.memory_space<vmem>>, vector<1x48x384xf32>,
    %c0_23 = arith.constant 0 : index
    %c0_24 = arith.constant 0 : index
    %c0_25 = arith.constant 0 : index
    %26 = vector.load %arg3[%c0_23, %c0_24, %c0_25] : memref<4x8x128xf32, #tpu.memory_space<vmem>>, vector<4x8x128xf32>
    %27 = vector.shape_cast %26 : vector<4x8x128xf32> to vector<32x128xf32>
    %28 = arith.truncf %27 : vector<32x128xf32> to vector<32x128xbf16>
    %c2 = arith.constant 2 : index
    %c0_26 = arith.constant 0 : index
    %c0_27 = arith.constant 0 : index
    %29 = vector.load %arg4[%c2, %c0_26, %c0_27] : memref<3x128x384xbf16, #tpu.memory_space<vmem>>, vector<1x128x384xbf16>
    %30 = vector.shape_cast %29 : vector<1x128x384xbf16> to vector<128x384xbf16>
    %cst_28 = arith.constant dense<0.000000e+00> : vector<32x384xf32>
    %31 = tpu.matmul %28, %30, %cst_28 {dimension_numbers = #tpu.dot_dimension_numbers<[1], [0], [0], [1], [0, 0, 1, 1], [], []>} : vector<32x128xbf16>, vector<128x384xbf16>, vector<32x384xf32> -> vector<32x384xf32>
    %c2_29 = arith.constant 2 : index
    %c0_30 = arith.constant 0 : index
    %c0_31 = arith.constant 0 : index
    %32 = vector.load %arg6[%c2_29, %c0_30, %c0_31] : memref<3x1x384xf32, #tpu.memory_space<vmem>>, vector<1x1x384xf32>
    %33 = vector.shape_cast %32 : vector<1x1x384xf32> to vector<1x384xf32>
    %34 = vector.broadcast %33 : vector<1x384xf32> to vector<32x384xf32>
    %35 = arith.addf %31, %34 : vector<32x384xf32>
    %c2_32 = arith.constant 2 : index
    %c0_33 = arith.constant 0 : index
    %c0_34 = arith.constant 0 : index
    %36 = vector.load %arg11[%c2_32, %c0_33, %c0_34] : memref<3x64x384xf32, #tpu.memory_space<vmem>>, vector<1x32x384xf32>
    %37 = vector.shape_cast %36 : vector<1x32x384xf32> to vector<32x384xf32>
    %38 = vector.shape_cast %35 : vector<32x384xf32> to vector<1x32x384xf32>
    tpu.vector_store %arg11[%c2_32, %c0_33, %c0_34], %38 {strides = array<i32>} : memref<3x64x384xf32, #tpu.memory_space<vmem>>, vector<1x32x384xf32>,
    %c0_35 = arith.constant 0 : index
    %c0_36 = arith.constant 0 : index
    %c0_37 = arith.constant 0 : index
    %39 = vector.load %arg7[%c0_35, %c0_36, %c0_37] : memref<3x1x128xf32, #tpu.memory_space<vmem>>, vector<1x1x128xf32>
    %40 = vector.shape_cast %39 : vector<1x1x128xf32> to vector<1x128xf32>
    %41 = vector.shape_cast %40 : vector<1x128xf32> to vector<1x128xf32>
    %42 = vector.broadcast %41 : vector<1x128xf32> to vector<8x128xf32>
    %c1_38 = arith.constant 1 : index
    %c0_39 = arith.constant 0 : index
    %c0_40 = arith.constant 0 : index
    %43 = vector.load %arg7[%c1_38, %c0_39, %c0_40] : memref<3x1x128xf32, #tpu.memory_space<vmem>>, vector<1x1x128xf32>
    %44 = vector.shape_cast %43 : vector<1x1x128xf32> to vector<1x128xf32>
    %45 = vector.shape_cast %44 : vector<1x128xf32> to vector<1x128xf32>
    %46 = vector.broadcast %45 : vector<1x128xf32> to vector<8x128xf32>
    %c2_41 = arith.constant 2 : index
    %c0_42 = arith.constant 0 : index
    %c0_43 = arith.constant 0 : index
    %47 = vector.load %arg7[%c2_41, %c0_42, %c0_43] : memref<3x1x128xf32, #tpu.memory_space<vmem>>, vector<1x1x128xf32>
    %48 = vector.shape_cast %47 : vector<1x1x128xf32> to vector<1x128xf32>
    %49 = vector.shape_cast %48 : vector<1x128xf32> to vector<1x128xf32>
    %50 = vector.broadcast %49 : vector<1x128xf32> to vector<8x128xf32>
    %cst_44 = arith.constant 0.000000e+00 : f32
    %51 = vector.broadcast %cst_44 : f32 to vector<8x128xf32>
    %cst_45 = arith.constant 0.000000e+00 : f32
    %52 = vector.broadcast %cst_45 : f32 to vector<8x128xf32>
    %cst_46 = arith.constant 0.000000e+00 : f32
    %53 = vector.broadcast %cst_46 : f32 to vector<8x128xf32>
    %54 = arith.truncf %51 : vector<8x128xf32> to vector<8x128xbf16>
    %c0_47 = arith.constant 0 : index
    %c0_48 = arith.constant 0 : index
    %c0_49 = arith.constant 0 : index
    %55 = vector.load %arg5[%c0_47, %c0_48, %c0_49] : memref<3x128x384xbf16, #tpu.memory_space<vmem>>, vector<1x128x384xbf16>
    %56 = vector.shape_cast %55 : vector<1x128x384xbf16> to vector<128x384xbf16>
    %cst_50 = arith.constant dense<0.000000e+00> : vector<8x384xf32>
    %57 = tpu.matmul %54, %56, %cst_50 {dimension_numbers = #tpu.dot_dimension_numbers<[1], [0], [0], [1], [0, 0, 1, 1], [], []>} : vector<8x128xbf16>, vector<128x384xbf16>, vector<8x384xf32> -> vector<8x384xf32>
    %58 = arith.truncf %52 : vector<8x128xf32> to vector<8x128xbf16>
    %c1_51 = arith.constant 1 : index
    %c0_52 = arith.constant 0 : index
    %c0_53 = arith.constant 0 : index
    %59 = vector.load %arg5[%c1_51, %c0_52, %c0_53] : memref<3x128x384xbf16, #tpu.memory_space<vmem>>, vector<1x128x384xbf16>
    %60 = vector.shape_cast %59 : vector<1x128x384xbf16> to vector<128x384xbf16>
    %cst_54 = arith.constant dense<0.000000e+00> : vector<8x384xf32>
    %61 = tpu.matmul %58, %60, %cst_54 {dimension_numbers = #tpu.dot_dimension_numbers<[1], [0], [0], [1], [0, 0, 1, 1], [], []>} : vector<8x128xbf16>, vector<128x384xbf16>, vector<8x384xf32> -> vector<8x384xf32>
    %62 = arith.truncf %53 : vector<8x128xf32> to vector<8x128xbf16>
    %c2_55 = arith.constant 2 : index
    %c0_56 = arith.constant 0 : index
    %c0_57 = arith.constant 0 : index
    %63 = vector.load %arg5[%c2_55, %c0_56, %c0_57] : memref<3x128x384xbf16, #tpu.memory_space<vmem>>, vector<1x128x384xbf16>
    %64 = vector.shape_cast %63 : vector<1x128x384xbf16> to vector<128x384xbf16>
    %cst_58 = arith.constant dense<0.000000e+00> : vector<8x384xf32>
    %65 = tpu.matmul %62, %64, %cst_58 {dimension_numbers = #tpu.dot_dimension_numbers<[1], [0], [0], [1], [0, 0, 1, 1], [], []>} : vector<8x128xbf16>, vector<128x384xbf16>, vector<8x384xf32> -> vector<8x384xf32>
    %c0_59 = arith.constant 0 : index
    %c0_60 = arith.constant 0 : index
    %c0_61 = arith.constant 0 : index
    %66 = vector.load %arg11[%c0_59, %c0_60, %c0_61] : memref<3x64x384xf32, #tpu.memory_space<vmem>>, vector<1x8x384xf32>
    %67 = vector.shape_cast %66 : vector<1x8x384xf32> to vector<8x384xf32>
    %68 = vector.extract_strided_slice %67 {offsets = [0, 0], sizes = [8, 128], strides = [1, 1]} : vector<8x384xf32> to vector<8x128xf32>
    %69 = vector.extract_strided_slice %57 {offsets = [0, 0], sizes = [8, 128], strides = [1, 1]} : vector<8x384xf32> to vector<8x128xf32>
    %70 = arith.addf %68, %69 : vector<8x128xf32>
    %71 = arith.negf %70 : vector<8x128xf32>
    %72 = math.exp %71 : vector<8x128xf32>
    %cst_62 = arith.constant 1.000000e+00 : f32
    %73 = vector.broadcast %cst_62 : f32 to vector<8x128xf32>
    %74 = arith.addf %73, %72 : vector<8x128xf32>
    %75 = arith.divf %73, %74 : vector<8x128xf32>
    %76 = vector.extract_strided_slice %67 {offsets = [0, 128], sizes = [8, 128], strides = [1, 1]} : vector<8x384xf32> to vector<8x128xf32>
    %77 = vector.extract_strided_slice %57 {offsets = [0, 128], sizes = [8, 128], strides = [1, 1]} : vector<8x384xf32> to vector<8x128xf32>
    %78 = arith.addf %76, %77 : vector<8x128xf32>
    %79 = arith.negf %78 : vector<8x128xf32>
    %80 = math.exp %79 : vector<8x128xf32>
    %cst_63 = arith.constant 1.000000e+00 : f32
    %81 = vector.broadcast %cst_63 : f32 to vector<8x128xf32>
    %82 = arith.addf %81, %80 : vector<8x128xf32>
    %83 = arith.divf %81, %82 : vector<8x128xf32>
    %84 = vector.extract_strided_slice %67 {offsets = [0, 256], sizes = [8, 128], strides = [1, 1]} : vector<8x384xf32> to vector<8x128xf32>
    %85 = vector.extract_strided_slice %57 {offsets = [0, 256], sizes = [8, 128], strides = [1, 1]} : vector<8x384xf32> to vector<8x128xf32>
    %86 = arith.addf %85, %42 : vector<8x128xf32>
    %87 = arith.mulf %75, %86 : vector<8x128xf32>
    %88 = arith.addf %84, %87 : vector<8x128xf32>
    %89 = math.tanh %88 : vector<8x128xf32>
    %cst_64 = arith.constant 1.000000e+00 : f32
    %90 = vector.broadcast %cst_64 : f32 to vector<8x128xf32>
    %91 = arith.subf %90, %83 : vector<8x128xf32>
    %92 = arith.mulf %91, %89 : vector<8x128xf32>
    %93 = arith.mulf %83, %51 : vector<8x128xf32>
    %94 = arith.addf %92, %93 : vector<8x128xf32>
    %c1_65 = arith.constant 1 : index
    %c0_66 = arith.constant 0 : index
    %c0_67 = arith.constant 0 : index
    %95 = vector.load %arg11[%c1_65, %c0_66, %c0_67] : memref<3x64x384xf32, #tpu.memory_space<vmem>>, vector<1x8x384xf32>
    %96 = vector.shape_cast %95 : vector<1x8x384xf32> to vector<8x384xf32>
    %97 = vector.extract_strided_slice %96 {offsets = [0, 0], sizes = [8, 128], strides = [1, 1]} : vector<8x384xf32> to vector<8x128xf32>
    %98 = vector.extract_strided_slice %61 {offsets = [0, 0], sizes = [8, 128], strides = [1, 1]} : vector<8x384xf32> to vector<8x128xf32>
    %99 = arith.addf %97, %98 : vector<8x128xf32>
    %100 = arith.negf %99 : vector<8x128xf32>
    %101 = math.exp %100 : vector<8x128xf32>
    %cst_68 = arith.constant 1.000000e+00 : f32
    %102 = vector.broadcast %cst_68 : f32 to vector<8x128xf32>
    %103 = arith.addf %102, %101 : vector<8x128xf32>
    %104 = arith.divf %102, %103 : vector<8x128xf32>
    %105 = vector.extract_strided_slice %96 {offsets = [0, 128], sizes = [8, 128], strides = [1, 1]} : vector<8x384xf32> to vector<8x128xf32>
    %106 = vector.extract_strided_slice %61 {offsets = [0, 128], sizes = [8, 128], strides = [1, 1]} : vector<8x384xf32> to vector<8x128xf32>
    %107 = arith.addf %105, %106 : vector<8x128xf32>
    %108 = arith.negf %107 : vector<8x128xf32>
    %109 = math.exp %108 : vector<8x128xf32>
    %cst_69 = arith.constant 1.000000e+00 : f32
    %110 = vector.broadcast %cst_69 : f32 to vector<8x128xf32>
    %111 = arith.addf %110, %109 : vector<8x128xf32>
    %112 = arith.divf %110, %111 : vector<8x128xf32>
    %113 = vector.extract_strided_slice %96 {offsets = [0, 256], sizes = [8, 128], strides = [1, 1]} : vector<8x384xf32> to vector<8x128xf32>
    %114 = vector.extract_strided_slice %61 {offsets = [0, 256], sizes = [8, 128], strides = [1, 1]} : vector<8x384xf32> to vector<8x128xf32>
    %115 = arith.addf %114, %46 : vector<8x128xf32>
    %116 = arith.mulf %104, %115 : vector<8x128xf32>
    %117 = arith.addf %113, %116 : vector<8x128xf32>
    %118 = math.tanh %117 : vector<8x128xf32>
    %cst_70 = arith.constant 1.000000e+00 : f32
    %119 = vector.broadcast %cst_70 : f32 to vector<8x128xf32>
    %120 = arith.subf %119, %112 : vector<8x128xf32>
    %121 = arith.mulf %120, %118 : vector<8x128xf32>
    %122 = arith.mulf %112, %52 : vector<8x128xf32>
    %123 = arith.addf %121, %122 : vector<8x128xf32>
    %c2_71 = arith.constant 2 : index
    %c0_72 = arith.constant 0 : index
    %c0_73 = arith.constant 0 : index
    %124 = vector.load %arg11[%c2_71, %c0_72, %c0_73] : memref<3x64x384xf32, #tpu.memory_space<vmem>>, vector<1x8x384xf32>
    %125 = vector.shape_cast %124 : vector<1x8x384xf32> to vector<8x384xf32>
    %126 = vector.extract_strided_slice %125 {offsets = [0, 0], sizes = [8, 128], strides = [1, 1]} : vector<8x384xf32> to vector<8x128xf32>
    %127 = vector.extract_strided_slice %65 {offsets = [0, 0], sizes = [8, 128], strides = [1, 1]} : vector<8x384xf32> to vector<8x128xf32>
    %128 = arith.addf %126, %127 : vector<8x128xf32>
    %129 = arith.negf %128 : vector<8x128xf32>
    %130 = math.exp %129 : vector<8x128xf32>
    %cst_74 = arith.constant 1.000000e+00 : f32
    %131 = vector.broadcast %cst_74 : f32 to vector<8x128xf32>
    %132 = arith.addf %131, %130 : vector<8x128xf32>
    %133 = arith.divf %131, %132 : vector<8x128xf32>
    %134 = vector.extract_strided_slice %125 {offsets = [0, 128], sizes = [8, 128], strides = [1, 1]} : vector<8x384xf32> to vector<8x128xf32>
    %135 = vector.extract_strided_slice %65 {offsets = [0, 128], sizes = [8, 128], strides = [1, 1]} : vector<8x384xf32> to vector<8x128xf32>
    %136 = arith.addf %134, %135 : vector<8x128xf32>
    %137 = arith.negf %136 : vector<8x128xf32>
    %138 = math.exp %137 : vector<8x128xf32>
    %cst_75 = arith.constant 1.000000e+00 : f32
    %139 = vector.broadcast %cst_75 : f32 to vector<8x128xf32>
    %140 = arith.addf %139, %138 : vector<8x128xf32>
    %141 = arith.divf %139, %140 : vector<8x128xf32>
    %142 = vector.extract_strided_slice %125 {offsets = [0, 256], sizes = [8, 128], strides = [1, 1]} : vector<8x384xf32> to vector<8x128xf32>
    %143 = vector.extract_strided_slice %65 {offsets = [0, 256], sizes = [8, 128], strides = [1, 1]} : vector<8x384xf32> to vector<8x128xf32>
    %144 = arith.addf %143, %50 : vector<8x128xf32>
    %145 = arith.mulf %133, %144 : vector<8x128xf32>
    %146 = arith.addf %142, %145 : vector<8x128xf32>
    %147 = math.tanh %146 : vector<8x128xf32>
    %cst_76 = arith.constant 1.000000e+00 : f32
    %148 = vector.broadcast %cst_76 : f32 to vector<8x128xf32>
    %149 = arith.subf %148, %141 : vector<8x128xf32>
    %150 = arith.mulf %149, %147 : vector<8x128xf32>
    %151 = arith.mulf %141, %53 : vector<8x128xf32>
    %152 = arith.addf %150, %151 : vector<8x128xf32>
    %153 = arith.truncf %94 : vector<8x128xf32> to vector<8x128xbf16>
    %c0_77 = arith.constant 0 : index
    %c0_78 = arith.constant 0 : index
    %c0_79 = arith.constant 0 : index
    %154 = vector.load %arg5[%c0_77, %c0_78, %c0_79] : memref<3x128x384xbf16, #tpu.memory_space<vmem>>, vector<1x128x384xbf16>
    %155 = vector.shape_cast %154 : vector<1x128x384xbf16> to vector<128x384xbf16>
    %cst_80 = arith.constant dense<0.000000e+00> : vector<8x384xf32>
    %156 = tpu.matmul %153, %155, %cst_80 {dimension_numbers = #tpu.dot_dimension_numbers<[1], [0], [0], [1], [0, 0, 1, 1], [], []>} : vector<8x128xbf16>, vector<128x384xbf16>, vector<8x384xf32> -> vector<8x384xf32>
    %157 = arith.truncf %123 : vector<8x128xf32> to vector<8x128xbf16>
    %c1_81 = arith.constant 1 : index
    %c0_82 = arith.constant 0 : index
    %c0_83 = arith.constant 0 : index
    %158 = vector.load %arg5[%c1_81, %c0_82, %c0_83] : memref<3x128x384xbf16, #tpu.memory_space<vmem>>, vector<1x128x384xbf16>
    %159 = vector.shape_cast %158 : vector<1x128x384xbf16> to vector<128x384xbf16>
    %cst_84 = arith.constant dense<0.000000e+00> : vector<8x384xf32>
    %160 = tpu.matmul %157, %159, %cst_84 {dimension_numbers = #tpu.dot_dimension_numbers<[1], [0], [0], [1], [0, 0, 1, 1], [], []>} : vector<8x128xbf16>, vector<128x384xbf16>, vector<8x384xf32> -> vector<8x384xf32>
    %161 = arith.truncf %152 : vector<8x128xf32> to vector<8x128xbf16>
    %c2_85 = arith.constant 2 : index
    %c0_86 = arith.constant 0 : index
    %c0_87 = arith.constant 0 : index
    %162 = vector.load %arg5[%c2_85, %c0_86, %c0_87] : memref<3x128x384xbf16, #tpu.memory_space<vmem>>, vector<1x128x384xbf16>
    %163 = vector.shape_cast %162 : vector<1x128x384xbf16> to vector<128x384xbf16>
    %cst_88 = arith.constant dense<0.000000e+00> : vector<8x384xf32>
    %164 = tpu.matmul %161, %163, %cst_88 {dimension_numbers = #tpu.dot_dimension_numbers<[1], [0], [0], [1], [0, 0, 1, 1], [], []>} : vector<8x128xbf16>, vector<128x384xbf16>, vector<8x384xf32> -> vector<8x384xf32>
    %c0_89 = arith.constant 0 : index
    %c8 = arith.constant 8 : index
    %c0_90 = arith.constant 0 : index
    %165 = vector.load %arg11[%c0_89, %c8, %c0_90] : memref<3x64x384xf32, #tpu.memory_space<vmem>>, vector<1x8x384xf32>
    %166 = vector.shape_cast %165 : vector<1x8x384xf32> to vector<8x384xf32>
    %167 = vector.extract_strided_slice %166 {offsets = [0, 0], sizes = [8, 128], strides = [1, 1]} : vector<8x384xf32> to vector<8x128xf32>
    %168 = vector.extract_strided_slice %156 {offsets = [0, 0], sizes = [8, 128], strides = [1, 1]} : vector<8x384xf32> to vector<8x128xf32>
    %169 = arith.addf %167, %168 : vector<8x128xf32>
    %170 = arith.negf %169 : vector<8x128xf32>
    %171 = math.exp %170 : vector<8x128xf32>
    %cst_91 = arith.constant 1.000000e+00 : f32
    %172 = vector.broadcast %cst_91 : f32 to vector<8x128xf32>
    %173 = arith.addf %172, %171 : vector<8x128xf32>
    %174 = arith.divf %172, %173 : vector<8x128xf32>
    %175 = vector.extract_strided_slice %166 {offsets = [0, 128], sizes = [8, 128], strides = [1, 1]} : vector<8x384xf32> to vector<8x128xf32>
    %176 = vector.extract_strided_slice %156 {offsets = [0, 128], sizes = [8, 128], strides = [1, 1]} : vector<8x384xf32> to vector<8x128xf32>
    %177 = arith.addf %175, %176 : vector<8x128xf32>
    %178 = arith.negf %177 : vector<8x128xf32>
    %179 = math.exp %178 : vector<8x128xf32>
    %cst_92 = arith.constant 1.000000e+00 : f32
    %180 = vector.broadcast %cst_92 : f32 to vector<8x128xf32>
    %181 = arith.addf %180, %179 : vector<8x128xf32>
    %182 = arith.divf %180, %181 : vector<8x128xf32>
    %183 = vector.extract_strided_slice %166 {offsets = [0, 256], sizes = [8, 128], strides = [1, 1]} : vector<8x384xf32> to vector<8x128xf32>
    %184 = vector.extract_strided_slice %156 {offsets = [0, 256], sizes = [8, 128], strides = [1, 1]} : vector<8x384xf32> to vector<8x128xf32>
    %185 = arith.addf %184, %42 : vector<8x128xf32>
    %186 = arith.mulf %174, %185 : vector<8x128xf32>
    %187 = arith.addf %183, %186 : vector<8x128xf32>
    %188 = math.tanh %187 : vector<8x128xf32>
    %cst_93 = arith.constant 1.000000e+00 : f32
    %189 = vector.broadcast %cst_93 : f32 to vector<8x128xf32>
    %190 = arith.subf %189, %182 : vector<8x128xf32>
    %191 = arith.mulf %190, %188 : vector<8x128xf32>
    %192 = arith.mulf %182, %94 : vector<8x128xf32>
    %193 = arith.addf %191, %192 : vector<8x128xf32>
    %c1_94 = arith.constant 1 : index
    %c8_95 = arith.constant 8 : index
    %c0_96 = arith.constant 0 : index
    %194 = vector.load %arg11[%c1_94, %c8_95, %c0_96] : memref<3x64x384xf32, #tpu.memory_space<vmem>>, vector<1x8x384xf32>
    %195 = vector.shape_cast %194 : vector<1x8x384xf32> to vector<8x384xf32>
    %196 = vector.extract_strided_slice %195 {offsets = [0, 0], sizes = [8, 128], strides = [1, 1]} : vector<8x384xf32> to vector<8x128xf32>
    %197 = vector.extract_strided_slice %160 {offsets = [0, 0], sizes = [8, 128], strides = [1, 1]} : vector<8x384xf32> to vector<8x128xf32>
    %198 = arith.addf %196, %197 : vector<8x128xf32>
    %199 = arith.negf %198 : vector<8x128xf32>
    %200 = math.exp %199 : vector<8x128xf32>
    %cst_97 = arith.constant 1.000000e+00 : f32
    %201 = vector.broadcast %cst_97 : f32 to vector<8x128xf32>
    %202 = arith.addf %201, %200 : vector<8x128xf32>
    %203 = arith.divf %201, %202 : vector<8x128xf32>
    %204 = vector.extract_strided_slice %195 {offsets = [0, 128], sizes = [8, 128], strides = [1, 1]} : vector<8x384xf32> to vector<8x128xf32>
    %205 = vector.extract_strided_slice %160 {offsets = [0, 128], sizes = [8, 128], strides = [1, 1]} : vector<8x384xf32> to vector<8x128xf32>
    %206 = arith.addf %204, %205 : vector<8x128xf32>
    %207 = arith.negf %206 : vector<8x128xf32>
    %208 = math.exp %207 : vector<8x128xf32>
    %cst_98 = arith.constant 1.000000e+00 : f32
    %209 = vector.broadcast %cst_98 : f32 to vector<8x128xf32>
    %210 = arith.addf %209, %208 : vector<8x128xf32>
    %211 = arith.divf %209, %210 : vector<8x128xf32>
    %212 = vector.extract_strided_slice %195 {offsets = [0, 256], sizes = [8, 128], strides = [1, 1]} : vector<8x384xf32> to vector<8x128xf32>
    %213 = vector.extract_strided_slice %160 {offsets = [0, 256], sizes = [8, 128], strides = [1, 1]} : vector<8x384xf32> to vector<8x128xf32>
    %214 = arith.addf %213, %46 : vector<8x128xf32>
    %215 = arith.mulf %203, %214 : vector<8x128xf32>
    %216 = arith.addf %212, %215 : vector<8x128xf32>
    %217 = math.tanh %216 : vector<8x128xf32>
    %cst_99 = arith.constant 1.000000e+00 : f32
    %218 = vector.broadcast %cst_99 : f32 to vector<8x128xf32>
    %219 = arith.subf %218, %211 : vector<8x128xf32>
    %220 = arith.mulf %219, %217 : vector<8x128xf32>
    %221 = arith.mulf %211, %123 : vector<8x128xf32>
    %222 = arith.addf %220, %221 : vector<8x128xf32>
    %c2_100 = arith.constant 2 : index
    %c8_101 = arith.constant 8 : index
    %c0_102 = arith.constant 0 : index
    %223 = vector.load %arg11[%c2_100, %c8_101, %c0_102] : memref<3x64x384xf32, #tpu.memory_space<vmem>>, vector<1x8x384xf32>
    %224 = vector.shape_cast %223 : vector<1x8x384xf32> to vector<8x384xf32>
    %225 = vector.extract_strided_slice %224 {offsets = [0, 0], sizes = [8, 128], strides = [1, 1]} : vector<8x384xf32> to vector<8x128xf32>
    %226 = vector.extract_strided_slice %164 {offsets = [0, 0], sizes = [8, 128], strides = [1, 1]} : vector<8x384xf32> to vector<8x128xf32>
    %227 = arith.addf %225, %226 : vector<8x128xf32>
    %228 = arith.negf %227 : vector<8x128xf32>
    %229 = math.exp %228 : vector<8x128xf32>
    %cst_103 = arith.constant 1.000000e+00 : f32
    %230 = vector.broadcast %cst_103 : f32 to vector<8x128xf32>
    %231 = arith.addf %230, %229 : vector<8x128xf32>
    %232 = arith.divf %230, %231 : vector<8x128xf32>
    %233 = vector.extract_strided_slice %224 {offsets = [0, 128], sizes = [8, 128], strides = [1, 1]} : vector<8x384xf32> to vector<8x128xf32>
    %234 = vector.extract_strided_slice %164 {offsets = [0, 128], sizes = [8, 128], strides = [1, 1]} : vector<8x384xf32> to vector<8x128xf32>
    %235 = arith.addf %233, %234 : vector<8x128xf32>
    %236 = arith.negf %235 : vector<8x128xf32>
    %237 = math.exp %236 : vector<8x128xf32>
    %cst_104 = arith.constant 1.000000e+00 : f32
    %238 = vector.broadcast %cst_104 : f32 to vector<8x128xf32>
    %239 = arith.addf %238, %237 : vector<8x128xf32>
    %240 = arith.divf %238, %239 : vector<8x128xf32>
    %241 = vector.extract_strided_slice %224 {offsets = [0, 256], sizes = [8, 128], strides = [1, 1]} : vector<8x384xf32> to vector<8x128xf32>
    %242 = vector.extract_strided_slice %164 {offsets = [0, 256], sizes = [8, 128], strides = [1, 1]} : vector<8x384xf32> to vector<8x128xf32>
    %243 = arith.addf %242, %50 : vector<8x128xf32>
    %244 = arith.mulf %232, %243 : vector<8x128xf32>
    %245 = arith.addf %241, %244 : vector<8x128xf32>
    %246 = math.tanh %245 : vector<8x128xf32>
    %cst_105 = arith.constant 1.000000e+00 : f32
    %247 = vector.broadcast %cst_105 : f32 to vector<8x128xf32>
    %248 = arith.subf %247, %240 : vector<8x128xf32>
    %249 = arith.mulf %248, %246 : vector<8x128xf32>
    %250 = arith.mulf %240, %152 : vector<8x128xf32>
    %251 = arith.addf %249, %250 : vector<8x128xf32>
    %252 = arith.truncf %193 : vector<8x128xf32> to vector<8x128xbf16>
    %c0_106 = arith.constant 0 : index
    %c0_107 = arith.constant 0 : index
    %c0_108 = arith.constant 0 : index
    %253 = vector.load %arg5[%c0_106, %c0_107, %c0_108] : memref<3x128x384xbf16, #tpu.memory_space<vmem>>, vector<1x128x384xbf16>
    %254 = vector.shape_cast %253 : vector<1x128x384xbf16> to vector<128x384xbf16>
    %cst_109 = arith.constant dense<0.000000e+00> : vector<8x384xf32>
    %255 = tpu.matmul %252, %254, %cst_109 {dimension_numbers = #tpu.dot_dimension_numbers<[1], [0], [0], [1], [0, 0, 1, 1], [], []>} : vector<8x128xbf16>, vector<128x384xbf16>, vector<8x384xf32> -> vector<8x384xf32>
    %256 = arith.truncf %222 : vector<8x128xf32> to vector<8x128xbf16>
    %c1_110 = arith.constant 1 : index
    %c0_111 = arith.constant 0 : index
    %c0_112 = arith.constant 0 : index
    %257 = vector.load %arg5[%c1_110, %c0_111, %c0_112] : memref<3x128x384xbf16, #tpu.memory_space<vmem>>, vector<1x128x384xbf16>
    %258 = vector.shape_cast %257 : vector<1x128x384xbf16> to vector<128x384xbf16>
    %cst_113 = arith.constant dense<0.000000e+00> : vector<8x384xf32>
    %259 = tpu.matmul %256, %258, %cst_113 {dimension_numbers = #tpu.dot_dimension_numbers<[1], [0], [0], [1], [0, 0, 1, 1], [], []>} : vector<8x128xbf16>, vector<128x384xbf16>, vector<8x384xf32> -> vector<8x384xf32>
    %260 = arith.truncf %251 : vector<8x128xf32> to vector<8x128xbf16>
    %c2_114 = arith.constant 2 : index
    %c0_115 = arith.constant 0 : index
    %c0_116 = arith.constant 0 : index
    %261 = vector.load %arg5[%c2_114, %c0_115, %c0_116] : memref<3x128x384xbf16, #tpu.memory_space<vmem>>, vector<1x128x384xbf16>
    %262 = vector.shape_cast %261 : vector<1x128x384xbf16> to vector<128x384xbf16>
    %cst_117 = arith.constant dense<0.000000e+00> : vector<8x384xf32>
    %263 = tpu.matmul %260, %262, %cst_117 {dimension_numbers = #tpu.dot_dimension_numbers<[1], [0], [0], [1], [0, 0, 1, 1], [], []>} : vector<8x128xbf16>, vector<128x384xbf16>, vector<8x384xf32> -> vector<8x384xf32>
    %c0_118 = arith.constant 0 : index
    %c16 = arith.constant 16 : index
    %c0_119 = arith.constant 0 : index
    %264 = vector.load %arg11[%c0_118, %c16, %c0_119] : memref<3x64x384xf32, #tpu.memory_space<vmem>>, vector<1x8x384xf32>
    %265 = vector.shape_cast %264 : vector<1x8x384xf32> to vector<8x384xf32>
    %266 = vector.extract_strided_slice %265 {offsets = [0, 0], sizes = [8, 128], strides = [1, 1]} : vector<8x384xf32> to vector<8x128xf32>
    %267 = vector.extract_strided_slice %255 {offsets = [0, 0], sizes = [8, 128], strides = [1, 1]} : vector<8x384xf32> to vector<8x128xf32>
    %268 = arith.addf %266, %267 : vector<8x128xf32>
    %269 = arith.negf %268 : vector<8x128xf32>
    %270 = math.exp %269 : vector<8x128xf32>
    %cst_120 = arith.constant 1.000000e+00 : f32
    %271 = vector.broadcast %cst_120 : f32 to vector<8x128xf32>
    %272 = arith.addf %271, %270 : vector<8x128xf32>
    %273 = arith.divf %271, %272 : vector<8x128xf32>
    %274 = vector.extract_strided_slice %265 {offsets = [0, 128], sizes = [8, 128], strides = [1, 1]} : vector<8x384xf32> to vector<8x128xf32>
    %275 = vector.extract_strided_slice %255 {offsets = [0, 128], sizes = [8, 128], strides = [1, 1]} : vector<8x384xf32> to vector<8x128xf32>
    %276 = arith.addf %274, %275 : vector<8x128xf32>
    %277 = arith.negf %276 : vector<8x128xf32>
    %278 = math.exp %277 : vector<8x128xf32>
    %cst_121 = arith.constant 1.000000e+00 : f32
    %279 = vector.broadcast %cst_121 : f32 to vector<8x128xf32>
    %280 = arith.addf %279, %278 : vector<8x128xf32>
    %281 = arith.divf %279, %280 : vector<8x128xf32>
    %282 = vector.extract_strided_slice %265 {offsets = [0, 256], sizes = [8, 128], strides = [1, 1]} : vector<8x384xf32> to vector<8x128xf32>
    %283 = vector.extract_strided_slice %255 {offsets = [0, 256], sizes = [8, 128], strides = [1, 1]} : vector<8x384xf32> to vector<8x128xf32>
    %284 = arith.addf %283, %42 : vector<8x128xf32>
    %285 = arith.mulf %273, %284 : vector<8x128xf32>
    %286 = arith.addf %282, %285 : vector<8x128xf32>
    %287 = math.tanh %286 : vector<8x128xf32>
    %cst_122 = arith.constant 1.000000e+00 : f32
    %288 = vector.broadcast %cst_122 : f32 to vector<8x128xf32>
    %289 = arith.subf %288, %281 : vector<8x128xf32>
    %290 = arith.mulf %289, %287 : vector<8x128xf32>
    %291 = arith.mulf %281, %193 : vector<8x128xf32>
    %292 = arith.addf %290, %291 : vector<8x128xf32>
    %c1_123 = arith.constant 1 : index
    %c16_124 = arith.constant 16 : index
    %c0_125 = arith.constant 0 : index
    %293 = vector.load %arg11[%c1_123, %c16_124, %c0_125] : memref<3x64x384xf32, #tpu.memory_space<vmem>>, vector<1x8x384xf32>
    %294 = vector.shape_cast %293 : vector<1x8x384xf32> to vector<8x384xf32>
    %295 = vector.extract_strided_slice %294 {offsets = [0, 0], sizes = [8, 128], strides = [1, 1]} : vector<8x384xf32> to vector<8x128xf32>
    %296 = vector.extract_strided_slice %259 {offsets = [0, 0], sizes = [8, 128], strides = [1, 1]} : vector<8x384xf32> to vector<8x128xf32>
    %297 = arith.addf %295, %296 : vector<8x128xf32>
    %298 = arith.negf %297 : vector<8x128xf32>
    %299 = math.exp %298 : vector<8x128xf32>
    %cst_126 = arith.constant 1.000000e+00 : f32
    %300 = vector.broadcast %cst_126 : f32 to vector<8x128xf32>
    %301 = arith.addf %300, %299 : vector<8x128xf32>
    %302 = arith.divf %300, %301 : vector<8x128xf32>
    %303 = vector.extract_strided_slice %294 {offsets = [0, 128], sizes = [8, 128], strides = [1, 1]} : vector<8x384xf32> to vector<8x128xf32>
    %304 = vector.extract_strided_slice %259 {offsets = [0, 128], sizes = [8, 128], strides = [1, 1]} : vector<8x384xf32> to vector<8x128xf32>
    %305 = arith.addf %303, %304 : vector<8x128xf32>
    %306 = arith.negf %305 : vector<8x128xf32>
    %307 = math.exp %306 : vector<8x128xf32>
    %cst_127 = arith.constant 1.000000e+00 : f32
    %308 = vector.broadcast %cst_127 : f32 to vector<8x128xf32>
    %309 = arith.addf %308, %307 : vector<8x128xf32>
    %310 = arith.divf %308, %309 : vector<8x128xf32>
    %311 = vector.extract_strided_slice %294 {offsets = [0, 256], sizes = [8, 128], strides = [1, 1]} : vector<8x384xf32> to vector<8x128xf32>
    %312 = vector.extract_strided_slice %259 {offsets = [0, 256], sizes = [8, 128], strides = [1, 1]} : vector<8x384xf32> to vector<8x128xf32>
    %313 = arith.addf %312, %46 : vector<8x128xf32>
    %314 = arith.mulf %302, %313 : vector<8x128xf32>
    %315 = arith.addf %311, %314 : vector<8x128xf32>
    %316 = math.tanh %315 : vector<8x128xf32>
    %cst_128 = arith.constant 1.000000e+00 : f32
    %317 = vector.broadcast %cst_128 : f32 to vector<8x128xf32>
    %318 = arith.subf %317, %310 : vector<8x128xf32>
    %319 = arith.mulf %318, %316 : vector<8x128xf32>
    %320 = arith.mulf %310, %222 : vector<8x128xf32>
    %321 = arith.addf %319, %320 : vector<8x128xf32>
    %c2_129 = arith.constant 2 : index
    %c16_130 = arith.constant 16 : index
    %c0_131 = arith.constant 0 : index
    %322 = vector.load %arg11[%c2_129, %c16_130, %c0_131] : memref<3x64x384xf32, #tpu.memory_space<vmem>>, vector<1x8x384xf32>
    %323 = vector.shape_cast %322 : vector<1x8x384xf32> to vector<8x384xf32>
    %324 = vector.extract_strided_slice %323 {offsets = [0, 0], sizes = [8, 128], strides = [1, 1]} : vector<8x384xf32> to vector<8x128xf32>
    %325 = vector.extract_strided_slice %263 {offsets = [0, 0], sizes = [8, 128], strides = [1, 1]} : vector<8x384xf32> to vector<8x128xf32>
    %326 = arith.addf %324, %325 : vector<8x128xf32>
    %327 = arith.negf %326 : vector<8x128xf32>
    %328 = math.exp %327 : vector<8x128xf32>
    %cst_132 = arith.constant 1.000000e+00 : f32
    %329 = vector.broadcast %cst_132 : f32 to vector<8x128xf32>
    %330 = arith.addf %329, %328 : vector<8x128xf32>
    %331 = arith.divf %329, %330 : vector<8x128xf32>
    %332 = vector.extract_strided_slice %323 {offsets = [0, 128], sizes = [8, 128], strides = [1, 1]} : vector<8x384xf32> to vector<8x128xf32>
    %333 = vector.extract_strided_slice %263 {offsets = [0, 128], sizes = [8, 128], strides = [1, 1]} : vector<8x384xf32> to vector<8x128xf32>
    %334 = arith.addf %332, %333 : vector<8x128xf32>
    %335 = arith.negf %334 : vector<8x128xf32>
    %336 = math.exp %335 : vector<8x128xf32>
    %cst_133 = arith.constant 1.000000e+00 : f32
    %337 = vector.broadcast %cst_133 : f32 to vector<8x128xf32>
    %338 = arith.addf %337, %336 : vector<8x128xf32>
    %339 = arith.divf %337, %338 : vector<8x128xf32>
    %340 = vector.extract_strided_slice %323 {offsets = [0, 256], sizes = [8, 128], strides = [1, 1]} : vector<8x384xf32> to vector<8x128xf32>
    %341 = vector.extract_strided_slice %263 {offsets = [0, 256], sizes = [8, 128], strides = [1, 1]} : vector<8x384xf32> to vector<8x128xf32>
    %342 = arith.addf %341, %50 : vector<8x128xf32>
    %343 = arith.mulf %331, %342 : vector<8x128xf32>
    %344 = arith.addf %340, %343 : vector<8x128xf32>
    %345 = math.tanh %344 : vector<8x128xf32>
    %cst_134 = arith.constant 1.000000e+00 : f32
    %346 = vector.broadcast %cst_134 : f32 to vector<8x128xf32>
    %347 = arith.subf %346, %339 : vector<8x128xf32>
    %348 = arith.mulf %347, %345 : vector<8x128xf32>
    %349 = arith.mulf %339, %251 : vector<8x128xf32>
    %350 = arith.addf %348, %349 : vector<8x128xf32>
    %351 = arith.truncf %292 : vector<8x128xf32> to vector<8x128xbf16>
    %c0_135 = arith.constant 0 : index
    %c0_136 = arith.constant 0 : index
    %c0_137 = arith.constant 0 : index
    %352 = vector.load %arg5[%c0_135, %c0_136, %c0_137] : memref<3x128x384xbf16, #tpu.memory_space<vmem>>, vector<1x128x384xbf16>
    %353 = vector.shape_cast %352 : vector<1x128x384xbf16> to vector<128x384xbf16>
    %cst_138 = arith.constant dense<0.000000e+00> : vector<8x384xf32>
    %354 = tpu.matmul %351, %353, %cst_138 {dimension_numbers = #tpu.dot_dimension_numbers<[1], [0], [0], [1], [0, 0, 1, 1], [], []>} : vector<8x128xbf16>, vector<128x384xbf16>, vector<8x384xf32> -> vector<8x384xf32>
    %355 = arith.truncf %321 : vector<8x128xf32> to vector<8x128xbf16>
    %c1_139 = arith.constant 1 : index
    %c0_140 = arith.constant 0 : index
    %c0_141 = arith.constant 0 : index
    %356 = vector.load %arg5[%c1_139, %c0_140, %c0_141] : memref<3x128x384xbf16, #tpu.memory_space<vmem>>, vector<1x128x384xbf16>
    %357 = vector.shape_cast %356 : vector<1x128x384xbf16> to vector<128x384xbf16>
    %cst_142 = arith.constant dense<0.000000e+00> : vector<8x384xf32>
    %358 = tpu.matmul %355, %357, %cst_142 {dimension_numbers = #tpu.dot_dimension_numbers<[1], [0], [0], [1], [0, 0, 1, 1], [], []>} : vector<8x128xbf16>, vector<128x384xbf16>, vector<8x384xf32> -> vector<8x384xf32>
    %359 = arith.truncf %350 : vector<8x128xf32> to vector<8x128xbf16>
    %c2_143 = arith.constant 2 : index
    %c0_144 = arith.constant 0 : index
    %c0_145 = arith.constant 0 : index
    %360 = vector.load %arg5[%c2_143, %c0_144, %c0_145] : memref<3x128x384xbf16, #tpu.memory_space<vmem>>, vector<1x128x384xbf16>
    %361 = vector.shape_cast %360 : vector<1x128x384xbf16> to vector<128x384xbf16>
    %cst_146 = arith.constant dense<0.000000e+00> : vector<8x384xf32>
    %362 = tpu.matmul %359, %361, %cst_146 {dimension_numbers = #tpu.dot_dimension_numbers<[1], [0], [0], [1], [0, 0, 1, 1], [], []>} : vector<8x128xbf16>, vector<128x384xbf16>, vector<8x384xf32> -> vector<8x384xf32>
    %c0_147 = arith.constant 0 : index
    %c24 = arith.constant 24 : index
    %c0_148 = arith.constant 0 : index
    %363 = vector.load %arg11[%c0_147, %c24, %c0_148] : memref<3x64x384xf32, #tpu.memory_space<vmem>>, vector<1x8x384xf32>
    %364 = vector.shape_cast %363 : vector<1x8x384xf32> to vector<8x384xf32>
    %365 = vector.extract_strided_slice %364 {offsets = [0, 0], sizes = [8, 128], strides = [1, 1]} : vector<8x384xf32> to vector<8x128xf32>
    %366 = vector.extract_strided_slice %354 {offsets = [0, 0], sizes = [8, 128], strides = [1, 1]} : vector<8x384xf32> to vector<8x128xf32>
    %367 = arith.addf %365, %366 : vector<8x128xf32>
    %368 = arith.negf %367 : vector<8x128xf32>
    %369 = math.exp %368 : vector<8x128xf32>
    %cst_149 = arith.constant 1.000000e+00 : f32
    %370 = vector.broadcast %cst_149 : f32 to vector<8x128xf32>
    %371 = arith.addf %370, %369 : vector<8x128xf32>
    %372 = arith.divf %370, %371 : vector<8x128xf32>
    %373 = vector.extract_strided_slice %364 {offsets = [0, 128], sizes = [8, 128], strides = [1, 1]} : vector<8x384xf32> to vector<8x128xf32>
    %374 = vector.extract_strided_slice %354 {offsets = [0, 128], sizes = [8, 128], strides = [1, 1]} : vector<8x384xf32> to vector<8x128xf32>
    %375 = arith.addf %373, %374 : vector<8x128xf32>
    %376 = arith.negf %375 : vector<8x128xf32>
    %377 = math.exp %376 : vector<8x128xf32>
    %cst_150 = arith.constant 1.000000e+00 : f32
    %378 = vector.broadcast %cst_150 : f32 to vector<8x128xf32>
    %379 = arith.addf %378, %377 : vector<8x128xf32>
    %380 = arith.divf %378, %379 : vector<8x128xf32>
    %381 = vector.extract_strided_slice %364 {offsets = [0, 256], sizes = [8, 128], strides = [1, 1]} : vector<8x384xf32> to vector<8x128xf32>
    %382 = vector.extract_strided_slice %354 {offsets = [0, 256], sizes = [8, 128], strides = [1, 1]} : vector<8x384xf32> to vector<8x128xf32>
    %383 = arith.addf %382, %42 : vector<8x128xf32>
    %384 = arith.mulf %372, %383 : vector<8x128xf32>
    %385 = arith.addf %381, %384 : vector<8x128xf32>
    %386 = math.tanh %385 : vector<8x128xf32>
    %cst_151 = arith.constant 1.000000e+00 : f32
    %387 = vector.broadcast %cst_151 : f32 to vector<8x128xf32>
    %388 = arith.subf %387, %380 : vector<8x128xf32>
    %389 = arith.mulf %388, %386 : vector<8x128xf32>
    %390 = arith.mulf %380, %292 : vector<8x128xf32>
    %391 = arith.addf %389, %390 : vector<8x128xf32>
    %c1_152 = arith.constant 1 : index
    %c24_153 = arith.constant 24 : index
    %c0_154 = arith.constant 0 : index
    %392 = vector.load %arg11[%c1_152, %c24_153, %c0_154] : memref<3x64x384xf32, #tpu.memory_space<vmem>>, vector<1x8x384xf32>
    %393 = vector.shape_cast %392 : vector<1x8x384xf32> to vector<8x384xf32>
    %394 = vector.extract_strided_slice %393 {offsets = [0, 0], sizes = [8, 128], strides = [1, 1]} : vector<8x384xf32> to vector<8x128xf32>
    %395 = vector.extract_strided_slice %358 {offsets = [0, 0], sizes = [8, 128], strides = [1, 1]} : vector<8x384xf32> to vector<8x128xf32>
    %396 = arith.addf %394, %395 : vector<8x128xf32>
    %397 = arith.negf %396 : vector<8x128xf32>
    %398 = math.exp %397 : vector<8x128xf32>
    %cst_155 = arith.constant 1.000000e+00 : f32
    %399 = vector.broadcast %cst_155 : f32 to vector<8x128xf32>
    %400 = arith.addf %399, %398 : vector<8x128xf32>
    %401 = arith.divf %399, %400 : vector<8x128xf32>
    %402 = vector.extract_strided_slice %393 {offsets = [0, 128], sizes = [8, 128], strides = [1, 1]} : vector<8x384xf32> to vector<8x128xf32>
    %403 = vector.extract_strided_slice %358 {offsets = [0, 128], sizes = [8, 128], strides = [1, 1]} : vector<8x384xf32> to vector<8x128xf32>
    %404 = arith.addf %402, %403 : vector<8x128xf32>
    %405 = arith.negf %404 : vector<8x128xf32>
    %406 = math.exp %405 : vector<8x128xf32>
    %cst_156 = arith.constant 1.000000e+00 : f32
    %407 = vector.broadcast %cst_156 : f32 to vector<8x128xf32>
    %408 = arith.addf %407, %406 : vector<8x128xf32>
    %409 = arith.divf %407, %408 : vector<8x128xf32>
    %410 = vector.extract_strided_slice %393 {offsets = [0, 256], sizes = [8, 128], strides = [1, 1]} : vector<8x384xf32> to vector<8x128xf32>
    %411 = vector.extract_strided_slice %358 {offsets = [0, 256], sizes = [8, 128], strides = [1, 1]} : vector<8x384xf32> to vector<8x128xf32>
    %412 = arith.addf %411, %46 : vector<8x128xf32>
    %413 = arith.mulf %401, %412 : vector<8x128xf32>
    %414 = arith.addf %410, %413 : vector<8x128xf32>
    %415 = math.tanh %414 : vector<8x128xf32>
    %cst_157 = arith.constant 1.000000e+00 : f32
    %416 = vector.broadcast %cst_157 : f32 to vector<8x128xf32>
    %417 = arith.subf %416, %409 : vector<8x128xf32>
    %418 = arith.mulf %417, %415 : vector<8x128xf32>
    %419 = arith.mulf %409, %321 : vector<8x128xf32>
    %420 = arith.addf %418, %419 : vector<8x128xf32>
    %c2_158 = arith.constant 2 : index
    %c24_159 = arith.constant 24 : index
    %c0_160 = arith.constant 0 : index
    %421 = vector.load %arg11[%c2_158, %c24_159, %c0_160] : memref<3x64x384xf32, #tpu.memory_space<vmem>>, vector<1x8x384xf32>
    %422 = vector.shape_cast %421 : vector<1x8x384xf32> to vector<8x384xf32>
    %423 = vector.extract_strided_slice %422 {offsets = [0, 0], sizes = [8, 128], strides = [1, 1]} : vector<8x384xf32> to vector<8x128xf32>
    %424 = vector.extract_strided_slice %362 {offsets = [0, 0], sizes = [8, 128], strides = [1, 1]} : vector<8x384xf32> to vector<8x128xf32>
    %425 = arith.addf %423, %424 : vector<8x128xf32>
    %426 = arith.negf %425 : vector<8x128xf32>
    %427 = math.exp %426 : vector<8x128xf32>
    %cst_161 = arith.constant 1.000000e+00 : f32
    %428 = vector.broadcast %cst_161 : f32 to vector<8x128xf32>
    %429 = arith.addf %428, %427 : vector<8x128xf32>
    %430 = arith.divf %428, %429 : vector<8x128xf32>
    %431 = vector.extract_strided_slice %422 {offsets = [0, 128], sizes = [8, 128], strides = [1, 1]} : vector<8x384xf32> to vector<8x128xf32>
    %432 = vector.extract_strided_slice %362 {offsets = [0, 128], sizes = [8, 128], strides = [1, 1]} : vector<8x384xf32> to vector<8x128xf32>
    %433 = arith.addf %431, %432 : vector<8x128xf32>
    %434 = arith.negf %433 : vector<8x128xf32>
    %435 = math.exp %434 : vector<8x128xf32>
    %cst_162 = arith.constant 1.000000e+00 : f32
    %436 = vector.broadcast %cst_162 : f32 to vector<8x128xf32>
    %437 = arith.addf %436, %435 : vector<8x128xf32>
    %438 = arith.divf %436, %437 : vector<8x128xf32>
    %439 = vector.extract_strided_slice %422 {offsets = [0, 256], sizes = [8, 128], strides = [1, 1]} : vector<8x384xf32> to vector<8x128xf32>
    %440 = vector.extract_strided_slice %362 {offsets = [0, 256], sizes = [8, 128], strides = [1, 1]} : vector<8x384xf32> to vector<8x128xf32>
    %441 = arith.addf %440, %50 : vector<8x128xf32>
    %442 = arith.mulf %430, %441 : vector<8x128xf32>
    %443 = arith.addf %439, %442 : vector<8x128xf32>
    %444 = math.tanh %443 : vector<8x128xf32>
    %cst_163 = arith.constant 1.000000e+00 : f32
    %445 = vector.broadcast %cst_163 : f32 to vector<8x128xf32>
    %446 = arith.subf %445, %438 : vector<8x128xf32>
    %447 = arith.mulf %446, %444 : vector<8x128xf32>
    %448 = arith.mulf %438, %350 : vector<8x128xf32>
    %449 = arith.addf %447, %448 : vector<8x128xf32>
    %450 = arith.truncf %391 : vector<8x128xf32> to vector<8x128xbf16>
    %c0_164 = arith.constant 0 : index
    %c0_165 = arith.constant 0 : index
    %c0_166 = arith.constant 0 : index
    %451 = vector.load %arg5[%c0_164, %c0_165, %c0_166] : memref<3x128x384xbf16, #tpu.memory_space<vmem>>, vector<1x128x384xbf16>
    %452 = vector.shape_cast %451 : vector<1x128x384xbf16> to vector<128x384xbf16>
    %cst_167 = arith.constant dense<0.000000e+00> : vector<8x384xf32>
    %453 = tpu.matmul %450, %452, %cst_167 {dimension_numbers = #tpu.dot_dimension_numbers<[1], [0], [0], [1], [0, 0, 1, 1], [], []>} : vector<8x128xbf16>, vector<128x384xbf16>, vector<8x384xf32> -> vector<8x384xf32>
    %454 = arith.truncf %420 : vector<8x128xf32> to vector<8x128xbf16>
    %c1_168 = arith.constant 1 : index
    %c0_169 = arith.constant 0 : index
    %c0_170 = arith.constant 0 : index
    %455 = vector.load %arg5[%c1_168, %c0_169, %c0_170] : memref<3x128x384xbf16, #tpu.memory_space<vmem>>, vector<1x128x384xbf16>
    %456 = vector.shape_cast %455 : vector<1x128x384xbf16> to vector<128x384xbf16>
    %cst_171 = arith.constant dense<0.000000e+00> : vector<8x384xf32>
    %457 = tpu.matmul %454, %456, %cst_171 {dimension_numbers = #tpu.dot_dimension_numbers<[1], [0], [0], [1], [0, 0, 1, 1], [], []>} : vector<8x128xbf16>, vector<128x384xbf16>, vector<8x384xf32> -> vector<8x384xf32>
    %c0_172 = arith.constant 0 : index
    %c32 = arith.constant 32 : index
    %c0_173 = arith.constant 0 : index
    %458 = vector.load %arg11[%c0_172, %c32, %c0_173] : memref<3x64x384xf32, #tpu.memory_space<vmem>>, vector<1x8x384xf32>
    %459 = vector.shape_cast %458 : vector<1x8x384xf32> to vector<8x384xf32>
    %460 = vector.extract_strided_slice %459 {offsets = [0, 0], sizes = [8, 128], strides = [1, 1]} : vector<8x384xf32> to vector<8x128xf32>
    %461 = vector.extract_strided_slice %453 {offsets = [0, 0], sizes = [8, 128], strides = [1, 1]} : vector<8x384xf32> to vector<8x128xf32>
    %462 = arith.addf %460, %461 : vector<8x128xf32>
    %463 = arith.negf %462 : vector<8x128xf32>
    %464 = math.exp %463 : vector<8x128xf32>
    %cst_174 = arith.constant 1.000000e+00 : f32
    %465 = vector.broadcast %cst_174 : f32 to vector<8x128xf32>
    %466 = arith.addf %465, %464 : vector<8x128xf32>
    %467 = arith.divf %465, %466 : vector<8x128xf32>
    %468 = vector.extract_strided_slice %459 {offsets = [0, 128], sizes = [8, 128], strides = [1, 1]} : vector<8x384xf32> to vector<8x128xf32>
    %469 = vector.extract_strided_slice %453 {offsets = [0, 128], sizes = [8, 128], strides = [1, 1]} : vector<8x384xf32> to vector<8x128xf32>
    %470 = arith.addf %468, %469 : vector<8x128xf32>
    %471 = arith.negf %470 : vector<8x128xf32>
    %472 = math.exp %471 : vector<8x128xf32>
    %cst_175 = arith.constant 1.000000e+00 : f32
    %473 = vector.broadcast %cst_175 : f32 to vector<8x128xf32>
    %474 = arith.addf %473, %472 : vector<8x128xf32>
    %475 = arith.divf %473, %474 : vector<8x128xf32>
    %476 = vector.extract_strided_slice %459 {offsets = [0, 256], sizes = [8, 128], strides = [1, 1]} : vector<8x384xf32> to vector<8x128xf32>
    %477 = vector.extract_strided_slice %453 {offsets = [0, 256], sizes = [8, 128], strides = [1, 1]} : vector<8x384xf32> to vector<8x128xf32>
    %478 = arith.addf %477, %42 : vector<8x128xf32>
    %479 = arith.mulf %467, %478 : vector<8x128xf32>
    %480 = arith.addf %476, %479 : vector<8x128xf32>
    %481 = math.tanh %480 : vector<8x128xf32>
    %cst_176 = arith.constant 1.000000e+00 : f32
    %482 = vector.broadcast %cst_176 : f32 to vector<8x128xf32>
    %483 = arith.subf %482, %475 : vector<8x128xf32>
    %484 = arith.mulf %483, %481 : vector<8x128xf32>
    %485 = arith.mulf %475, %391 : vector<8x128xf32>
    %486 = arith.addf %484, %485 : vector<8x128xf32>
    %c1_177 = arith.constant 1 : index
    %c32_178 = arith.constant 32 : index
    %c0_179 = arith.constant 0 : index
    %487 = vector.load %arg11[%c1_177, %c32_178, %c0_179] : memref<3x64x384xf32, #tpu.memory_space<vmem>>, vector<1x8x384xf32>
    %488 = vector.shape_cast %487 : vector<1x8x384xf32> to vector<8x384xf32>
    %489 = vector.extract_strided_slice %488 {offsets = [0, 0], sizes = [8, 128], strides = [1, 1]} : vector<8x384xf32> to vector<8x128xf32>
    %490 = vector.extract_strided_slice %457 {offsets = [0, 0], sizes = [8, 128], strides = [1, 1]} : vector<8x384xf32> to vector<8x128xf32>
    %491 = arith.addf %489, %490 : vector<8x128xf32>
    %492 = arith.negf %491 : vector<8x128xf32>
    %493 = math.exp %492 : vector<8x128xf32>
    %cst_180 = arith.constant 1.000000e+00 : f32
    %494 = vector.broadcast %cst_180 : f32 to vector<8x128xf32>
    %495 = arith.addf %494, %493 : vector<8x128xf32>
    %496 = arith.divf %494, %495 : vector<8x128xf32>
    %497 = vector.extract_strided_slice %488 {offsets = [0, 128], sizes = [8, 128], strides = [1, 1]} : vector<8x384xf32> to vector<8x128xf32>
    %498 = vector.extract_strided_slice %457 {offsets = [0, 128], sizes = [8, 128], strides = [1, 1]} : vector<8x384xf32> to vector<8x128xf32>
    %499 = arith.addf %497, %498 : vector<8x128xf32>
    %500 = arith.negf %499 : vector<8x128xf32>
    %501 = math.exp %500 : vector<8x128xf32>
    %cst_181 = arith.constant 1.000000e+00 : f32
    %502 = vector.broadcast %cst_181 : f32 to vector<8x128xf32>
    %503 = arith.addf %502, %501 : vector<8x128xf32>
    %504 = arith.divf %502, %503 : vector<8x128xf32>
    %505 = vector.extract_strided_slice %488 {offsets = [0, 256], sizes = [8, 128], strides = [1, 1]} : vector<8x384xf32> to vector<8x128xf32>
    %506 = vector.extract_strided_slice %457 {offsets = [0, 256], sizes = [8, 128], strides = [1, 1]} : vector<8x384xf32> to vector<8x128xf32>
    %507 = arith.addf %506, %46 : vector<8x128xf32>
    %508 = arith.mulf %496, %507 : vector<8x128xf32>
    %509 = arith.addf %505, %508 : vector<8x128xf32>
    %510 = math.tanh %509 : vector<8x128xf32>
    %cst_182 = arith.constant 1.000000e+00 : f32
    %511 = vector.broadcast %cst_182 : f32 to vector<8x128xf32>
    %512 = arith.subf %511, %504 : vector<8x128xf32>
    %513 = arith.mulf %512, %510 : vector<8x128xf32>
    %514 = arith.mulf %504, %420 : vector<8x128xf32>
    %515 = arith.addf %513, %514 : vector<8x128xf32>
    %516 = arith.truncf %486 : vector<8x128xf32> to vector<8x128xbf16>
    %c0_183 = arith.constant 0 : index
    %c0_184 = arith.constant 0 : index
    %c0_185 = arith.constant 0 : index
    %517 = vector.load %arg5[%c0_183, %c0_184, %c0_185] : memref<3x128x384xbf16, #tpu.memory_space<vmem>>, vector<1x128x384xbf16>
    %518 = vector.shape_cast %517 : vector<1x128x384xbf16> to vector<128x384xbf16>
    %cst_186 = arith.constant dense<0.000000e+00> : vector<8x384xf32>
    %519 = tpu.matmul %516, %518, %cst_186 {dimension_numbers = #tpu.dot_dimension_numbers<[1], [0], [0], [1], [0, 0, 1, 1], [], []>} : vector<8x128xbf16>, vector<128x384xbf16>, vector<8x384xf32> -> vector<8x384xf32>
    %520 = arith.truncf %515 : vector<8x128xf32> to vector<8x128xbf16>
    %c1_187 = arith.constant 1 : index
    %c0_188 = arith.constant 0 : index
    %c0_189 = arith.constant 0 : index
    %521 = vector.load %arg5[%c1_187, %c0_188, %c0_189] : memref<3x128x384xbf16, #tpu.memory_space<vmem>>, vector<1x128x384xbf16>
    %522 = vector.shape_cast %521 : vector<1x128x384xbf16> to vector<128x384xbf16>
    %cst_190 = arith.constant dense<0.000000e+00> : vector<8x384xf32>
    %523 = tpu.matmul %520, %522, %cst_190 {dimension_numbers = #tpu.dot_dimension_numbers<[1], [0], [0], [1], [0, 0, 1, 1], [], []>} : vector<8x128xbf16>, vector<128x384xbf16>, vector<8x384xf32> -> vector<8x384xf32>
    %c0_191 = arith.constant 0 : index
    %c40 = arith.constant 40 : index
    %c0_192 = arith.constant 0 : index
    %524 = vector.load %arg11[%c0_191, %c40, %c0_192] : memref<3x64x384xf32, #tpu.memory_space<vmem>>, vector<1x8x384xf32>
    %525 = vector.shape_cast %524 : vector<1x8x384xf32> to vector<8x384xf32>
    %526 = vector.extract_strided_slice %525 {offsets = [0, 0], sizes = [8, 128], strides = [1, 1]} : vector<8x384xf32> to vector<8x128xf32>
    %527 = vector.extract_strided_slice %519 {offsets = [0, 0], sizes = [8, 128], strides = [1, 1]} : vector<8x384xf32> to vector<8x128xf32>
    %528 = arith.addf %526, %527 : vector<8x128xf32>
    %529 = arith.negf %528 : vector<8x128xf32>
    %530 = math.exp %529 : vector<8x128xf32>
    %cst_193 = arith.constant 1.000000e+00 : f32
    %531 = vector.broadcast %cst_193 : f32 to vector<8x128xf32>
    %532 = arith.addf %531, %530 : vector<8x128xf32>
    %533 = arith.divf %531, %532 : vector<8x128xf32>
    %534 = vector.extract_strided_slice %525 {offsets = [0, 128], sizes = [8, 128], strides = [1, 1]} : vector<8x384xf32> to vector<8x128xf32>
    %535 = vector.extract_strided_slice %519 {offsets = [0, 128], sizes = [8, 128], strides = [1, 1]} : vector<8x384xf32> to vector<8x128xf32>
    %536 = arith.addf %534, %535 : vector<8x128xf32>
    %537 = arith.negf %536 : vector<8x128xf32>
    %538 = math.exp %537 : vector<8x128xf32>
    %cst_194 = arith.constant 1.000000e+00 : f32
    %539 = vector.broadcast %cst_194 : f32 to vector<8x128xf32>
    %540 = arith.addf %539, %538 : vector<8x128xf32>
    %541 = arith.divf %539, %540 : vector<8x128xf32>
    %542 = vector.extract_strided_slice %525 {offsets = [0, 256], sizes = [8, 128], strides = [1, 1]} : vector<8x384xf32> to vector<8x128xf32>
    %543 = vector.extract_strided_slice %519 {offsets = [0, 256], sizes = [8, 128], strides = [1, 1]} : vector<8x384xf32> to vector<8x128xf32>
    %544 = arith.addf %543, %42 : vector<8x128xf32>
    %545 = arith.mulf %533, %544 : vector<8x128xf32>
    %546 = arith.addf %542, %545 : vector<8x128xf32>
    %547 = math.tanh %546 : vector<8x128xf32>
    %cst_195 = arith.constant 1.000000e+00 : f32
    %548 = vector.broadcast %cst_195 : f32 to vector<8x128xf32>
    %549 = arith.subf %548, %541 : vector<8x128xf32>
    %550 = arith.mulf %549, %547 : vector<8x128xf32>
    %551 = arith.mulf %541, %486 : vector<8x128xf32>
    %552 = arith.addf %550, %551 : vector<8x128xf32>
    %c1_196 = arith.constant 1 : index
    %c40_197 = arith.constant 40 : index
    %c0_198 = arith.constant 0 : index
    %553 = vector.load %arg11[%c1_196, %c40_197, %c0_198] : memref<3x64x384xf32, #tpu.memory_space<vmem>>, vector<1x8x384xf32>
    %554 = vector.shape_cast %553 : vector<1x8x384xf32> to vector<8x384xf32>
    %555 = vector.extract_strided_slice %554 {offsets = [0, 0], sizes = [8, 128], strides = [1, 1]} : vector<8x384xf32> to vector<8x128xf32>
    %556 = vector.extract_strided_slice %523 {offsets = [0, 0], sizes = [8, 128], strides = [1, 1]} : vector<8x384xf32> to vector<8x128xf32>
    %557 = arith.addf %555, %556 : vector<8x128xf32>
    %558 = arith.negf %557 : vector<8x128xf32>
    %559 = math.exp %558 : vector<8x128xf32>
    %cst_199 = arith.constant 1.000000e+00 : f32
    %560 = vector.broadcast %cst_199 : f32 to vector<8x128xf32>
    %561 = arith.addf %560, %559 : vector<8x128xf32>
    %562 = arith.divf %560, %561 : vector<8x128xf32>
    %563 = vector.extract_strided_slice %554 {offsets = [0, 128], sizes = [8, 128], strides = [1, 1]} : vector<8x384xf32> to vector<8x128xf32>
    %564 = vector.extract_strided_slice %523 {offsets = [0, 128], sizes = [8, 128], strides = [1, 1]} : vector<8x384xf32> to vector<8x128xf32>
    %565 = arith.addf %563, %564 : vector<8x128xf32>
    %566 = arith.negf %565 : vector<8x128xf32>
    %567 = math.exp %566 : vector<8x128xf32>
    %cst_200 = arith.constant 1.000000e+00 : f32
    %568 = vector.broadcast %cst_200 : f32 to vector<8x128xf32>
    %569 = arith.addf %568, %567 : vector<8x128xf32>
    %570 = arith.divf %568, %569 : vector<8x128xf32>
    %571 = vector.extract_strided_slice %554 {offsets = [0, 256], sizes = [8, 128], strides = [1, 1]} : vector<8x384xf32> to vector<8x128xf32>
    %572 = vector.extract_strided_slice %523 {offsets = [0, 256], sizes = [8, 128], strides = [1, 1]} : vector<8x384xf32> to vector<8x128xf32>
    %573 = arith.addf %572, %46 : vector<8x128xf32>
    %574 = arith.mulf %562, %573 : vector<8x128xf32>
    %575 = arith.addf %571, %574 : vector<8x128xf32>
    %576 = math.tanh %575 : vector<8x128xf32>
    %cst_201 = arith.constant 1.000000e+00 : f32
    %577 = vector.broadcast %cst_201 : f32 to vector<8x128xf32>
    %578 = arith.subf %577, %570 : vector<8x128xf32>
    %579 = arith.mulf %578, %576 : vector<8x128xf32>
    %580 = arith.mulf %570, %515 : vector<8x128xf32>
    %581 = arith.addf %579, %580 : vector<8x128xf32>
    %582 = arith.truncf %552 : vector<8x128xf32> to vector<8x128xbf16>
    %c0_202 = arith.constant 0 : index
    %c0_203 = arith.constant 0 : index
    %c0_204 = arith.constant 0 : index
    %583 = vector.load %arg5[%c0_202, %c0_203, %c0_204] : memref<3x128x384xbf16, #tpu.memory_space<vmem>>, vector<1x128x384xbf16>
    %584 = vector.shape_cast %583 : vector<1x128x384xbf16> to vector<128x384xbf16>
    %cst_205 = arith.constant dense<0.000000e+00> : vector<8x384xf32>
    %585 = tpu.matmul %582, %584, %cst_205 {dimension_numbers = #tpu.dot_dimension_numbers<[1], [0], [0], [1], [0, 0, 1, 1], [], []>} : vector<8x128xbf16>, vector<128x384xbf16>, vector<8x384xf32> -> vector<8x384xf32>
    %c0_206 = arith.constant 0 : index
    %c48 = arith.constant 48 : index
    %c0_207 = arith.constant 0 : index
    %586 = vector.load %arg11[%c0_206, %c48, %c0_207] : memref<3x64x384xf32, #tpu.memory_space<vmem>>, vector<1x8x384xf32>
    %587 = vector.shape_cast %586 : vector<1x8x384xf32> to vector<8x384xf32>
    %588 = vector.extract_strided_slice %587 {offsets = [0, 0], sizes = [8, 128], strides = [1, 1]} : vector<8x384xf32> to vector<8x128xf32>
    %589 = vector.extract_strided_slice %585 {offsets = [0, 0], sizes = [8, 128], strides = [1, 1]} : vector<8x384xf32> to vector<8x128xf32>
    %590 = arith.addf %588, %589 : vector<8x128xf32>
    %591 = arith.negf %590 : vector<8x128xf32>
    %592 = math.exp %591 : vector<8x128xf32>
    %cst_208 = arith.constant 1.000000e+00 : f32
    %593 = vector.broadcast %cst_208 : f32 to vector<8x128xf32>
    %594 = arith.addf %593, %592 : vector<8x128xf32>
    %595 = arith.divf %593, %594 : vector<8x128xf32>
    %596 = vector.extract_strided_slice %587 {offsets = [0, 128], sizes = [8, 128], strides = [1, 1]} : vector<8x384xf32> to vector<8x128xf32>
    %597 = vector.extract_strided_slice %585 {offsets = [0, 128], sizes = [8, 128], strides = [1, 1]} : vector<8x384xf32> to vector<8x128xf32>
    %598 = arith.addf %596, %597 : vector<8x128xf32>
    %599 = arith.negf %598 : vector<8x128xf32>
    %600 = math.exp %599 : vector<8x128xf32>
    %cst_209 = arith.constant 1.000000e+00 : f32
    %601 = vector.broadcast %cst_209 : f32 to vector<8x128xf32>
    %602 = arith.addf %601, %600 : vector<8x128xf32>
    %603 = arith.divf %601, %602 : vector<8x128xf32>
    %604 = vector.extract_strided_slice %587 {offsets = [0, 256], sizes = [8, 128], strides = [1, 1]} : vector<8x384xf32> to vector<8x128xf32>
    %605 = vector.extract_strided_slice %585 {offsets = [0, 256], sizes = [8, 128], strides = [1, 1]} : vector<8x384xf32> to vector<8x128xf32>
    %606 = arith.addf %605, %42 : vector<8x128xf32>
    %607 = arith.mulf %595, %606 : vector<8x128xf32>
    %608 = arith.addf %604, %607 : vector<8x128xf32>
    %609 = math.tanh %608 : vector<8x128xf32>
    %cst_210 = arith.constant 1.000000e+00 : f32
    %610 = vector.broadcast %cst_210 : f32 to vector<8x128xf32>
    %611 = arith.subf %610, %603 : vector<8x128xf32>
    %612 = arith.mulf %611, %609 : vector<8x128xf32>
    %613 = arith.mulf %603, %552 : vector<8x128xf32>
    %614 = arith.addf %612, %613 : vector<8x128xf32>
    %615 = arith.truncf %614 : vector<8x128xf32> to vector<8x128xbf16>
    %c0_211 = arith.constant 0 : index
    %c0_212 = arith.constant 0 : index
    %c0_213 = arith.constant 0 : index
    %616 = vector.load %arg5[%c0_211, %c0_212, %c0_213] : memref<3x128x384xbf16, #tpu.memory_space<vmem>>, vector<1x128x384xbf16>
    %617 = vector.shape_cast %616 : vector<1x128x384xbf16> to vector<128x384xbf16>
    %cst_214 = arith.constant dense<0.000000e+00> : vector<8x384xf32>
    %618 = tpu.matmul %615, %617, %cst_214 {dimension_numbers = #tpu.dot_dimension_numbers<[1], [0], [0], [1], [0, 0, 1, 1], [], []>} : vector<8x128xbf16>, vector<128x384xbf16>, vector<8x384xf32> -> vector<8x384xf32>
    %c0_215 = arith.constant 0 : index
    %c56 = arith.constant 56 : index
    %c0_216 = arith.constant 0 : index
    %619 = vector.load %arg11[%c0_215, %c56, %c0_216] : memref<3x64x384xf32, #tpu.memory_space<vmem>>, vector<1x8x384xf32>
    %620 = vector.shape_cast %619 : vector<1x8x384xf32> to vector<8x384xf32>
    %621 = vector.extract_strided_slice %620 {offsets = [0, 0], sizes = [8, 128], strides = [1, 1]} : vector<8x384xf32> to vector<8x128xf32>
    %622 = vector.extract_strided_slice %618 {offsets = [0, 0], sizes = [8, 128], strides = [1, 1]} : vector<8x384xf32> to vector<8x128xf32>
    %623 = arith.addf %621, %622 : vector<8x128xf32>
    %624 = arith.negf %623 : vector<8x128xf32>
    %625 = math.exp %624 : vector<8x128xf32>
    %cst_217 = arith.constant 1.000000e+00 : f32
    %626 = vector.broadcast %cst_217 : f32 to vector<8x128xf32>
    %627 = arith.addf %626, %625 : vector<8x128xf32>
    %628 = arith.divf %626, %627 : vector<8x128xf32>
    %629 = vector.extract_strided_slice %620 {offsets = [0, 128], sizes = [8, 128], strides = [1, 1]} : vector<8x384xf32> to vector<8x128xf32>
    %630 = vector.extract_strided_slice %618 {offsets = [0, 128], sizes = [8, 128], strides = [1, 1]} : vector<8x384xf32> to vector<8x128xf32>
    %631 = arith.addf %629, %630 : vector<8x128xf32>
    %632 = arith.negf %631 : vector<8x128xf32>
    %633 = math.exp %632 : vector<8x128xf32>
    %cst_218 = arith.constant 1.000000e+00 : f32
    %634 = vector.broadcast %cst_218 : f32 to vector<8x128xf32>
    %635 = arith.addf %634, %633 : vector<8x128xf32>
    %636 = arith.divf %634, %635 : vector<8x128xf32>
    %637 = vector.extract_strided_slice %620 {offsets = [0, 256], sizes = [8, 128], strides = [1, 1]} : vector<8x384xf32> to vector<8x128xf32>
    %638 = vector.extract_strided_slice %618 {offsets = [0, 256], sizes = [8, 128], strides = [1, 1]} : vector<8x384xf32> to vector<8x128xf32>
    %639 = arith.addf %638, %42 : vector<8x128xf32>
    %640 = arith.mulf %628, %639 : vector<8x128xf32>
    %641 = arith.addf %637, %640 : vector<8x128xf32>
    %642 = math.tanh %641 : vector<8x128xf32>
    %cst_219 = arith.constant 1.000000e+00 : f32
    %643 = vector.broadcast %cst_219 : f32 to vector<8x128xf32>
    %644 = arith.subf %643, %636 : vector<8x128xf32>
    %645 = arith.mulf %644, %642 : vector<8x128xf32>
    %646 = arith.mulf %636, %614 : vector<8x128xf32>
    %647 = arith.addf %645, %646 : vector<8x128xf32>
    %648 = arith.truncf %647 : vector<8x128xf32> to vector<8x128xbf16>
    %c0_220 = arith.constant 0 : index
    %c0_221 = arith.constant 0 : index
    %c0_222 = arith.constant 0 : index
    %649 = vector.load %arg8[%c0_220, %c0_221, %c0_222] : memref<3x128x128xbf16, #tpu.memory_space<vmem>>, vector<1x128x128xbf16>
    %650 = vector.shape_cast %649 : vector<1x128x128xbf16> to vector<128x128xbf16>
    %cst_223 = arith.constant dense<0.000000e+00> : vector<8x128xf32>
    %651 = tpu.matmul %648, %650, %cst_223 {dimension_numbers = #tpu.dot_dimension_numbers<[1], [0], [0], [1], [0, 0, 1, 1], [], []>} : vector<8x128xbf16>, vector<128x128xbf16>, vector<8x128xf32> -> vector<8x128xf32>
    %652 = arith.truncf %581 : vector<8x128xf32> to vector<8x128xbf16>
    %c1_224 = arith.constant 1 : index
    %c0_225 = arith.constant 0 : index
    %c0_226 = arith.constant 0 : index
    %653 = vector.load %arg8[%c1_224, %c0_225, %c0_226] : memref<3x128x128xbf16, #tpu.memory_space<vmem>>, vector<1x128x128xbf16>
    %654 = vector.shape_cast %653 : vector<1x128x128xbf16> to vector<128x128xbf16>
    %cst_227 = arith.constant dense<0.000000e+00> : vector<8x128xf32>
    %655 = tpu.matmul %652, %654, %cst_227 {dimension_numbers = #tpu.dot_dimension_numbers<[1], [0], [0], [1], [0, 0, 1, 1], [], []>} : vector<8x128xbf16>, vector<128x128xbf16>, vector<8x128xf32> -> vector<8x128xf32>
    %656 = arith.addf %651, %655 : vector<8x128xf32>
    %657 = arith.truncf %449 : vector<8x128xf32> to vector<8x128xbf16>
    %c2_228 = arith.constant 2 : index
    %c0_229 = arith.constant 0 : index
    %c0_230 = arith.constant 0 : index
    %658 = vector.load %arg8[%c2_228, %c0_229, %c0_230] : memref<3x128x128xbf16, #tpu.memory_space<vmem>>, vector<1x128x128xbf16>
    %659 = vector.shape_cast %658 : vector<1x128x128xbf16> to vector<128x128xbf16>
    %cst_231 = arith.constant dense<0.000000e+00> : vector<8x128xf32>
    %660 = tpu.matmul %657, %659, %cst_231 {dimension_numbers = #tpu.dot_dimension_numbers<[1], [0], [0], [1], [0, 0, 1, 1], [], []>} : vector<8x128xbf16>, vector<128x128xbf16>, vector<8x128xf32> -> vector<8x128xf32>
    %661 = arith.addf %656, %660 : vector<8x128xf32>
    %c0_232 = arith.constant 0 : index
    %c0_233 = arith.constant 0 : index
    %662 = vector.load %arg9[%c0_232, %c0_233] : memref<1x128xf32, #tpu.memory_space<vmem>>, vector<1x128xf32>
    %663 = vector.broadcast %662 : vector<1x128xf32> to vector<8x128xf32>
    %664 = arith.addf %661, %663 : vector<8x128xf32>
    %665 = vector.extract_strided_slice %664 {offsets = [0, 0], sizes = [2, 4], strides = [1, 1]} : vector<8x128xf32> to vector<2x4xf32>
    %c0_234 = arith.constant 0 : index
    %c0_235 = arith.constant 0 : index
    %666 = vector.load %arg10[%c0_234, %c0_235] : memref<2x4xf32, #tpu.memory_space<vmem>>, vector<2x4xf32>
    tpu.vector_store %arg10[%c0_234, %c0_235], %665 {strides = array<i32>} : memref<2x4xf32, #tpu.memory_space<vmem>>, vector<2x4xf32>,
    return
  }
  func.func @transform_0(%arg0: i32) -> (i32, i32, i32) {
    %c0_i32 = arith.constant 0 : i32
    %c0_i32_0 = arith.constant 0 : i32
    %c0_i32_1 = arith.constant 0 : i32
    %c0_i32_2 = arith.constant 0 : i32
    return %c0_i32, %c0_i32_0, %c0_i32_1 : i32, i32, i32
  }
  func.func @transform_1(%arg0: i32) -> (i32, i32, i32) {
    %c0_i32 = arith.constant 0 : i32
    %c0_i32_0 = arith.constant 0 : i32
    %c0_i32_1 = arith.constant 0 : i32
    %c0_i32_2 = arith.constant 0 : i32
    return %c0_i32, %c0_i32_0, %c0_i32_1 : i32, i32, i32
  }
  func.func @transform_2(%arg0: i32) -> (i32, i32, i32) {
    %c0_i32 = arith.constant 0 : i32
    %c0_i32_0 = arith.constant 0 : i32
    %c0_i32_1 = arith.constant 0 : i32
    %c0_i32_2 = arith.constant 0 : i32
    return %c0_i32, %c0_i32_0, %c0_i32_1 : i32, i32, i32
  }
  func.func @transform_3(%arg0: i32) -> (i32, i32, i32) {
    %c0_i32 = arith.constant 0 : i32
    %c0_i32_0 = arith.constant 0 : i32
    %c0_i32_1 = arith.constant 0 : i32
    %c0_i32_2 = arith.constant 0 : i32
    return %c0_i32, %c0_i32_0, %c0_i32_1 : i32, i32, i32
  }
  func.func @transform_4(%arg0: i32) -> (i32, i32, i32) {
    %c0_i32 = arith.constant 0 : i32
    %c0_i32_0 = arith.constant 0 : i32
    %c0_i32_1 = arith.constant 0 : i32
    %c0_i32_2 = arith.constant 0 : i32
    return %c0_i32, %c0_i32_0, %c0_i32_1 : i32, i32, i32
  }
  func.func @transform_5(%arg0: i32) -> (i32, i32, i32) {
    %c0_i32 = arith.constant 0 : i32
    %c0_i32_0 = arith.constant 0 : i32
    %c0_i32_1 = arith.constant 0 : i32
    %c0_i32_2 = arith.constant 0 : i32
    return %c0_i32, %c0_i32_0, %c0_i32_1 : i32, i32, i32
  }
  func.func @transform_6(%arg0: i32) -> (i32, i32, i32) {
    %c0_i32 = arith.constant 0 : i32
    %c0_i32_0 = arith.constant 0 : i32
    %c0_i32_1 = arith.constant 0 : i32
    %c0_i32_2 = arith.constant 0 : i32
    return %c0_i32, %c0_i32_0, %c0_i32_1 : i32, i32, i32
  }
  func.func @transform_7(%arg0: i32) -> (i32, i32, i32) {
    %c0_i32 = arith.constant 0 : i32
    %c0_i32_0 = arith.constant 0 : i32
    %c0_i32_1 = arith.constant 0 : i32
    %c0_i32_2 = arith.constant 0 : i32
    return %c0_i32, %c0_i32_0, %c0_i32_1 : i32, i32, i32
  }
  func.func @transform_8(%arg0: i32) -> (i32, i32) {
    %c0_i32 = arith.constant 0 : i32
    %c0_i32_0 = arith.constant 0 : i32
    %c0_i32_1 = arith.constant 0 : i32
    return %c0_i32, %c0_i32_0 : i32, i32
  }
  func.func @transform_9(%arg0: i32) -> (i32, i32) {
    %c0_i32 = arith.constant 0 : i32
    %c0_i32_0 = arith.constant 0 : i32
    %c0_i32_1 = arith.constant 0 : i32
    return %c0_i32, %c0_i32_0 : i32, i32
  }
}

</mosaic_0001>

<bundles_post_ra>
// kernel: multi_freq_gru_forward.1
= control target key start
LH: loop header
LB: loop body
LE: loop exit
PB: predicated region body
PF: predicated region fallthrough
CT: control target
= control target key end

     0   :  { %14 = vsyncpa [#allocation4], 0  ;;  %s6967_s0 = inlined_call_operand.vmem [shape: f32[8,8,128], index: 0, kind: input, shape index: {}]   ;;  %s6968_s1 = inlined_call_operand.vmem [shape: f32[6,8,128], index: 1, kind: input, shape index: {}]   ;;  %s6969_s2 = inlined_call_operand.vmem [shape: f32[4,8,128], index: 2, kind: input, shape index: {}]   ;;  %s6970_s3 = inlined_call_operand.hbm [shape: bf16[3,128,384], index: 3, kind: input, shape index: {}]   ;;  %s6971_s4 = inlined_call_operand.hbm [shape: bf16[3,128,384], index: 4, kind: input, shape index: {}]   ;;  %s6972_s5 = inlined_call_operand.vmem [shape: f32[3,1,384], index: 5, kind: input, shape index: {}]   ;;  %s6973_s6 = inlined_call_operand.vmem [shape: f32[3,1,128], index: 6, kind: input, shape index: {}]   ;;  %s6974_s7 = inlined_call_operand.vmem [shape: bf16[3,128,128], index: 7, kind: input, shape index: {}]   ;;  %s6975_s8 = inlined_call_operand.vmem [shape: f32[1,128], index: 8, kind: input, shape index: {}]   ;;  %s6976_s9 = inlined_call_operand.hbm [shape: f32[2,4], index: 9, kind: output, shape index: {}]  }
   0x1   :  { %15 = vsyncpa [#allocation7], 0 }
   0x2   :  { %16 = vsyncpa [#allocation5], 0  ;;  %s5370_s30 = smov [#allocation3]   ;;  %s5298_s13 = scalar_lea.hbm %s6970_s3, 9216 }
   0x3   :  { %s28_s10 = sshll.u32 %s5370_s30, 4  ;;  %p5299_p0 = scmp.ne.s32.totalorder %s6970_s3, %s5298_s13  ;;  %s29_s10 = int_to_ptr.vmem [resolvable:$true] %s28_s10 }
   0x4   :  { %p5302_p1 = scmp.lt.u32.totalorder %s5298_s13, %s6970_s3 }
   0x6   :  { %p5304_p2 = pnand %p5302_p1, %p5299_p0 }
   0x8   :  { %5307 = shalt.err (!%p5304_p2)
}
   0x9   :  { %s5308_s18 = scalar_lea.vmem %s29_s10, 9216  ;;  %p5313_p4 = scmp.lt.s32.totalorder %s29_s10, %s29_s10 }
   0xa   :  { %p5309_p3 = scmp.ne.s32.totalorder %s29_s10, %s5308_s18  ;;  %p5314_p5 = scmp.lt.s32.totalorder %s5308_s18, %s5308_s18 }
   0xc   :  { %p5315_p6 = por %p5314_p5, %p5313_p4 }
   0xe   :  { %p5316_p7 = pnand %p5315_p6, %p5309_p3 }
  0x10   :  { %5319 = shalt.err (!%p5316_p7)
}
  0x11   :  { %s5371_s19 = smov 192   ;;  %s5372_s20 = smov 12  }
  0x12   :  { %34 = dma.hbm_to_vmem [thread:$0]  %s6970_s3, 9216, %s29_s10, [#allocation4], %s5371_s19, %s5371_s19, %s5372_s20  }
  0x13   :  { %s5373_s23 = smov [#allocation6]   ;;  %s5320_s27 = scalar_lea.hbm %s6971_s4, 9216 }
  0x14   :  { %s40_s24 = sshll.u32 %s5373_s23, 4  ;;  %p5321_p8 = scmp.ne.s32.totalorder %s6971_s4, %s5320_s27  ;;  %s41_s24 = int_to_ptr.vmem [resolvable:$true] %s40_s24 }
  0x15   :  { %p5324_p9 = scmp.lt.u32.totalorder %s5320_s27, %s6971_s4 }
  0x17   :  { %p5326_p10 = pnand %p5324_p9, %p5321_p8 }
  0x19   :  { %5329 = shalt.err (!%p5326_p10)
}
  0x1a   :  { %s5330_s12 = scalar_lea.vmem %s41_s24, 9216  ;;  %p5335_p12 = scmp.lt.s32.totalorder %s41_s24, %s41_s24 }
  0x1b   :  { %p5331_p11 = scmp.ne.s32.totalorder %s41_s24, %s5330_s12  ;;  %p5336_p13 = scmp.lt.s32.totalorder %s5330_s12, %s5330_s12 }
  0x1d   :  { %p5337_p0 = por %p5336_p13, %p5335_p12 }
  0x1f   :  { %p5338_p1 = pnand %p5337_p0, %p5331_p11 }
  0x21   :  { %5341 = shalt.err (!%p5338_p1)
}
  0x22   :  { %46 = dma.hbm_to_vmem [thread:$0]  %s6971_s4, 9216, %s41_s24, [#allocation7], %s5371_s19, %s5371_s19, %s5372_s20  }
  0x23   :  { %5364 = dma.done.wait [#allocation4], 9216  }
  0x24   :  { %5365 = vsyncadd [#allocation4], 4294958080 }
  0x25   :  { %5366 = dma.done.wait [#allocation7], 9216  }
  0x26   :  { %5367 = vsyncadd [#allocation7], 4294958080  ;;  %v6977_v0 = vmov 0   ;;  %v4778_v1 = vld [vmem:[#allocation3 + $0x4] ss:$12 sps:$4 sm:$0xff]   ;;  %v63_v14 = vld [vmem:[%s6967_s0 + $0x8] sm:$0xff] }
  0x27   :  { %283 = vmatprep.mubr.bf16.mxu0 %v6977_v0  ;;  %v4780_v2 = vld [vmem:[#allocation3] ss:$12 sps:$4 sm:$0xff]   ;;  %251 = vmatprep.subr.bf16.mxu0 %v4778_v1  ;;  %v4781_v3 = vld [vmem:[#allocation3 + $0x1c] ss:$12 sps:$4 sm:$0xff]   ;;  %v4783_v4 = vld [vmem:[#allocation3 + $0x18] ss:$12 sps:$4 sm:$0xff]  }
  0x28   :  { %252 = vmatpush1.bf16.msra.mxu0 %v4780_v2  ;;  %v4784_v5 = vld [vmem:[#allocation3 + $0x34] ss:$12 sps:$4 sm:$0xff]   ;;  %v4786_v6 = vld [vmem:[#allocation3 + $0x30] ss:$12 sps:$4 sm:$0xff]   ;;  %v4787_v7 = vld [vmem:[#allocation3 + $0x4c] ss:$12 sps:$4 sm:$0xff]  }
  0x29   :  { %253 = vmatprep.subr.bf16.mxu0 %v4781_v3  ;;  %v4796_v8 = vld [vmem:[#allocation3 + $0x8] ss:$12 sps:$4 sm:$0xff]   ;;  %v4800_v10 = vld [vmem:[#allocation3 + $0x20] ss:$12 sps:$4 sm:$0xff]   ;;  %v4790_v11 = vld [vmem:[#allocation3 + $0x64] ss:$12 sps:$4 sm:$0xff]  }
  0x2a   :  { %v4789_v9 = vld [vmem:[#allocation3 + $0x48] ss:$12 sps:$4 sm:$0xff]   ;;  %4278 = vmatprep.subr.bf16.mxu1 %v4796_v8  ;;  %v4804_v12 = vld [vmem:[#allocation3 + $0x38] ss:$12 sps:$4 sm:$0xff]   ;;  %v4792_v15 = vld [vmem:[#allocation3 + $0x60] ss:$12 sps:$4 sm:$0xff]  }
  0x2b   :  { %4279 = vmatpush3.bf16.msra.mxu1 %v4796_v8  ;;  %v62_v13 = vld [vmem:[%s6967_s0] sm:$0xff]  ;;  %v4793_v16 = vld [vmem:[#allocation3 + $0x7c] ss:$12 sps:$4 sm:$0xff]   ;;  %v4801_v23 = vld [vmem:[#allocation3 + $0xac] ss:$12 sps:$4 sm:$0xff]   ;;  %v6989_v40 = vmov 0.0  }
  0x2c   :  { %254 = vmatpush1.bf16.msra.mxu0 %v4783_v4  ;;  %4280 = vmatprep.subr.bf16.mxu1 %v4800_v10  ;;  %v70_v17 = vpack.c.bf16 %v63_v14, %v62_v13  ;;  %v4808_v18 = vld [vmem:[#allocation3 + $0x50] ss:$12 sps:$4 sm:$0xff]   ;;  %v4795_v19 = vld [vmem:[#allocation3 + $0x78] ss:$12 sps:$4 sm:$0xff]   ;;  %v4797_v20 = vld [vmem:[#allocation3 + $0x94] ss:$12 sps:$4 sm:$0xff]  }
  0x2d   :  { %255 = vmatprep.subr.bf16.mxu0 %v4784_v5  ;;  %v4812_v21 = vld [vmem:[#allocation3 + $0x68] ss:$12 sps:$4 sm:$0xff]   ;;  %v4799_v22 = vld [vmem:[#allocation3 + $0x90] ss:$12 sps:$4 sm:$0xff]   ;;  %v4816_v24 = vld [vmem:[#allocation3 + $0x80] ss:$12 sps:$4 sm:$0xff]  }
  0x2e   :  { %4294 = vmatprep.mubr.bf16.mxu1 %v70_v17  ;;  %v4803_v25 = vld [vmem:[#allocation3 + $0xa8] ss:$12 sps:$4 sm:$0xff]   ;;  %v4807_v26 = vld [vmem:[#allocation3 + $0xc4] ss:$12 sps:$4 sm:$0xff]   ;;  %v4805_v28 = vld [vmem:[#allocation3 + $0xc0] ss:$12 sps:$4 sm:$0xff]  }
  0x2f   :  { %4281 = vmatpush3.bf16.msra.mxu1 %v4800_v10  ;;  %v4820_v27 = vld [vmem:[#allocation3 + $0x98] ss:$12 sps:$4 sm:$0xff]   ;;  %v4811_v29 = vld [vmem:[#allocation3 + $0xdc] ss:$12 sps:$4 sm:$0xff]   ;;  %v64_v32 = vld [vmem:[%s6967_s0 + $0x10] sm:$0xff]  ;;  %vm5376_vm0 = vmmov 0  }
  0x30   :  { %256 = vmatpush1.bf16.msra.mxu0 %v4786_v6  ;;  %4282 = vmatprep.subr.bf16.mxu1 %v4804_v12  ;;  %v4824_v30 = vld [vmem:[#allocation3 + $0xb0] ss:$12 sps:$4 sm:$0xff]   ;;  %v4809_v31 = vld [vmem:[#allocation3 + $0xd8] ss:$12 sps:$4 sm:$0xff]   ;;  %v4815_v34 = vld [vmem:[#allocation3 + $0xf4] ss:$12 sps:$4 sm:$0xff]  }
  0x31   :  { %257 = vmatprep.subr.bf16.mxu0 %v4787_v7  ;;  %v65_v33 = vld [vmem:[%s6967_s0 + $0x18] sm:$0xff]  ;;  %v66_v38 = vld [vmem:[%s6967_s0 + $0x20] sm:$0xff]  ;;  %v67_v39 = vld [vmem:[%s6967_s0 + $0x28] sm:$0xff]  ;;  %s5377_s10 = smov [#allocation8]   ;;  %vm3794_vm1 = vcmask 25600  }
  0x32   :  { %v4813_v35 = vld [vmem:[#allocation3 + $0xf0] ss:$12 sps:$4 sm:$0xff]   ;;  %v71_v36 = vpack.c.bf16 %v65_v33, %v64_v32  ;;  %v4819_v37 = vld [vmem:[#allocation3 + $0x10c] ss:$12 sps:$4 sm:$0xff]   ;;  %v4831_v41 = vld [vmem:[#allocation3 + $0xc8] ss:$12 sps:$4 sm:$0xff]   ;;  %v72_v43 = vpack.c.bf16 %v67_v39, %v66_v38 }
  0x33   :  { %4283 = vmatpush3.bf16.msra.mxu1 %v4804_v12  ;;  %v4817_v42 = vld [vmem:[#allocation3 + $0x108] ss:$12 sps:$4 sm:$0xff]   ;;  %v4823_v44 = vld [vmem:[#allocation3 + $0x124] ss:$12 sps:$4 sm:$0xff]   ;;  %v4835_v45 = vld [vmem:[#allocation3 + $0xe0] ss:$12 sps:$4 sm:$0xff]  }
  0x34   :  { %258 = vmatpush1.bf16.msra.mxu0 %v4789_v9  ;;  %4284 = vmatprep.subr.bf16.mxu1 %v4808_v18  ;;  %v4821_v46 = vld [vmem:[#allocation3 + $0x120] ss:$12 sps:$4 sm:$0xff]   ;;  %v68_v47 = vld [vmem:[%s6967_s0 + $0x30] sm:$0xff]  ;;  %v69_v48 = vld [vmem:[%s6967_s0 + $0x38] sm:$0xff]  ;;  %s3802_s4 = sshll.u32 %s5377_s10, 4  ;;  %s3803_s4 = int_to_ptr.vmem [resolvable:$true] %s3802_s4 }
  0x35   :  { %259 = vmatprep.subr.bf16.mxu0 %v4790_v11  ;;  %v4827_v49 = vld [vmem:[#allocation3 + $0x13c] ss:$12 sps:$4 sm:$0xff]   ;;  %v4836_v50 = vld [vmem:[#allocation3 + $0xf8] ss:$12 sps:$4 sm:$0xff]   ;;  %v73_v51 = vpack.c.bf16 %v69_v48, %v68_v47  ;;  %v4830_v53 = vld [vmem:[#allocation3 + $0x154] ss:$12 sps:$4 sm:$0xff]   ;;  %p5347_p3 = scmp.lt.s32.totalorder %s3803_s4, %s3803_s4 }
  0x36   :  { %v4825_v52 = vld [vmem:[#allocation3 + $0x138] ss:$12 sps:$4 sm:$0xff]   ;;  %v4840_v54 = vld [vmem:[#allocation3 + $0x110] ss:$12 sps:$4 sm:$0xff]   ;;  %v4844_v57 = vld [vmem:[#allocation3 + $0x128] ss:$12 sps:$4 sm:$0xff]  }
  0x37   :  { %4285 = vmatpush3.bf16.msra.mxu1 %v4808_v18  ;;  %v4828_v55 = vld [vmem:[#allocation3 + $0x150] ss:$12 sps:$4 sm:$0xff]   ;;  %v4834_v56 = vld [vmem:[#allocation3 + $0x16c] ss:$12 sps:$4 sm:$0xff]   ;;  %v4832_v58 = vld [vmem:[#allocation3 + $0x168] ss:$12 sps:$4 sm:$0xff]  }
  0x38   :  { %260 = vmatpush1.bf16.msra.mxu0 %v4792_v15  ;;  %4286 = vmatprep.subr.bf16.mxu1 %v4812_v21  ;;  %v413_v59 = vld [vmem:[%s6968_s1] sm:$0xff]  ;;  %v414_v60 = vld [vmem:[%s6968_s1 + $0x8] sm:$0xff]  ;;  %v415_v5 = vld [vmem:[%s6968_s1 + $0x10] sm:$0xff]  ;;  %s5342_s13 = scalar_lea.vmem %s3803_s4, 32 }
  0x39   :  { %261 = vmatprep.subr.bf16.mxu0 %v4793_v16  ;;  %v4839_v61 = vld [vmem:[#allocation3 + $0x184] ss:$12 sps:$4 sm:$0xff]   ;;  %v4848_v62 = vld [vmem:[#allocation3 + $0x140] ss:$12 sps:$4 sm:$0xff]   ;;  %v419_v63 = vpack.c.bf16 %v414_v60, %v413_v59  ;;  %v4843_v2 = vld [vmem:[#allocation3 + $0x19c] ss:$12 sps:$4 sm:$0xff]   ;;  %p5343_p2 = scmp.ne.s32.totalorder %s3803_s4, %s5342_s13  ;;  %p5348_p4 = scmp.lt.s32.totalorder %s5342_s13, %s5342_s13 }
  0x3a   :  { %v4837_v1 = vld [vmem:[#allocation3 + $0x180] ss:$12 sps:$4 sm:$0xff]   ;;  %v4852_v3 = vld [vmem:[#allocation3 + $0x158] ss:$12 sps:$4 sm:$0xff]   ;;  %v4856_v8 = vld [vmem:[#allocation3 + $0x170] ss:$12 sps:$4 sm:$0xff]  }
  0x3b   :  { %4287 = vmatpush3.bf16.msra.mxu1 %v4812_v21  ;;  %v4841_v4 = vld [vmem:[#allocation3 + $0x198] ss:$12 sps:$4 sm:$0xff]   ;;  %v4847_v7 = vld [vmem:[#allocation3 + $0x1b4] ss:$12 sps:$4 sm:$0xff]   ;;  %v4845_v11 = vld [vmem:[#allocation3 + $0x1b0] ss:$12 sps:$4 sm:$0xff]   ;;  %p5349_p5 = por %p5348_p4, %p5347_p3 }
  0x3c   :  { %262 = vmatpush1.bf16.msra.mxu0 %v4795_v19  ;;  %4288 = vmatprep.subr.bf16.mxu1 %v4816_v24  ;;  %v416_v6 = vld [vmem:[%s6968_s1 + $0x18] sm:$0xff]  ;;  %v4860_v10 = vld [vmem:[#allocation3 + $0x188] ss:$12 sps:$4 sm:$0xff]   ;;  %v417_v14 = vld [vmem:[%s6968_s1 + $0x20] sm:$0xff] }
  0x3d   :  { %263 = vmatprep.subr.bf16.mxu0 %v4797_v20  ;;  %v420_v9 = vpack.c.bf16 %v416_v6, %v415_v5  ;;  %v4851_v12 = vld [vmem:[#allocation3 + $0x1cc] ss:$12 sps:$4 sm:$0xff]   ;;  %v4849_v13 = vld [vmem:[#allocation3 + $0x1c8] ss:$12 sps:$4 sm:$0xff]   ;;  %v5522_v33 = vld [vmem:[#allocation6 + $0x4] ss:$12 sps:$4 sm:$0xff]   ;;  %p5350_p6 = pnand %p5349_p5, %p5343_p2 }
  0x3e   :  { %v4864_v15 = vld [vmem:[#allocation3 + $0x1a0] ss:$12 sps:$4 sm:$0xff]   ;;  %v4868_v19 = vld [vmem:[#allocation3 + $0x1b8] ss:$12 sps:$4 sm:$0xff]   ;;  %v4859_v21 = vld [vmem:[#allocation3 + $0x1fc] ss:$12 sps:$4 sm:$0xff]  }
  0x3f   :  { %4289 = vmatpush3.bf16.msra.mxu1 %v4816_v24  ;;  %v418_v16 = vld [vmem:[%s6968_s1 + $0x28] sm:$0xff]  ;;  %v4863_v24 = vld [vmem:[#allocation3 + $0x214] ss:$12 sps:$4 sm:$0xff]   ;;  %v4888_v38 = vld [vmem:[#allocation3 + $0x230] ss:$12 sps:$4 sm:$0xff]  }
  0x40   :  { %264 = vmatpush1.bf16.msra.mxu0 %v4799_v22  ;;  %4290 = vmatprep.subr.bf16.mxu1 %v4820_v27  ;;  %v421_v18 = vpack.c.bf16 %v418_v16, %v417_v14  ;;  %v4853_v20 = vld [vmem:[#allocation3 + $0x1e0] ss:$12 sps:$4 sm:$0xff]   ;;  %v4872_v22 = vld [vmem:[#allocation3 + $0x1d0] ss:$12 sps:$4 sm:$0xff]   ;;  %v5552_v47 = vld [vmem:[#allocation6 + $0x48] ss:$12 sps:$4 sm:$0xff]  }
  0x41   :  { %265 = vmatprep.subr.bf16.mxu0 %v4801_v23  ;;  %v4857_v23 = vld [vmem:[#allocation3 + $0x1f8] ss:$12 sps:$4 sm:$0xff]   ;;  %v742_v39 = vld [vmem:[%s6969_s2 + $0x10] sm:$0xff] }
  0x42   :  { %v5556_v48 = vld [vmem:[#allocation6 + $0x64] ss:$12 sps:$4 sm:$0xff]   ;;  %v5592_v59 = vld [vmem:[#allocation6 + $0xa8] ss:$12 sps:$4 sm:$0xff]   ;;  %v5630_v6 = vld [vmem:[#allocation6 + $0x10c] ss:$12 sps:$4 sm:$0xff]  }
  0x43   :  { %4291 = vmatpush3.bf16.msra.mxu1 %v4820_v27  ;;  %v4867_v27 = vld [vmem:[#allocation3 + $0x22c] ss:$12 sps:$4 sm:$0xff]   ;;  %v5595_v60 = vld [vmem:[#allocation6 + $0xc4] ss:$12 sps:$4 sm:$0xff]  }
  0x44   :  { %266 = vmatpush1.bf16.msra.mxu0 %v4803_v25  ;;  %4292 = vmatprep.subr.bf16.mxu1 %v4824_v30  ;;  %v4861_v25 = vld [vmem:[#allocation3 + $0x210] ss:$12 sps:$4 sm:$0xff]   ;;  %v5660_v14 = vld [vmem:[#allocation6 + $0x138] ss:$12 sps:$4 sm:$0xff]  }
  0x45   :  { %601 = vmatprep.subr.bf16.mxu0 %v4807_v26  ;;  %v4876_v26 = vld [vmem:[#allocation3 + $0x1e8] ss:$12 sps:$4 sm:$0xff]   ;;  %v5627_v5 = vld [vmem:[#allocation6 + $0xf0] ss:$12 sps:$4 sm:$0xff]  }
  0x46   :  { %v5666_v16 = vld [vmem:[#allocation6 + $0x110] ss:$12 sps:$4 sm:$0xff]  }
  0x47   :  { %284 = vmatmul.mubr.bf16.vlgmr.msra.gmra.mrb[0].mxu0 %v70_v17  ;;  %4293 = vmatpush3.bf16.msra.mxu1 %v4824_v30  ;;  %v4855_v17 = vld [vmem:[#allocation3 + $0x1e4] ss:$12 sps:$4 sm:$0xff]   ;;  %v4880_v30 = vld [vmem:[#allocation3 + $0x200] ss:$12 sps:$4 sm:$0xff]  }
  0x48   :  { %602 = vmatpush1.bf16.msra.mxu0 %v4805_v28  ;;  %293 = vmatprep.mubr.bf16.mxu0 %v6977_v0  ;;  %v740_v28 = vld [vmem:[%s6969_s2] sm:$0xff] }
  0x49   :  { %603 = vmatprep.subr.bf16.mxu0 %v4811_v29  ;;  %4302 = vmatprep.subr.bf16.mxu1 %v6989_v40  ;;  %v741_v29 = vld [vmem:[%s6969_s2 + $0x8] sm:$0xff] }
  0x4a   :  { %4295 = vmatmul.mubr.bf16.vlgmr.msra.gmra.mrb[0].mxu1 %v71_v36  ;;  %v744_v32 = vpack.c.bf16 %v741_v29, %v740_v28  ;;  %v5708_v28 = vld [vmem:[#allocation6 + $0x170] ss:$12 sps:$4 sm:$0xff]  }
  0x4b   :  { %4303 = vmatpush3.bf16.msra.mxu1 %v4831_v41  ;;  %4298 = vmatprep.mubr.bf16.mxu1 %v72_v43  ;;  %v743_v41 = vld [vmem:[%s6969_s2 + $0x18] sm:$0xff] }
  0x4c   :  { %604 = vmatpush1.bf16.msra.mxu0 %v4809_v31  ;;  %4304 = vmatprep.subr.bf16.mxu1 %v6989_v40  ;;  %v4865_v31 = vld [vmem:[#allocation3 + $0x228] ss:$12 sps:$4 sm:$0xff]   ;;  %v5712_v29 = vld [vmem:[#allocation6 + $0x1b0] ss:$12 sps:$4 sm:$0xff]  }
  0x4d   :  { %605 = vmatprep.subr.bf16.mxu0 %v4815_v34  ;;  %v4884_v34 = vld [vmem:[#allocation3 + $0x218] ss:$12 sps:$4 sm:$0xff]   ;;  %7039 = vst [vmem:[#allocation13_spill] sm:$0xff] %v5712_v29 }
  0x4f   :  { %294 = vmatmul.mubr.bf16.gmra.mrb[4].mxu0 %v71_v36  ;;  %4305 = vmatpush3.bf16.msra.mxu1 %v4835_v45  ;;  %v5527_v36 = vld [vmem:[#allocation6 + $0x1c] ss:$12 sps:$4 sm:$0xff]   ;;  %v5546_v45 = vld [vmem:[#allocation6 + $0x4c] ss:$12 sps:$4 sm:$0xff]  }
  0x50   :  { %606 = vmatpush1.bf16.msra.mxu0 %v4813_v35  ;;  %303 = vmatprep.mubr.bf16.mxu0 %v6977_v0  ;;  %v5524_v35 = vld [vmem:[#allocation6] ss:$12 sps:$4 sm:$0xff]  }
  0x51   :  { %607 = vmatprep.subr.bf16.mxu0 %v4819_v37  ;;  %4306 = vmatprep.subr.bf16.mxu1 %v6989_v40  ;;  %v5529_v37 = vld [vmem:[#allocation6 + $0x18] ss:$12 sps:$4 sm:$0xff]  }
  0x52   :  { %4299 = vmatmul.mubr.bf16.gmra.mrb[4].mxu1 %v73_v51 }
  0x53   :  { %4307 = vmatpush3.bf16.msra.mxu1 %v4836_v50  ;;  %4318 = vmatprep.mubr.msk.bf16.mxu1 %vm5376_vm0, %v6989_v40  ;;  %v5565_v50 = vld [vmem:[#allocation6 + $0x60] ss:$12 sps:$4 sm:$0xff]  }
  0x54   :  { %608 = vmatpush1.bf16.msra.mxu0 %v4817_v42  ;;  %4308 = vmatprep.subr.bf16.mxu1 %v6989_v40  ;;  %v5540_v42 = vld [vmem:[#allocation6 + $0x34] ss:$12 sps:$4 sm:$0xff]  }
  0x55   :  { %609 = vmatprep.subr.bf16.mxu0 %v4823_v44  ;;  %v5543_v44 = vld [vmem:[#allocation6 + $0x30] ss:$12 sps:$4 sm:$0xff]  }
  0x57   :  { %304 = vmatmul.mubr.bf16.gmra.mrb[8].mxu0 %v72_v43  ;;  %4309 = vmatpush3.bf16.msra.mxu1 %v4840_v54  ;;  %v745_v43 = vpack.c.bf16 %v743_v41, %v742_v39  ;;  %v5578_v54 = vld [vmem:[#allocation6 + $0x94] ss:$12 sps:$4 sm:$0xff]   ;;  %v5738_v41 = vld [vmem:[#allocation6 + $0x1fc] ss:$12 sps:$4 sm:$0xff]  }
  0x58   :  { %610 = vmatpush1.bf16.msra.mxu0 %v4821_v46  ;;  %313 = vmatprep.mubr.bf16.mxu0 %v6977_v0  ;;  %v5548_v46 = vld [vmem:[#allocation6 + $0x8] ss:$12 sps:$4 sm:$0xff]   ;;  %v5735_v39 = vld [vmem:[#allocation6 + $0x1e0] ss:$12 sps:$4 sm:$0xff]   ;;  %7044 = vst [vmem:[#allocation18_spill] sm:$0xff] %v5738_v41 }
  0x59   :  { %611 = vmatprep.subr.bf16.mxu0 %v4827_v49  ;;  %4310 = vmatprep.subr.bf16.mxu1 %v6989_v40  ;;  %v5559_v49 = vld [vmem:[#allocation6 + $0x20] ss:$12 sps:$4 sm:$0xff]   ;;  %7043 = vst [vmem:[#allocation17_spill] sm:$0xff] %v5735_v39 }
  0x5b   :  { %4311 = vmatpush3.bf16.msra.mxu1 %v4844_v57  ;;  %v5585_v57 = vld [vmem:[#allocation6 + $0xac] ss:$12 sps:$4 sm:$0xff]  }
  0x5c   :  { %612 = vmatpush1.bf16.msra.mxu0 %v4825_v52  ;;  %4312 = vmatprep.subr.bf16.mxu1 %v6989_v40  ;;  %v5571_v52 = vld [vmem:[#allocation6 + $0x38] ss:$12 sps:$4 sm:$0xff]  }
  0x5d   :  { %613 = vmatprep.subr.bf16.mxu0 %v4830_v53  ;;  %v5575_v53 = vld [vmem:[#allocation6 + $0x78] ss:$12 sps:$4 sm:$0xff]  }
  0x5f   :  { %314 = vmatmul.mubr.bf16.gmra.mrb[12].mxu0 %v73_v51  ;;  %4313 = vmatpush3.bf16.msra.mxu1 %v4848_v62  ;;  %v5568_v51 = vld [vmem:[#allocation6 + $0x7c] ss:$12 sps:$4 sm:$0xff]   ;;  %v5602_v62 = vld [vmem:[#allocation6 + $0xc0] ss:$12 sps:$4 sm:$0xff]  }
  0x60   :  { %614 = vmatpush1.bf16.msra.mxu0 %v4828_v55  ;;  %633 = vmatprep.mubr.bf16.mxu0 %v6977_v0  ;;  %v5581_v55 = vld [vmem:[#allocation6 + $0x50] ss:$12 sps:$4 sm:$0xff]  }
  0x61   :  { %615 = vmatprep.subr.bf16.mxu0 %v4834_v56  ;;  %4314 = vmatprep.subr.bf16.mxu1 %v6989_v40  ;;  %v5583_v56 = vld [vmem:[#allocation6 + $0x90] ss:$12 sps:$4 sm:$0xff]  }
  0x63   :  { %4315 = vmatpush3.bf16.msra.mxu1 %v4852_v3  ;;  %v5616_v3 = vld [vmem:[#allocation6 + $0xf4] ss:$12 sps:$4 sm:$0xff]  }
  0x64   :  { %616 = vmatpush1.bf16.msra.mxu0 %v4832_v58  ;;  %4316 = vmatprep.subr.bf16.mxu1 %v6989_v40  ;;  %v5589_v58 = vld [vmem:[#allocation6 + $0x68] ss:$12 sps:$4 sm:$0xff]  }
  0x65   :  { %925 = vmatprep.subr.bf16.mxu0 %v4839_v61  ;;  %v5599_v61 = vld [vmem:[#allocation6 + $0x80] ss:$12 sps:$4 sm:$0xff]  }
  0x67   :  { %634 = vmatmul.mubr.bf16.vlgmr.msra.gmra.mrb[16].mxu0 %v419_v63  ;;  %4317 = vmatpush3.bf16.msra.mxu1 %v4856_v8  ;;  %v5637_v8 = vld [vmem:[#allocation6 + $0x108] ss:$12 sps:$4 sm:$0xff]  }
  0x68   :  { %926 = vmatpush1.bf16.msra.mxu0 %v4837_v1  ;;  %643 = vmatprep.mubr.bf16.mxu0 %v6977_v0  ;;  %v5609_v1 = vld [vmem:[#allocation6 + $0x98] ss:$12 sps:$4 sm:$0xff]  }
  0x69   :  { %927 = vmatprep.subr.bf16.mxu0 %v4843_v2  ;;  %4330 = vmatprep.subr.bf16.mxu1 %v4860_v10  ;;  %v5612_v2 = vld [vmem:[#allocation6 + $0xd8] ss:$12 sps:$4 sm:$0xff]  }
  0x6a   :  { %4319 = vmatmul.mubr.bf16.vlgmr.msra.gmra.mrb[8].mxu1 %v419_v63  ;;  %v5605_v63 = vld [vmem:[#allocation6 + $0xdc] ss:$12 sps:$4 sm:$0xff]  }
  0x6b   :  { %4331 = vmatpush3.bf16.msra.mxu1 %v4860_v10  ;;  %4322 = vmatprep.mubr.msk.bf16.mxu1 %vm5376_vm0, %v6989_v40  ;;  %v5644_v10 = vld [vmem:[#allocation6 + $0xe0] ss:$12 sps:$4 sm:$0xff]  }
  0x6c   :  { %928 = vmatpush1.bf16.msra.mxu0 %v4841_v4  ;;  %4332 = vmatprep.subr.bf16.mxu1 %v4864_v15  ;;  %v5620_v4 = vld [vmem:[#allocation6 + $0xb0] ss:$12 sps:$4 sm:$0xff]  }
  0x6d   :  { %929 = vmatprep.subr.bf16.mxu0 %v4847_v7  ;;  %7038 = vst [vmem:[#allocation12_spill] sm:$0xff] %v5620_v4  ;;  %v5633_v7 = vld [vmem:[#allocation6 + $0xc8] ss:$12 sps:$4 sm:$0xff]  }
  0x6f   :  { %644 = vmatmul.mubr.bf16.gmra.mrb[20].mxu0 %v420_v9  ;;  %4333 = vmatpush3.bf16.msra.mxu1 %v4864_v15  ;;  %v5663_v15 = vld [vmem:[#allocation6 + $0x154] ss:$12 sps:$4 sm:$0xff]  }
  0x70   :  { %930 = vmatpush1.bf16.msra.mxu0 %v4845_v11  ;;  %653 = vmatprep.mubr.bf16.mxu0 %v6977_v0  ;;  %v5650_v11 = vld [vmem:[#allocation6 + $0x120] ss:$12 sps:$4 sm:$0xff]  }
  0x71   :  { %931 = vmatprep.subr.bf16.mxu0 %v4851_v12  ;;  %4334 = vmatprep.subr.bf16.mxu1 %v4868_v19  ;;  %v5653_v12 = vld [vmem:[#allocation6 + $0x13c] ss:$12 sps:$4 sm:$0xff]  }
  0x72   :  { %4323 = vmatmul.mubr.bf16.gmra.mrb[12].mxu1 %v420_v9  ;;  %v5640_v9 = vld [vmem:[#allocation6 + $0x124] ss:$12 sps:$4 sm:$0xff]  }
  0x73   :  { %4335 = vmatpush3.bf16.msra.mxu1 %v4868_v19  ;;  %4326 = vmatprep.mubr.msk.bf16.mxu1 %vm5376_vm0, %v6989_v40  ;;  %v5676_v19 = vld [vmem:[#allocation6 + $0x128] ss:$12 sps:$4 sm:$0xff]  }
  0x74   :  { %932 = vmatpush1.bf16.msra.mxu0 %v4849_v13  ;;  %4336 = vmatprep.subr.bf16.mxu1 %v4872_v22  ;;  %v5656_v13 = vld [vmem:[#allocation6 + $0xf8] ss:$12 sps:$4 sm:$0xff]  }
  0x75   :  { %933 = vmatprep.subr.bf16.mxu0 %v4855_v17  ;;  %v5670_v17 = vld [vmem:[#allocation6 + $0x150] ss:$12 sps:$4 sm:$0xff]  }
  0x77   :  { %654 = vmatmul.mubr.bf16.gmra.mrb[24].mxu0 %v421_v18  ;;  %4337 = vmatpush3.bf16.msra.mxu1 %v4872_v22  ;;  %v5686_v22 = vld [vmem:[#allocation6 + $0x140] ss:$12 sps:$4 sm:$0xff]  }
  0x78   :  { %934 = vmatpush1.bf16.msra.mxu0 %v4853_v20  ;;  %957 = vmatprep.mubr.bf16.mxu0 %v6977_v0  ;;  %v5680_v20 = vld [vmem:[#allocation6 + $0x168] ss:$12 sps:$4 sm:$0xff]  }
  0x79   :  { %935 = vmatprep.subr.bf16.mxu0 %v4859_v21  ;;  %4338 = vmatprep.subr.bf16.mxu1 %v4876_v26  ;;  %v5683_v21 = vld [vmem:[#allocation6 + $0x184] ss:$12 sps:$4 sm:$0xff]  }
  0x7a   :  { %4327 = vmatmul.mubr.bf16.gmra.mrb[16].mxu1 %v421_v18  ;;  %v5673_v18 = vld [vmem:[#allocation6 + $0x16c] ss:$12 sps:$4 sm:$0xff]  }
  0x7b   :  { %4339 = vmatpush3.bf16.msra.mxu1 %v4876_v26  ;;  %4346 = vmatprep.mubr.bf16.mxu1 %v744_v32  ;;  %v5701_v26 = vld [vmem:[#allocation6 + $0x198] ss:$12 sps:$4 sm:$0xff]  }
  0x7c   :  { %936 = vmatpush1.bf16.msra.mxu0 %v4857_v23  ;;  %4340 = vmatprep.subr.bf16.mxu1 %v4880_v30  ;;  %v5690_v23 = vld [vmem:[#allocation6 + $0x180] ss:$12 sps:$4 sm:$0xff]  }
  0x7d   :  { %937 = vmatprep.subr.bf16.mxu0 %v4863_v24  ;;  %v5693_v24 = vld [vmem:[#allocation6 + $0x19c] ss:$12 sps:$4 sm:$0xff]  }
  0x7f   :  { %4341 = vmatpush3.bf16.msra.mxu1 %v4880_v30  ;;  %v5715_v30 = vld [vmem:[#allocation6 + $0x1cc] ss:$12 sps:$4 sm:$0xff]  }
  0x80   :  { %938 = vmatpush1.bf16.msra.mxu0 %v4861_v25  ;;  %4342 = vmatprep.subr.bf16.mxu1 %v4884_v34  ;;  %v5696_v25 = vld [vmem:[#allocation6 + $0x158] ss:$12 sps:$4 sm:$0xff]   ;;  %7040 = vst [vmem:[#allocation14_spill] sm:$0xff] %v5715_v30 }
  0x81   :  { %939 = vmatprep.subr.bf16.mxu0 %v4867_v27  ;;  %v5705_v27 = vld [vmem:[#allocation6 + $0x1b4] ss:$12 sps:$4 sm:$0xff]  }
  0x83   :  { %4343 = vmatpush3.bf16.msra.mxu1 %v4884_v34  ;;  %v5725_v34 = vld [vmem:[#allocation6 + $0x1e4] ss:$12 sps:$4 sm:$0xff]  }
  0x84   :  { %940 = vmatpush1.bf16.msra.mxu0 %v4865_v31  ;;  %4344 = vmatprep.subr.bf16.mxu1 %v4888_v38  ;;  %v5718_v31 = vld [vmem:[#allocation6 + $0x188] ss:$12 sps:$4 sm:$0xff]   ;;  %7042 = vst [vmem:[#allocation16_spill] sm:$0xff] %v5725_v34 }
  0x85   :  { %1223 = vmatprep.subr.bf16.mxu0 %v5522_v33 }
  0x87   :  { %958 = vmatmul.mubr.bf16.vlgmr.msra.gmra.mrb[28].mxu0 %v744_v32  ;;  %4345 = vmatpush3.bf16.msra.mxu1 %v4888_v38  ;;  %v5722_v32 = vld [vmem:[#allocation6 + $0x1c8] ss:$12 sps:$4 sm:$0xff]   ;;  %v5729_v38 = vld [vmem:[#allocation6 + $0x1a0] ss:$12 sps:$4 sm:$0xff]  }
  0x88   :  { %1224 = vmatpush1.bf16.msra.mxu0 %v5524_v35  ;;  %967 = vmatprep.mubr.bf16.mxu0 %v6977_v0  ;;  %7041 = vst [vmem:[#allocation15_spill] sm:$0xff] %v5722_v32 }
  0x89   :  { %1225 = vmatprep.subr.bf16.mxu0 %v5527_v36  ;;  %4350 = vmatprep.subr.bf16.mxu1 %v6989_v40 }
  0x8a   :  { %4347 = vmatmul.mubr.bf16.vlgmr.msra.gmra.mrb[20].mxu1 %v745_v43 }
  0x8b   :  { %4351 = vmatpush3.bf16.msra.mxu1 %v5548_v46  ;;  %4366 = vmatprep.mubr.msk.bf16.mxu1 %vm5376_vm0, %v6989_v40 }
  0x8c   :  { %1226 = vmatpush1.bf16.msra.mxu0 %v5529_v37  ;;  %4352 = vmatprep.subr.bf16.mxu1 %v6989_v40 }
  0x8d   :  { %1227 = vmatprep.subr.bf16.mxu0 %v5540_v42 }
  0x8f   :  { %968 = vmatmul.mubr.bf16.gmra.mrb[32].mxu0 %v745_v43  ;;  %4353 = vmatpush3.bf16.msra.mxu1 %v5559_v49  ;;  %v5741_v43 = vld [vmem:[#allocation6 + $0x1b8] ss:$12 sps:$4 sm:$0xff]  }
  0x90   :  { %1228 = vmatpush1.bf16.msra.mxu0 %v5543_v44  ;;  %1255 = vmatprep.mubr.bf16.mxu0 %v6977_v0 }
  0x91   :  { %1229 = vmatprep.subr.bf16.mxu0 %v5546_v45  ;;  %4354 = vmatprep.subr.bf16.mxu1 %v6989_v40 }
  0x93   :  { %4355 = vmatpush3.bf16.msra.mxu1 %v5571_v52 }
  0x94   :  { %1230 = vmatpush1.bf16.msra.mxu0 %v5552_v47  ;;  %4356 = vmatprep.subr.bf16.mxu1 %v6989_v40 }
  0x95   :  { %1231 = vmatprep.subr.bf16.mxu0 %v5556_v48 }
  0x97   :  { %4357 = vmatpush3.bf16.msra.mxu1 %v5581_v55 }
  0x98   :  { %1232 = vmatpush1.bf16.msra.mxu0 %v5565_v50  ;;  %4358 = vmatprep.subr.bf16.mxu1 %v6989_v40 }
  0x99   :  { %1233 = vmatprep.subr.bf16.mxu0 %v5568_v51 }
  0x9b   :  { %4359 = vmatpush3.bf16.msra.mxu1 %v5589_v58 }
  0x9c   :  { %1234 = vmatpush1.bf16.msra.mxu0 %v5575_v53  ;;  %4360 = vmatprep.subr.bf16.mxu1 %v6989_v40 }
  0x9d   :  { %1235 = vmatprep.subr.bf16.mxu0 %v5578_v54 }
  0x9f   :  { %4361 = vmatpush3.bf16.msra.mxu1 %v5599_v61 }
  0xa0   :  { %1236 = vmatpush1.bf16.msra.mxu0 %v5583_v56  ;;  %4362 = vmatprep.subr.bf16.mxu1 %v6989_v40 }
  0xa1   :  { %1237 = vmatprep.subr.bf16.mxu0 %v5585_v57 }
  0xa3   :  { %4363 = vmatpush3.bf16.msra.mxu1 %v5609_v1 }
  0xa4   :  { %1238 = vmatpush1.bf16.msra.mxu0 %v5592_v59  ;;  %4364 = vmatprep.subr.bf16.mxu1 %v6989_v40 }
  0xa5   :  { %1465 = vmatprep.subr.bf16.mxu0 %v5595_v60 }
  0xa7   :  { %1256 = vmatmul.mubr.bf16.vlgmr.msra.gmra.mrb[36].mxu0 %v6977_v0  ;;  %4365 = vmatpush3.bf16.msra.mxu1 %v5620_v4 }
  0xa8   :  { %1466 = vmatpush1.bf16.msra.mxu0 %v5602_v62  ;;  %1497 = vmatprep.mubr.bf16.mxu0 %v6977_v0 }
  0xa9   :  { %1467 = vmatprep.subr.bf16.mxu0 %v5605_v63  ;;  %4370 = vmatprep.subr.bf16.mxu1 %v6989_v40 }
  0xaa   :  { %4367 = vmatmul.mubr.bf16.vlgmr.msra.gmra.mrb[24].mxu1 %v6977_v0 }
  0xab   :  { %4371 = vmatpush3.bf16.msra.mxu1 %v5633_v7  ;;  %4386 = vmatprep.mubr.msk.bf16.mxu1 %vm5376_vm0, %v6989_v40 }
  0xac   :  { %1468 = vmatpush1.bf16.msra.mxu0 %v5612_v2  ;;  %4372 = vmatprep.subr.bf16.mxu1 %v6989_v40 }
  0xad   :  { %1469 = vmatprep.subr.bf16.mxu0 %v5616_v3 }
  0xaf   :  { %4373 = vmatpush3.bf16.msra.mxu1 %v5644_v10 }
  0xb0   :  { %1470 = vmatpush1.bf16.msra.mxu0 %v5627_v5  ;;  %4374 = vmatprep.subr.bf16.mxu1 %v6989_v40 }
  0xb1   :  { %1471 = vmatprep.subr.bf16.mxu0 %v5630_v6 }
  0xb3   :  { %4375 = vmatpush3.bf16.msra.mxu1 %v5656_v13 }
  0xb4   :  { %1472 = vmatpush1.bf16.msra.mxu0 %v5637_v8  ;;  %4376 = vmatprep.subr.bf16.mxu1 %v6989_v40 }
  0xb5   :  { %1473 = vmatprep.subr.bf16.mxu0 %v5640_v9 }
  0xb7   :  { %4377 = vmatpush3.bf16.msra.mxu1 %v5666_v16 }
  0xb8   :  { %1474 = vmatpush1.bf16.msra.mxu0 %v5650_v11  ;;  %4378 = vmatprep.subr.bf16.mxu1 %v6989_v40 }
  0xb9   :  { %1475 = vmatprep.subr.bf16.mxu0 %v5653_v12 }
  0xbb   :  { %4379 = vmatpush3.bf16.msra.mxu1 %v5676_v19 }
  0xbc   :  { %1476 = vmatpush1.bf16.msra.mxu0 %v5660_v14  ;;  %4380 = vmatprep.subr.bf16.mxu1 %v6989_v40 }
  0xbd   :  { %1477 = vmatprep.subr.bf16.mxu0 %v5663_v15 }
  0xbf   :  { %4381 = vmatpush3.bf16.msra.mxu1 %v5686_v22 }
  0xc0   :  { %1478 = vmatpush1.bf16.msra.mxu0 %v5670_v17  ;;  %4382 = vmatprep.subr.bf16.mxu1 %v6989_v40 }
  0xc1   :  { %1479 = vmatprep.subr.bf16.mxu0 %v5673_v18 }
  0xc3   :  { %4383 = vmatpush3.bf16.msra.mxu1 %v5696_v25 }
  0xc4   :  { %1480 = vmatpush1.bf16.msra.mxu0 %v5680_v20  ;;  %4384 = vmatprep.subr.bf16.mxu1 %v6989_v40 }
  0xc5   :  { %1707 = vmatprep.subr.bf16.mxu0 %v5683_v21 }
  0xc7   :  { %1498 = vmatmul.mubr.bf16.vlgmr.msra.gmra.mrb[40].mxu0 %v6977_v0  ;;  %4385 = vmatpush3.bf16.msra.mxu1 %v5708_v28 }
  0xc8   :  { %1708 = vmatpush1.bf16.msra.mxu0 %v5690_v23  ;;  %1739 = vmatprep.mubr.bf16.mxu0 %v6977_v0 }
  0xc9   :  { %1709 = vmatprep.subr.bf16.mxu0 %v5693_v24  ;;  %4390 = vmatprep.subr.bf16.mxu1 %v6989_v40 }
  0xca   :  { %4387 = vmatmul.mubr.bf16.vlgmr.msra.gmra.mrb[28].mxu1 %v6977_v0  ;;  %v5745_v0 = vld [vmem:[#allocation6 + $0x1f8] ss:$12 sps:$4 sm:$0xff]  }
  0xcb   :  { %4391 = vmatpush3.bf16.msra.mxu1 %v5718_v31  ;;  %4406 = vmatprep.mubr.msk.bf16.mxu1 %vm5376_vm0, %v6989_v40  ;;  %7045 = vst [vmem:[#allocation19_spill] sm:$0xff] %v5745_v0 }
  0xcc   :  { %1710 = vmatpush1.bf16.msra.mxu0 %v5701_v26  ;;  %4392 = vmatprep.subr.bf16.mxu1 %v6989_v40 }
  0xcd   :  { %1711 = vmatprep.subr.bf16.mxu0 %v5705_v27 }
  0xcf   :  { %4393 = vmatpush3.bf16.msra.mxu1 %v5729_v38 }
  0xd0   :  { %1712 = vmatpush1.bf16.msra.mxu0 %v5712_v29  ;;  %4394 = vmatprep.subr.bf16.mxu1 %v6989_v40  ;;  %v5758_v29 = vld [vmem:[#allocation6 + $0x22c] ss:$12 sps:$4 sm:$0xff]  }
  0xd1   :  { %1713 = vmatprep.subr.bf16.mxu0 %v5715_v30  ;;  %v5748_v30 = vld [vmem:[#allocation6 + $0x214] ss:$12 sps:$4 sm:$0xff]   ;;  %7049 = vst [vmem:[#allocation23_spill] sm:$0xff] %v5758_v29 }
  0xd2   :  { %7046 = vst [vmem:[#allocation20_spill] sm:$0xff] %v5748_v30 }
  0xd3   :  { %4395 = vmatpush3.bf16.msra.mxu1 %v5741_v43 }
  0xd4   :  { %1714 = vmatpush1.bf16.msra.mxu0 %v5722_v32  ;;  %v5751_v32 = vld [vmem:[#allocation6 + $0x1d0] ss:$12 sps:$4 sm:$0xff]   ;;  %4396 = vmatprep.subr.bf16.mxu1 %v6989_v40 }
  0xd5   :  { %1715 = vmatprep.subr.bf16.mxu0 %v5725_v34  ;;  %7047 = vst [vmem:[#allocation21_spill] sm:$0xff] %v5751_v32  ;;  %v5755_v34 = vld [vmem:[#allocation6 + $0x210] ss:$12 sps:$4 sm:$0xff]  }
  0xd6   :  { %7048 = vst [vmem:[#allocation22_spill] sm:$0xff] %v5755_v34 }
  0xd7   :  { %4397 = vmatpush3.bf16.msra.mxu1 %v5751_v32  ;;  %v7054_v32 = vmov 0  }
  0xd8   :  { %1716 = vmatpush1.bf16.msra.mxu0 %v5735_v39  ;;  %v5761_v39 = vld [vmem:[#allocation6 + $0x1e8] ss:$12 sps:$4 sm:$0xff]   ;;  %4398 = vmatprep.subr.bf16.mxu1 %v6989_v40 }
  0xd9   :  { %1717 = vmatprep.subr.bf16.mxu0 %v5738_v41  ;;  %7050 = vst [vmem:[#allocation24_spill] sm:$0xff] %v5761_v39  ;;  %v5765_v41 = vld [vmem:[#allocation6 + $0x228] ss:$12 sps:$4 sm:$0xff]  }
  0xda   :  { %7051 = vst [vmem:[#allocation25_spill] sm:$0xff] %v5765_v41 }
  0xdb   :  { %4399 = vmatpush3.bf16.msra.mxu1 %v5761_v39 }
  0xdc   :  { %1718 = vmatpush1.bf16.msra.mxu0 %v5745_v0  ;;  %v5769_v0 = vld [vmem:[#allocation6 + $0x200] ss:$12 sps:$4 sm:$0xff]   ;;  %4400 = vmatprep.subr.bf16.mxu1 %v6989_v40 }
  0xdd   :  { %1719 = vmatprep.subr.bf16.mxu0 %v5748_v30  ;;  %7052 = vst [vmem:[#allocation26_spill] sm:$0xff] %v5769_v0  ;;  %v5775_v30 = vld [vmem:[#allocation6 + $0x218] ss:$12 sps:$4 sm:$0xff]  }
  0xde   :  { %7053 = vst [vmem:[#allocation27_spill] sm:$0xff] %v5775_v30 }
  0xdf   :  { %4401 = vmatpush3.bf16.msra.mxu1 %v5769_v0 }
  0xe0   :  { %1720 = vmatpush1.bf16.msra.mxu0 %v5755_v34  ;;  %4402 = vmatprep.subr.bf16.mxu1 %v6989_v40 }
  0xe1   :  { %1721 = vmatprep.subr.bf16.mxu0 %v5758_v29  ;;  %v5783_v29 = vld [vmem:[#allocation6 + $0x230] ss:$12 sps:$4 sm:$0xff]  }
  0xe2   :  { %7055 = vst [vmem:[#allocation28_spill] sm:$0xff] %v5783_v29 }
  0xe3   :  { %4403 = vmatpush3.bf16.msra.mxu1 %v5775_v30 }
  0xe4   :  { %1722 = vmatpush1.bf16.msra.mxu0 %v5765_v41  ;;  %4404 = vmatprep.subr.bf16.mxu1 %v6989_v40 }
  0xe5   :  { %1864 = vmatprep.subr.bf16.mxu0 %v5522_v33  ;;  %v108_v33 = vlaneseq }
  0xe7   :  { %1740 = vmatmul.mubr.bf16.vlgmr.msra.gmra.mrb[44].mxu0 %v7054_v32  ;;  %4405 = vmatpush3.bf16.msra.mxu1 %v5783_v29 }
  0xe8   :  { %1865 = vmatpush1.bf16.msra.mxu0 %v5524_v35  ;;  %1896 = vmatprep.mubr.bf16.mxu0 %v7054_v32  ;;  %v109_v35 = vshrl.u32 %v108_v33, 7 }
  0xe9   :  { %1866 = vmatprep.subr.bf16.mxu0 %v5527_v36  ;;  %4410 = vmatprep.subr.bf16.mxu1 %v6989_v40 }
  0xea   :  { %4407 = vmatmul.mubr.bf16.vlgmr.msra.gmra.mrb[32].mxu1 %v7054_v32  ;;  %v5821_v36 = vsub.s32 0, %v109_v35 }
  0xeb   :  { %4411 = vmatpush3.bf16.msra.mxu1 %v5548_v46  ;;  %4426 = vmatprep.mubr.msk.bf16.mxu1 %vm5376_vm0, %v6989_v40 }
  0xec   :  { %1867 = vmatpush1.bf16.msra.mxu0 %v5529_v37  ;;  %4412 = vmatprep.subr.bf16.mxu1 %v6989_v40  ;;  %v106_v37 = vld [vmem:[%s6972_s5] sm:$0x7] }
  0xed   :  { %1868 = vmatprep.subr.bf16.mxu0 %v5540_v42  ;;  %v5826_v42 = vsub.s32 1, %v109_v35 }
  0xef   :  { %4413 = vmatpush3.bf16.msra.mxu1 %v5559_v49 }
  0xf0   :  { %1869 = vmatpush1.bf16.msra.mxu0 %v5543_v44  ;;  %4414 = vmatprep.subr.bf16.mxu1 %v6989_v40  ;;  %v5829_v44 = vrot.slane %v106_v37, %v5821_v36 }
  0xf1   :  { %1870 = vmatprep.subr.bf16.mxu0 %v5546_v45 }
  0xf3   :  { %4415 = vmatpush3.bf16.msra.mxu1 %v5571_v52 }
  0xf4   :  { %1871 = vmatpush1.bf16.msra.mxu0 %v5552_v47  ;;  %4416 = vmatprep.subr.bf16.mxu1 %v6989_v40  ;;  %v5836_v47 = vrot.slane %v106_v37, %v5826_v42 }
  0xf5   :  { %1872 = vmatprep.subr.bf16.mxu0 %v5556_v48 }
  0xf7   :  { %4417 = vmatpush3.bf16.msra.mxu1 %v5581_v55 }
  0xf8   :  { %1873 = vmatpush1.bf16.msra.mxu0 %v5565_v50  ;;  %4418 = vmatprep.subr.bf16.mxu1 %v6989_v40 }
  0xf9   :  { %1874 = vmatprep.subr.bf16.mxu0 %v5568_v51  ;;  %v5841_v51 = vsub.s32 2, %v109_v35 }
  0xfb   :  { %4419 = vmatpush3.bf16.msra.mxu1 %v5589_v58 }
  0xfc   :  { %1875 = vmatpush1.bf16.msra.mxu0 %v5575_v53  ;;  %4420 = vmatprep.subr.bf16.mxu1 %v6989_v40  ;;  %v5847_v53 = vrot.slane %v106_v37, %v5841_v51 }
  0xfd   :  { %1876 = vmatprep.subr.bf16.mxu0 %v5578_v54 }
  0xff   :  { %4421 = vmatpush3.bf16.msra.mxu1 %v5599_v61 }
 0x100   :  { %1877 = vmatpush1.bf16.msra.mxu0 %v5583_v56  ;;  %4422 = vmatprep.subr.bf16.mxu1 %v6989_v40 }
 0x101   :  { %1878 = vmatprep.subr.bf16.mxu0 %v5585_v57 }
 0x103   :  { %4423 = vmatpush3.bf16.msra.mxu1 %v5609_v1 }
 0x104   :  { %1879 = vmatpush1.bf16.msra.mxu0 %v5592_v59  ;;  %4424 = vmatprep.subr.bf16.mxu1 %v6989_v40 }
 0x105   :  { %1946 = vmatprep.subr.bf16.mxu0 %v5595_v60 }
 0x107   :  { %4425 = vmatpush3.bf16.msra.mxu1 %v5620_v4 }
 0x108   :  { %4430 = vmatprep.subr.bf16.mxu1 %v6989_v40 }
 0x11a   :  { %v5831_v45 = vpop.f32.mrb[0].mxu0 }
 0x11b   :  { %v5833_v46 = vpop.f32.mrb[1].mxu0 }
 0x11c   :  { %v289_v48 = vpop.f32.mrb[2].mxu0 }
 0x11d   :  { %v5839_v49 = vadd.f32 %v289_v48, %v5829_v44  ;;  %v291_v50 = vpop.f32.mrb[3].mxu0  ;;  %v4296_v59 = vpop.f32.mrb[0].mxu1 }
 0x11e   :  { %v5844_v52 = vadd.f32 %v291_v50, %v5836_v47  ;;  %v5859_v1 = vadd.f32 %v4296_v59, %v5847_v53  ;;  %v5861_v33 = vpop.f32.mrb[1].mxu1 }
 0x11f   :  { %7056 = vst [vmem:[#allocation29_spill] sm:$0xff] %v5839_v49  ;;  %v4297_v37 = vpop.f32.mrb[2].mxu1 }
 0x120   :  { %7057 = vst [vmem:[#allocation30_spill] sm:$0xff] %v5844_v52  ;;  %7061 = vst [vmem:[#allocation34_spill] sm:$0xff] %v5859_v1  ;;  %v5867_v48 = vadd.f32 %v4297_v37, %v5847_v53  ;;  %v361_v50 = vpop.f32.mrb[3].mxu1 }
 0x122   :  { %v295_v54 = vpop.f32.mrb[4].mxu0  ;;  %7063 = vst [vmem:[#allocation36_spill] sm:$0xff] %v5867_v48 }
 0x123   :  { %v5850_v55 = vadd.f32 %v295_v54, %v5829_v44  ;;  %v297_v56 = vpop.f32.mrb[5].mxu0  ;;  %v5870_v54 = vadd.f32 %v361_v50, %v5847_v53 }
 0x124   :  { %v5853_v57 = vadd.f32 %v297_v56, %v5836_v47  ;;  %v299_v58 = vpop.f32.mrb[6].mxu0 }
 0x125   :  { %7058 = vst [vmem:[#allocation31_spill] sm:$0xff] %v5850_v55  ;;  %v5856_v60 = vadd.f32 %v299_v58, %v5829_v44  ;;  %v301_v61 = vpop.f32.mrb[7].mxu0  ;;  %7064 = vst [vmem:[#allocation37_spill] sm:$0xff] %v5870_v54  ;;  %v4300_v1 = vpop.f32.mrb[4].mxu1 }
 0x126   :  { %7059 = vst [vmem:[#allocation32_spill] sm:$0xff] %v5853_v57  ;;  %v5864_v35 = vadd.f32 %v301_v61, %v5836_v47  ;;  %v5882_v37 = vadd.f32 %v4300_v1, %v5847_v53  ;;  %v374_v48 = vpop.f32.mrb[5].mxu1 }
 0x127   :  { %7060 = vst [vmem:[#allocation33_spill] sm:$0xff] %v5856_v60 }
 0x128   :  { %7062 = vst [vmem:[#allocation35_spill] sm:$0xff] %v5864_v35  ;;  %7068 = vst [vmem:[#allocation41_spill] sm:$0xff] %v5882_v37 }
 0x12a   :  { %v305_v56 = vpop.f32.mrb[8].mxu0 }
 0x12b   :  { %v5873_v58 = vadd.f32 %v305_v56, %v5829_v44  ;;  %v307_v40 = vpop.f32.mrb[9].mxu0  ;;  %v5888_v56 = vadd.f32 %v374_v48, %v5847_v53 }
 0x12c   :  { %v5876_v59 = vadd.f32 %v307_v40, %v5836_v47  ;;  %v309_v60 = vpop.f32.mrb[10].mxu0 }
 0x12d   :  { %7065 = vst [vmem:[#allocation38_spill] sm:$0xff] %v5873_v58  ;;  %v5879_v61 = vadd.f32 %v309_v60, %v5829_v44  ;;  %v311_v35 = vpop.f32.mrb[11].mxu0  ;;  %7070 = vst [vmem:[#allocation43_spill] sm:$0xff] %v5888_v56  ;;  %v4301_v58 = vpop.f32.mrb[6].mxu1 }
 0x12e   :  { %7066 = vst [vmem:[#allocation39_spill] sm:$0xff] %v5876_v59  ;;  %v5885_v50 = vadd.f32 %v311_v35, %v5836_v47  ;;  %v5891_v40 = vadd.f32 %v4301_v58, %v5847_v53  ;;  %v377_v59 = vpop.f32.mrb[7].mxu1 }
 0x12f   :  { %7067 = vst [vmem:[#allocation40_spill] sm:$0xff] %v5879_v61  ;;  %v5894_v57 = vadd.f32 %v377_v59, %v5847_v53  ;;  %v3836_v59 = vld [vmem:[%s6972_s5 + $0x3] sm:$0x7] }
 0x130   :  { %7069 = vst [vmem:[#allocation42_spill] sm:$0xff] %v5885_v50  ;;  %7071 = vst [vmem:[#allocation44_spill] sm:$0xff] %v5891_v40  ;;  %v5912_v40 = vrot.slane %v3836_v59, %v5821_v36  ;;  %v5931_v55 = vrot.slane %v3836_v59, %v5841_v51 }
 0x131   :  { %7072 = vst [vmem:[#allocation45_spill] sm:$0xff] %v5894_v57 }
 0x132   :  { %v315_v60 = vpop.f32.mrb[12].mxu0 }
 0x133   :  { %v5897_v61 = vadd.f32 %v315_v60, %v5829_v44  ;;  %v317_v1 = vpop.f32.mrb[13].mxu0 }
 0x134   :  { %v5900_v37 = vadd.f32 %v317_v1, %v5836_v47  ;;  %v319_v35 = vpop.f32.mrb[14].mxu0  ;;  %v5919_v1 = vrot.slane %v3836_v59, %v5826_v42 }
 0x135   :  { %7073 = vst [vmem:[#allocation46_spill] sm:$0xff] %v5897_v61  ;;  %v5903_v48 = vadd.f32 %v319_v35, %v5829_v44  ;;  %v321_v50 = vpop.f32.mrb[15].mxu0 }
 0x136   :  { %7074 = vst [vmem:[#allocation47_spill] sm:$0xff] %v5900_v37  ;;  %v5906_v58 = vadd.f32 %v321_v50, %v5836_v47 }
 0x137   :  { %7075 = vst [vmem:[#allocation48_spill] sm:$0xff] %v5903_v48 }
 0x138   :  { %7076 = vst [vmem:[#allocation49_spill] sm:$0xff] %v5906_v58 }
 0x13a   :  { %v5914_v60 = vpop.f32.mrb[16].mxu0 }
 0x13b   :  { %v5916_v61 = vpop.f32.mrb[17].mxu0 }
 0x13c   :  { %v639_v35 = vpop.f32.mrb[18].mxu0 }
 0x13d   :  { %v5922_v48 = vadd.f32 %v639_v35, %v5912_v40  ;;  %v641_v50 = vpop.f32.mrb[19].mxu0  ;;  %v5936_v49 = vpop.f32.mrb[8].mxu1 }
 0x13e   :  { %v5925_v58 = vadd.f32 %v641_v50, %v5919_v1  ;;  %v4320_v50 = vpop.f32.mrb[9].mxu1 }
 0x13f   :  { %7077 = vst [vmem:[#allocation50_spill] sm:$0xff] %v5922_v48 }
 0x140   :  { %7078 = vst [vmem:[#allocation51_spill] sm:$0xff] %v5925_v58 }
 0x142   :  { %v645_v37 = vpop.f32.mrb[20].mxu0 }
 0x143   :  { %v5928_v57 = vadd.f32 %v645_v37, %v5912_v40  ;;  %v647_v56 = vpop.f32.mrb[21].mxu0  ;;  %v701_v37 = vpop.f32.mrb[10].mxu1 }
 0x144   :  { %v5934_v54 = vadd.f32 %v647_v56, %v5919_v1  ;;  %v649_v52 = vpop.f32.mrb[22].mxu0  ;;  %v4321_v59 = vpop.f32.mrb[11].mxu1 }
 0x145   :  { %7079 = vst [vmem:[#allocation52_spill] sm:$0xff] %v5928_v57  ;;  %v5939_v35 = vadd.f32 %v649_v52, %v5912_v40  ;;  %v651_v48 = vpop.f32.mrb[23].mxu0  ;;  %v5945_v57 = vadd.f32 %v701_v37, %v5931_v55 }
 0x146   :  { %7080 = vst [vmem:[#allocation53_spill] sm:$0xff] %v5934_v54  ;;  %v5942_v58 = vadd.f32 %v651_v48, %v5919_v1 }
 0x147   :  { %7081 = vst [vmem:[#allocation54_spill] sm:$0xff] %v5939_v35  ;;  %7083 = vst [vmem:[#allocation56_spill] sm:$0xff] %v5945_v57  ;;  %v706_v35 = vpop.f32.mrb[12].mxu1 }
 0x148   :  { %7082 = vst [vmem:[#allocation55_spill] sm:$0xff] %v5942_v58  ;;  %v5957_v58 = vadd.f32 %v706_v35, %v5931_v55  ;;  %v4324_v37 = vpop.f32.mrb[13].mxu1 }
 0x149   :  { %v709_v57 = vpop.f32.mrb[14].mxu1 }
 0x14a   :  { %v655_v4 = vpop.f32.mrb[24].mxu0  ;;  %7087 = vst [vmem:[#allocation60_spill] sm:$0xff] %v5957_v58 }
 0x14b   :  { %v5948_v56 = vadd.f32 %v655_v4, %v5912_v40  ;;  %v657_v54 = vpop.f32.mrb[25].mxu0  ;;  %v5963_v4 = vadd.f32 %v709_v57, %v5931_v55 }
 0x14c   :  { %v5951_v29 = vadd.f32 %v657_v54, %v5919_v1  ;;  %v659_v52 = vpop.f32.mrb[26].mxu0  ;;  %v3861_v54 = vld [vmem:[%s6972_s5 + $0x6] sm:$0x7] }
 0x14d   :  { %7084 = vst [vmem:[#allocation57_spill] sm:$0xff] %v5948_v56  ;;  %v5954_v50 = vadd.f32 %v659_v52, %v5912_v40  ;;  %v661_v48 = vpop.f32.mrb[27].mxu0  ;;  %7089 = vst [vmem:[#allocation62_spill] sm:$0xff] %v5963_v4  ;;  %v4325_v56 = vpop.f32.mrb[15].mxu1  ;;  %v785_v37 = vrot.slane %v3861_v54, %v5821_v36  ;;  %v789_v57 = vrot.slane %v3861_v54, %v5826_v42 }
 0x14e   :  { %7085 = vst [vmem:[#allocation58_spill] sm:$0xff] %v5951_v29  ;;  %v5960_v59 = vadd.f32 %v661_v48, %v5919_v1  ;;  %v714_v29 = vpop.f32.mrb[16].mxu1  ;;  %v793_v36 = vrot.slane %v3861_v54, %v5841_v51 }
 0x14f   :  { %7086 = vst [vmem:[#allocation59_spill] sm:$0xff] %v5954_v50  ;;  %v5969_v52 = vadd.f32 %v714_v29, %v5931_v55  ;;  %v4328_v50 = vpop.f32.mrb[17].mxu1 }
 0x150   :  { %7088 = vst [vmem:[#allocation61_spill] sm:$0xff] %v5960_v59  ;;  %v717_v35 = vpop.f32.mrb[18].mxu1 }
 0x151   :  { %7090 = vst [vmem:[#allocation63_spill] sm:$0xff] %v5969_v52  ;;  %v5973_v48 = vadd.f32 %v717_v35, %v5931_v55  ;;  %v4329_v59 = vpop.f32.mrb[19].mxu1 }
 0x153   :  { %7091 = vst [vmem:[#allocation64_spill] sm:$0xff] %v5973_v48 }
 0x15a   :  { %v959_v4 = vpop.f32.mrb[28].mxu0 }
 0x15b   :  { %v5976_v56 = vadd.f32 %v959_v4, %v785_v37  ;;  %v961_v58 = vpop.f32.mrb[29].mxu0 }
 0x15c   :  { %v5978_v41 = vadd.f32 %v961_v58, %v789_v57  ;;  %v963_v30 = vpop.f32.mrb[30].mxu0 }
 0x15d   :  { %v5980_v34 = vadd.f32 %v963_v30, %v785_v37  ;;  %v965_v29 = vpop.f32.mrb[31].mxu0  ;;  %v4348_v4 = vpop.f32.mrb[20].mxu1 }
 0x15e   :  { %v5982_v50 = vadd.f32 %v965_v29, %v789_v57  ;;  %v5991_v39 = vadd.f32 %v4348_v4, %v793_v36  ;;  %v1012_v30 = vpop.f32.mrb[21].mxu1 }
 0x15f   :  { %7092 = vst [vmem:[#allocation65_spill] sm:$0xff] %v5980_v34  ;;  %v5995_v29 = vadd.f32 %v1012_v30, %v793_v36 }
 0x160   :  { %7093 = vst [vmem:[#allocation66_spill] sm:$0xff] %v5982_v50  ;;  %7097 = vst [vmem:[#allocation70_spill] sm:$0xff] %v5991_v39  ;;  %v4349_v50 = vpop.f32.mrb[22].mxu1 }
 0x161   :  { %v5997_v51 = vadd.f32 %v4349_v50, %v793_v36  ;;  %v1015_v54 = vpop.f32.mrb[23].mxu1 }
 0x162   :  { %v969_v52 = vpop.f32.mrb[32].mxu0 }
 0x163   :  { %v5985_v35 = vadd.f32 %v969_v52, %v785_v37  ;;  %v971_v59 = vpop.f32.mrb[33].mxu0  ;;  %7099 = vst [vmem:[#allocation72_spill] sm:$0xff] %v5997_v51  ;;  %v5999_v52 = vadd.f32 %v1015_v54, %v793_v36 }
 0x164   :  { %v5987_v48 = vadd.f32 %v971_v59, %v789_v57  ;;  %v973_v42 = vpop.f32.mrb[34].mxu0  ;;  %v286_v59 = vadd.f32 %v5831_v45, %v5829_v44  ;;  %v6008_v45 = vld [vmem:[%s6973_s6] ss:$0 sm:$0xff] }
 0x165   :  { %7094 = vst [vmem:[#allocation67_spill] sm:$0xff] %v5985_v35  ;;  %v5989_v0 = vadd.f32 %v973_v42, %v785_v37  ;;  %v975_v58 = vpop.f32.mrb[35].mxu0  ;;  %v288_v37 = vadd.f32 %v5833_v46, %v5836_v47 }
 0x166   :  { %7095 = vst [vmem:[#allocation68_spill] sm:$0xff] %v5987_v48  ;;  %v5993_v34 = vadd.f32 %v975_v58, %v789_v57 }
 0x167   :  { %7096 = vst [vmem:[#allocation69_spill] sm:$0xff] %v5989_v0 }
 0x168   :  { %7098 = vst [vmem:[#allocation71_spill] sm:$0xff] %v5993_v34 }
 0x17a   :  { %v1257_v42 = vpop.f32.mrb[36].mxu0 }
 0x17b   :  { %v1791_v4 = vadd.f32 %v1257_v42, %v286_v59  ;;  %v1259_v0 = vpop.f32.mrb[37].mxu0 }
 0x17c   :  { %v1798_v39 = vadd.f32 %v1259_v0, %v288_v37  ;;  %v1261_v57 = vpop.f32.mrb[38].mxu0 }
 0x17d   :  { %v3963_v58 = vmul.f32 -1.442695, %v1791_v4  ;;  %v1262_v30 = vpop.f32.mrb[39].mxu0  ;;  %v1298_v50 = vpop.f32.mrb[24].mxu1 }
 0x17e   :  { %v3964_v34 = vmul.f32 -1.442695, %v1798_v39  ;;  %v4368_v51 = vpop.f32.mrb[25].mxu1  ;;  %v1805_v46 = vadd.f32 %v6008_v45, %v1298_v50  ;;  %v359_v39 = vadd.f32 %v5861_v33, %v5847_v53 }
 0x17f   :  { %4994 = vpow2.f32 %v3963_v58  ;;  %v1301_v36 = vpop.f32.mrb[26].mxu1  ;;  %v636_v51 = vadd.f32 %v5914_v60, %v5912_v40 }
 0x180   :  { %4996 = vpow2.f32 %v3964_v34  ;;  %v4369_v54 = vpop.f32.mrb[27].mxu1 }
 0x189   :  { %v4995_v48 = vpop.eup %4994 }
 0x18a   :  { %v1795_v35 = vadd.f32 1.0, %v4995_v48  ;;  %v4997_v44 = vpop.eup %4996 }
 0x18b   :  { %v1802_v0 = vadd.f32 1.0, %v4997_v44 }
 0x18c   :  { %4998 = vrcp.f32 %v1795_v35  ;;  %v638_v35 = vadd.f32 %v5916_v61, %v5919_v1 }
 0x18d   :  { %5000 = vrcp.f32 %v1802_v0 }
 0x196   :  { %v4999_v47 = vpop.eup %4998 }
 0x197   :  { %v1806_v34 = vmul.f32 %v4999_v47, %v1805_v46  ;;  %v5001_v50 = vpop.eup %5000 }
 0x198   :  { %v1809_v33 = vsub.f32 1.0, %v5001_v50  ;;  %v1811_v60 = vmul.f32 0.0, %v5001_v50  ;;  %v7109_v50 = vld [vmem:[#allocation19_spill] sm:$0xff] }
 0x199   :  { %v1807_v48 = vadd.f32 %v1806_v34, %v359_v39  ;;  %v7100_v34 = vmov 0.0  }
 0x19a   :  { %v1499_v59 = vpop.f32.mrb[40].mxu0 }
 0x19b   :  { %5002 = vtanh.f32 %v1807_v48  ;;  %v1816_v37 = vadd.f32 %v1499_v59, %v636_v51  ;;  %v1501_v42 = vpop.f32.mrb[41].mxu0  ;;  %v6031_v48 = vld [vmem:[%s6973_s6 + $0x1] ss:$0 sm:$0xff] }
 0x19c   :  { %v1823_v4 = vadd.f32 %v1501_v42, %v638_v35  ;;  %v1503_v57 = vpop.f32.mrb[42].mxu0  ;;  %v7103_v42 = vld [vmem:[#allocation15_spill] sm:$0xff] }
 0x19d   :  { %v3965_v58 = vmul.f32 -1.442695, %v1816_v37  ;;  %v1504_v30 = vpop.f32.mrb[43].mxu0  ;;  %v1540_v36 = vpop.f32.mrb[28].mxu1  ;;  %v7106_v57 = vld [vmem:[#allocation17_spill] sm:$0xff] }
 0x19e   :  { %v3966_v53 = vmul.f32 -1.442695, %v1823_v4  ;;  %v4388_v44 = vpop.f32.mrb[29].mxu1  ;;  %v7105_v4 = vld [vmem:[#allocation16_spill] sm:$0xff] }
 0x19f   :  { %5004 = vpow2.f32 %v3965_v58  ;;  %v1543_v0 = vpop.f32.mrb[30].mxu1  ;;  %v7108_v58 = vld [vmem:[#allocation18_spill] sm:$0xff]  ;;  %v7113_v44 = vld [vmem:[#allocation27_spill] sm:$0xff] }
 0x1a0   :  { %5006 = vpow2.f32 %v3966_v53  ;;  %v4389_v61 = vpop.f32.mrb[31].mxu1  ;;  %v7111_v53 = vld [vmem:[#allocation20_spill] sm:$0xff] }
 0x1a5   :  { %v5003_v54 = vpop.eup %5002 }
 0x1a6   :  { %v1810_v40 = vmul.f32 %v5003_v54, %v1809_v33  ;;  %v7112_v54 = vld [vmem:[#allocation22_spill] sm:$0xff] }
 0x1a8   :  { %v6017_v1 = vadd.f32 %v1811_v60, %v1810_v40  ;;  %v7114_v40 = vld [vmem:[#allocation23_spill] sm:$0xff] }
 0x1a9   :  { %v5005_v46 = vpop.eup %5004 }
 0x1aa   :  { %v1820_v47 = vadd.f32 1.0, %v5005_v46  ;;  %v1863_v39 = vpack.c.bf16 %v6017_v1, %v6017_v1  ;;  %v5007_v51 = vpop.eup %5006  ;;  %v7115_v46 = vld [vmem:[#allocation25_spill] sm:$0xff] }
 0x1ac   :  { %5008 = vrcp.f32 %v1820_v47  ;;  %1897 = vmatmul.mubr.bf16.vlgmr.msra.gmra.mrb[48].mxu0 %v1863_v39  ;;  %4427 = vmatmul.mubr.bf16.vlgmr.msra.gmra.mrb[36].mxu1 %v1863_v39  ;;  %v7116_v47 = vld [vmem:[#allocation28_spill] sm:$0xff] }
 0x1ad   :  { %1947 = vmatpush1.bf16.msra.mxu0 %v5602_v62  ;;  %4431 = vmatpush3.bf16.msra.mxu1 %v5633_v7  ;;  %v1827_v62 = vadd.f32 1.0, %v5007_v51  ;;  %v6114_v51 = vld [vmem:[#allocation6 + $0x4] ss:$12 sps:$4 sm:$0xff]  }
 0x1ae   :  { %1948 = vmatprep.subr.bf16.mxu0 %v5605_v63  ;;  %4432 = vmatprep.subr.bf16.mxu1 %v7100_v34  ;;  %v1830_v63 = vadd.f32 %v6031_v48, %v1540_v36 }
 0x1af   :  { %1978 = vmatprep.mubr.bf16.mxu0 %v7054_v32  ;;  %4446 = vmatprep.mubr.msk.bf16.mxu1 %vm5376_vm0, %v7100_v34  ;;  %5010 = vrcp.f32 %v1827_v62  ;;  %v6118_v62 = vld [vmem:[#allocation6] ss:$12 sps:$4 sm:$0xff]  }
 0x1b1   :  { %1949 = vmatpush1.bf16.msra.mxu0 %v5612_v2  ;;  %4433 = vmatpush3.bf16.msra.mxu1 %v5644_v10  ;;  %v699_v2 = vadd.f32 %v5936_v49, %v5931_v55 }
 0x1b2   :  { %1950 = vmatprep.subr.bf16.mxu0 %v5616_v3  ;;  %4434 = vmatprep.subr.bf16.mxu1 %v7100_v34 }
 0x1b5   :  { %1951 = vmatpush1.bf16.msra.mxu0 %v5627_v5  ;;  %4435 = vmatpush3.bf16.msra.mxu1 %v5656_v13 }
 0x1b6   :  { %v5009_v7 = vpop.eup %5008  ;;  %1952 = vmatprep.subr.bf16.mxu0 %v5630_v6  ;;  %4436 = vmatprep.subr.bf16.mxu1 %v7100_v34 }
 0x1b7   :  { %v1831_v10 = vmul.f32 %v5009_v7, %v1830_v63  ;;  %v6121_v63 = vld [vmem:[#allocation6 + $0x8] ss:$12 sps:$4 sm:$0xff]  }
 0x1b8   :  { %v6124_v7 = vld [vmem:[#allocation6 + $0x1c] ss:$12 sps:$4 sm:$0xff]  }
 0x1b9   :  { %v1832_v3 = vadd.f32 %v1831_v10, %v699_v2  ;;  %1953 = vmatpush1.bf16.msra.mxu0 %v5637_v8  ;;  %4437 = vmatpush3.bf16.msra.mxu1 %v5666_v16  ;;  %v6131_v2 = vld [vmem:[#allocation6 + $0x18] ss:$12 sps:$4 sm:$0xff]   ;;  %v6134_v10 = vld [vmem:[#allocation6 + $0x20] ss:$12 sps:$4 sm:$0xff]  }
 0x1ba   :  { %v1741_v35 = vpop.f32.mrb[44].mxu0  ;;  %1954 = vmatprep.subr.bf16.mxu0 %v5640_v9  ;;  %4438 = vmatprep.subr.bf16.mxu1 %v7100_v34  ;;  %v5011_v9 = vpop.eup %5010 }
 0x1bb   :  { %5012 = vtanh.f32 %v1832_v3  ;;  %v1841_v5 = vadd.f32 %v1741_v35, %v5976_v56  ;;  %v1743_v6 = vpop.f32.mrb[45].mxu0  ;;  %v6137_v3 = vld [vmem:[#allocation6 + $0x34] ss:$12 sps:$4 sm:$0xff]   ;;  %v6141_v35 = vld [vmem:[#allocation6 + $0x30] ss:$12 sps:$4 sm:$0xff]  }
 0x1bc   :  { %v1848_v13 = vadd.f32 %v1743_v6, %v5978_v41  ;;  %v1745_v59 = vpop.f32.mrb[46].mxu0  ;;  %v1834_v41 = vsub.f32 1.0, %v5011_v9  ;;  %v6147_v6 = vld [vmem:[#allocation6 + $0x4c] ss:$12 sps:$4 sm:$0xff]  }
 0x1bd   :  { %v3967_v49 = vmul.f32 -1.442695, %v1841_v5  ;;  %1955 = vmatpush1.bf16.msra.mxu0 %v5650_v11  ;;  %4439 = vmatpush3.bf16.msra.mxu1 %v5676_v19  ;;  %v1746_v8 = vpop.f32.mrb[47].mxu0  ;;  %v1782_v11 = vpop.f32.mrb[32].mxu1  ;;  %v1836_v19 = vmul.f32 0.0, %v5011_v9 }
 0x1be   :  { %1956 = vmatprep.subr.bf16.mxu0 %v5653_v12  ;;  %4440 = vmatprep.subr.bf16.mxu1 %v7100_v34  ;;  %v3968_v16 = vmul.f32 -1.442695, %v1848_v13  ;;  %v4408_v12 = vpop.f32.mrb[33].mxu1  ;;  %v6144_v5 = vld [vmem:[#allocation6 + $0x38] ss:$12 sps:$4 sm:$0xff]  }
 0x1bf   :  { %5014 = vpow2.f32 %v3967_v49  ;;  %v6151_v13 = vld [vmem:[#allocation6 + $0x48] ss:$12 sps:$4 sm:$0xff]   ;;  %v6154_v59 = vld [vmem:[#allocation6 + $0x50] ss:$12 sps:$4 sm:$0xff]   ;;  %v6161_v8 = vld [vmem:[#allocation6 + $0x60] ss:$12 sps:$4 sm:$0xff]  }
 0x1c0   :  { %5016 = vpow2.f32 %v3968_v16  ;;  %v6157_v49 = vld [vmem:[#allocation6 + $0x64] ss:$12 sps:$4 sm:$0xff]   ;;  %7119 = vst [vmem:[#allocation15_spill] sm:$0xff] %v6161_v8  ;;  %v6164_v9 = vld [vmem:[#allocation6 + $0x68] ss:$12 sps:$4 sm:$0xff]  }
 0x1c1   :  { %1957 = vmatpush1.bf16.msra.mxu0 %v5660_v14  ;;  %4441 = vmatpush3.bf16.msra.mxu1 %v5686_v22  ;;  %v1785_v22 = vpop.f32.mrb[34].mxu1  ;;  %v6167_v16 = vld [vmem:[#allocation6 + $0x7c] ss:$12 sps:$4 sm:$0xff]  }
 0x1c2   :  { %1958 = vmatprep.subr.bf16.mxu0 %v5663_v15  ;;  %4442 = vmatprep.subr.bf16.mxu1 %v7100_v34  ;;  %v4409_v56 = vpop.f32.mrb[35].mxu1  ;;  %7121 = vst [vmem:[#allocation16_spill] sm:$0xff] %v6167_v16  ;;  %v6181_v12 = vld [vmem:[#allocation6 + $0x90] ss:$12 sps:$4 sm:$0xff]   ;;  %v6191_v22 = vld [vmem:[#allocation6 + $0xa8] ss:$12 sps:$4 sm:$0xff]  }
 0x1c3   :  { %7125 = vst [vmem:[#allocation19_spill] sm:$0xff] %v6181_v12  ;;  %7128 = vst [vmem:[#allocation22_spill] sm:$0xff] %v6191_v22  ;;  %v7129_v56 = vld [vmem:[#allocation12_spill] sm:$0xff] }
 0x1c5   :  { %v5013_v55 = vpop.eup %5012  ;;  %1959 = vmatpush1.bf16.msra.mxu0 %v5670_v17  ;;  %4443 = vmatpush3.bf16.msra.mxu1 %v5696_v25 }
 0x1c6   :  { %1960 = vmatprep.subr.bf16.mxu0 %v5673_v18  ;;  %4444 = vmatprep.subr.bf16.mxu1 %v7100_v34  ;;  %v1835_v14 = vmul.f32 %v5013_v55, %v1834_v41  ;;  %v6171_v41 = vld [vmem:[#allocation6 + $0x78] ss:$12 sps:$4 sm:$0xff]   ;;  %v6177_v55 = vld [vmem:[#allocation6 + $0x94] ss:$12 sps:$4 sm:$0xff]  }
 0x1c7   :  { %7122 = vst [vmem:[#allocation17_spill] sm:$0xff] %v6171_v41  ;;  %7124 = vst [vmem:[#allocation18_spill] sm:$0xff] %v6177_v55 }
 0x1c8   :  { %v6062_v15 = vadd.f32 %v1836_v19, %v1835_v14  ;;  %v6184_v14 = vld [vmem:[#allocation6 + $0x98] ss:$12 sps:$4 sm:$0xff]  }
 0x1c9   :  { %v5015_v37 = vpop.eup %5014  ;;  %1961 = vmatpush1.bf16.msra.mxu0 %v5680_v20  ;;  %4445 = vmatpush3.bf16.msra.mxu1 %v5708_v28  ;;  %v6080_v20 = vld [vmem:[%s6973_s6 + $0x2] ss:$0 sm:$0xff]  ;;  %v6187_v19 = vld [vmem:[#allocation6 + $0xac] ss:$12 sps:$4 sm:$0xff]  }
 0x1ca   :  { %v1845_v17 = vadd.f32 1.0, %v5015_v37  ;;  %v1945_v25 = vpack.c.bf16 %v6062_v15, %v6062_v15  ;;  %2028 = vmatprep.subr.bf16.mxu0 %v5683_v21  ;;  %4450 = vmatprep.subr.bf16.mxu1 %v7100_v34  ;;  %v5017_v18 = vpop.eup %5016  ;;  %7127 = vst [vmem:[#allocation20_spill] sm:$0xff] %v6187_v19  ;;  %v6195_v37 = vld [vmem:[#allocation6 + $0xc4] ss:$12 sps:$4 sm:$0xff]  }
 0x1cb   :  { %v1852_v21 = vadd.f32 1.0, %v5017_v18  ;;  %7130 = vst [vmem:[#allocation27_spill] sm:$0xff] %v6195_v37  ;;  %v7131_v18 = vld [vmem:[#allocation29_spill] sm:$0xff] }
 0x1cc   :  { %5018 = vrcp.f32 %v1845_v17  ;;  %1979 = vmatmul.mubr.bf16.vlgmr.msra.gmra.mrb[52].mxu0 %v1945_v25  ;;  %4447 = vmatmul.mubr.bf16.vlgmr.msra.gmra.mrb[40].mxu1 %v1945_v25 }
 0x1cd   :  { %2029 = vmatpush1.bf16.msra.mxu0 %v5690_v23  ;;  %4451 = vmatpush3.bf16.msra.mxu1 %v5718_v31  ;;  %v1855_v23 = vadd.f32 %v6080_v20, %v1782_v11  ;;  %v7102_v31 = vld [vmem:[#allocation14_spill] sm:$0xff]  ;;  %5020 = vrcp.f32 %v1852_v21  ;;  %v6174_v11 = vld [vmem:[#allocation6 + $0x80] ss:$12 sps:$4 sm:$0xff]  }
 0x1ce   :  { %2030 = vmatprep.subr.bf16.mxu0 %v5693_v24  ;;  %4452 = vmatprep.subr.bf16.mxu1 %v7100_v34  ;;  %v7101_v24 = vld [vmem:[#allocation13_spill] sm:$0xff]  ;;  %7118 = vst [vmem:[#allocation14_spill] sm:$0xff] %v6157_v49 }
 0x1cf   :  { %2060 = vmatprep.mubr.bf16.mxu0 %v7054_v32  ;;  %4466 = vmatprep.mubr.msk.bf16.mxu1 %vm5376_vm0, %v7100_v34  ;;  %7117 = vst [vmem:[#allocation13_spill] sm:$0xff] %v6154_v59 }
 0x1d1   :  { %2031 = vmatpush1.bf16.msra.mxu0 %v5701_v26  ;;  %4453 = vmatpush3.bf16.msra.mxu1 %v5729_v38 }
 0x1d2   :  { %2032 = vmatprep.subr.bf16.mxu0 %v5705_v27  ;;  %4454 = vmatprep.subr.bf16.mxu1 %v7100_v34  ;;  %v7104_v27 = vld [vmem:[#allocation21_spill] sm:$0xff] }
 0x1d3   :  { %7120 = vst [vmem:[#allocation21_spill] sm:$0xff] %v6164_v9 }
 0x1d5   :  { %2033 = vmatpush1.bf16.msra.mxu0 %v7101_v24  ;;  %4455 = vmatpush3.bf16.msra.mxu1 %v5741_v43  ;;  %v7107_v43 = vld [vmem:[#allocation24_spill] sm:$0xff] }
 0x1d6   :  { %v5019_v28 = vpop.eup %5018  ;;  %2034 = vmatprep.subr.bf16.mxu0 %v7102_v31  ;;  %4456 = vmatprep.subr.bf16.mxu1 %v7100_v34  ;;  %7123 = vst [vmem:[#allocation24_spill] sm:$0xff] %v6174_v11 }
 0x1d7   :  { %v1856_v26 = vmul.f32 %v5019_v28, %v1855_v23  ;;  %v5021_v30 = vpop.eup %5020  ;;  %v7132_v28 = vld [vmem:[#allocation30_spill] sm:$0xff] }
 0x1d8   :  { %v1859_v33 = vsub.f32 1.0, %v5021_v30  ;;  %v1861_v0 = vmul.f32 0.0, %v5021_v30 }
 0x1d9   :  { %v1857_v38 = vadd.f32 %v1856_v26, %v5995_v29  ;;  %2035 = vmatpush1.bf16.msra.mxu0 %v7103_v42  ;;  %4457 = vmatpush3.bf16.msra.mxu1 %v7104_v27  ;;  %v7110_v29 = vld [vmem:[#allocation26_spill] sm:$0xff] }
 0x1da   :  { %2036 = vmatprep.subr.bf16.mxu0 %v7105_v4  ;;  %4458 = vmatprep.subr.bf16.mxu1 %v7100_v34  ;;  %7126 = vst [vmem:[#allocation26_spill] sm:$0xff] %v6184_v14 }
 0x1db   :  { %5022 = vtanh.f32 %v1857_v38 }
 0x1dd   :  { %2037 = vmatpush1.bf16.msra.mxu0 %v7106_v57  ;;  %4459 = vmatpush3.bf16.msra.mxu1 %v7107_v43 }
 0x1de   :  { %2038 = vmatprep.subr.bf16.mxu0 %v7108_v58  ;;  %4460 = vmatprep.subr.bf16.mxu1 %v7100_v34 }
 0x1e1   :  { %2039 = vmatpush1.bf16.msra.mxu0 %v7109_v50  ;;  %4461 = vmatpush3.bf16.msra.mxu1 %v7110_v29 }
 0x1e2   :  { %2040 = vmatprep.subr.bf16.mxu0 %v7111_v53  ;;  %4462 = vmatprep.subr.bf16.mxu1 %v7100_v34 }
 0x1e5   :  { %v5023_v36 = vpop.eup %5022  ;;  %2041 = vmatpush1.bf16.msra.mxu0 %v7112_v54  ;;  %4463 = vmatpush3.bf16.msra.mxu1 %v7113_v44 }
 0x1e6   :  { %2042 = vmatprep.subr.bf16.mxu0 %v7114_v40  ;;  %4464 = vmatprep.subr.bf16.mxu1 %v7100_v34  ;;  %v1860_v60 = vmul.f32 %v5023_v36, %v1859_v33  ;;  %v7133_v36 = vld [vmem:[#allocation37_spill] sm:$0xff] }
 0x1e8   :  { %v6108_v61 = vadd.f32 %v1861_v0, %v1860_v60  ;;  %v7134_v60 = vld [vmem:[#allocation50_spill] sm:$0xff] }
 0x1e9   :  { %2043 = vmatpush1.bf16.msra.mxu0 %v7115_v46  ;;  %4465 = vmatpush3.bf16.msra.mxu1 %v7116_v47 }
 0x1ea   :  { %v2027_v39 = vpack.c.bf16 %v6108_v61, %v6108_v61  ;;  %2185 = vmatprep.subr.bf16.mxu0 %v6114_v51  ;;  %4470 = vmatprep.subr.bf16.mxu1 %v7100_v34 }
 0x1ec   :  { %2061 = vmatmul.mubr.bf16.vlgmr.msra.gmra.mrb[56].mxu0 %v2027_v39  ;;  %4467 = vmatmul.mubr.bf16.vlgmr.msra.gmra.mrb[44].mxu1 %v2027_v39  ;;  %v7135_v39 = vld [vmem:[#allocation51_spill] sm:$0xff] }
 0x1ed   :  { %2186 = vmatpush1.bf16.msra.mxu0 %v6118_v62  ;;  %4471 = vmatpush3.bf16.msra.mxu1 %v6121_v63 }
 0x1ee   :  { %2187 = vmatprep.subr.bf16.mxu0 %v6124_v7  ;;  %4472 = vmatprep.subr.bf16.mxu1 %v7100_v34 }
 0x1ef   :  { %2217 = vmatprep.mubr.bf16.mxu0 %v7054_v32  ;;  %4486 = vmatprep.mubr.msk.bf16.mxu1 %vm5376_vm0, %v7100_v34 }
 0x1f1   :  { %2188 = vmatpush1.bf16.msra.mxu0 %v6131_v2  ;;  %4473 = vmatpush3.bf16.msra.mxu1 %v6134_v10 }
 0x1f2   :  { %2189 = vmatprep.subr.bf16.mxu0 %v6137_v3  ;;  %4474 = vmatprep.subr.bf16.mxu1 %v7100_v34 }
 0x1f5   :  { %2190 = vmatpush1.bf16.msra.mxu0 %v6141_v35  ;;  %4475 = vmatpush3.bf16.msra.mxu1 %v6144_v5 }
 0x1f6   :  { %2191 = vmatprep.subr.bf16.mxu0 %v6147_v6  ;;  %4476 = vmatprep.subr.bf16.mxu1 %v7100_v34 }
 0x1f9   :  { %2192 = vmatpush1.bf16.msra.mxu0 %v6151_v13  ;;  %4477 = vmatpush3.bf16.msra.mxu1 %v6154_v59 }
 0x1fa   :  { %2193 = vmatprep.subr.bf16.mxu0 %v6157_v49  ;;  %4478 = vmatprep.subr.bf16.mxu1 %v7100_v34 }
 0x1fd   :  { %2194 = vmatpush1.bf16.msra.mxu0 %v6161_v8  ;;  %4479 = vmatpush3.bf16.msra.mxu1 %v6164_v9 }
 0x1fe   :  { %2195 = vmatprep.subr.bf16.mxu0 %v6167_v16  ;;  %4480 = vmatprep.subr.bf16.mxu1 %v7100_v34 }
 0x201   :  { %2196 = vmatpush1.bf16.msra.mxu0 %v6171_v41  ;;  %4481 = vmatpush3.bf16.msra.mxu1 %v6174_v11 }
 0x202   :  { %2197 = vmatprep.subr.bf16.mxu0 %v6177_v55  ;;  %4482 = vmatprep.subr.bf16.mxu1 %v7100_v34 }
 0x205   :  { %2198 = vmatpush1.bf16.msra.mxu0 %v6181_v12  ;;  %4483 = vmatpush3.bf16.msra.mxu1 %v6184_v14 }
 0x206   :  { %2199 = vmatprep.subr.bf16.mxu0 %v6187_v19  ;;  %4484 = vmatprep.subr.bf16.mxu1 %v7100_v34 }
 0x209   :  { %2200 = vmatpush1.bf16.msra.mxu0 %v6191_v22  ;;  %4485 = vmatpush3.bf16.msra.mxu1 %v7129_v56 }
 0x20a   :  { %2267 = vmatprep.subr.bf16.mxu0 %v6195_v37  ;;  %4490 = vmatprep.subr.bf16.mxu1 %v7100_v34 }
 0x27f   :  { %v1898_v17 = vpop.f32.mrb[48].mxu0  ;;  %v1939_v25 = vpop.f32.mrb[36].mxu1 }
 0x280   :  { %v2112_v21 = vadd.f32 %v1898_v17, %v7131_v18  ;;  %v1900_v23 = vpop.f32.mrb[49].mxu0  ;;  %v4428_v24 = vpop.f32.mrb[37].mxu1  ;;  %v2126_v29 = vadd.f32 %v6008_v45, %v1939_v25 }
 0x281   :  { %v2119_v31 = vadd.f32 %v1900_v23, %v7132_v28  ;;  %v1902_v26 = vpop.f32.mrb[50].mxu0  ;;  %v1942_v38 = vpop.f32.mrb[38].mxu1 }
 0x282   :  { %v3969_v42 = vmul.f32 -1.442695, %v2112_v21  ;;  %v1903_v27 = vpop.f32.mrb[51].mxu0  ;;  %v4429_v4 = vpop.f32.mrb[39].mxu1 }
 0x283   :  { %v3970_v57 = vmul.f32 -1.442695, %v2119_v31 }
 0x284   :  { %5024 = vpow2.f32 %v3969_v42 }
 0x285   :  { %5026 = vpow2.f32 %v3970_v57 }
 0x28e   :  { %v5025_v43 = vpop.eup %5024 }
 0x28f   :  { %v2116_v58 = vadd.f32 1.0, %v5025_v43  ;;  %v5027_v30 = vpop.eup %5026 }
 0x290   :  { %v2123_v50 = vadd.f32 1.0, %v5027_v30  ;;  %v6213_v30 = vld [vmem:[#allocation6 + $0xc8] ss:$12 sps:$4 sm:$0xff]  }
 0x291   :  { %5028 = vrcp.f32 %v2116_v58  ;;  %v6210_v58 = vld [vmem:[#allocation6 + $0xc0] ss:$12 sps:$4 sm:$0xff]  }
 0x292   :  { %5030 = vrcp.f32 %v2123_v50  ;;  %v6216_v50 = vld [vmem:[#allocation6 + $0xdc] ss:$12 sps:$4 sm:$0xff]  }
 0x29b   :  { %v5029_v53 = vpop.eup %5028 }
 0x29c   :  { %v2127_v33 = vmul.f32 %v5029_v53, %v2126_v29  ;;  %v5031_v25 = vpop.eup %5030  ;;  %v6223_v29 = vld [vmem:[#allocation6 + $0xd8] ss:$12 sps:$4 sm:$0xff]   ;;  %v6226_v53 = vld [vmem:[#allocation6 + $0xe0] ss:$12 sps:$4 sm:$0xff]  }
 0x29d   :  { %v2130_v31 = vsub.f32 1.0, %v5031_v25  ;;  %v2132_v42 = vmul.f32 %v5031_v25, %v6017_v1 }
 0x29e   :  { %v2128_v54 = vadd.f32 %v2127_v33, %v7133_v36  ;;  %v6229_v33 = vld [vmem:[#allocation6 + $0xf4] ss:$12 sps:$4 sm:$0xff]  }
 0x29f   :  { %v1980_v44 = vpop.f32.mrb[52].mxu0  ;;  %v2021_v40 = vpop.f32.mrb[40].mxu1 }
 0x2a0   :  { %5032 = vtanh.f32 %v2128_v54  ;;  %v2137_v0 = vadd.f32 %v1980_v44, %v7134_v60  ;;  %v1982_v46 = vpop.f32.mrb[53].mxu0  ;;  %v4448_v47 = vpop.f32.mrb[41].mxu1  ;;  %v2151_v54 = vadd.f32 %v6031_v48, %v2021_v40  ;;  %v6234_v44 = vld [vmem:[#allocation6 + $0xf0] ss:$12 sps:$4 sm:$0xff]   ;;  %v6237_v60 = vld [vmem:[#allocation6 + $0xf8] ss:$12 sps:$4 sm:$0xff]  }
 0x2a1   :  { %v2144_v56 = vadd.f32 %v1982_v46, %v7135_v39  ;;  %v1984_v17 = vpop.f32.mrb[54].mxu0  ;;  %v2024_v18 = vpop.f32.mrb[42].mxu1  ;;  %v6240_v46 = vld [vmem:[#allocation6 + $0x10c] ss:$12 sps:$4 sm:$0xff]   ;;  %v7136_v39 = vld [vmem:[#allocation56_spill] sm:$0xff] }
 0x2a2   :  { %v3971_v21 = vmul.f32 -1.442695, %v2137_v0  ;;  %v1985_v23 = vpop.f32.mrb[55].mxu0  ;;  %v4449_v24 = vpop.f32.mrb[43].mxu1  ;;  %v6245_v40 = vld [vmem:[#allocation6 + $0x108] ss:$12 sps:$4 sm:$0xff]  }
 0x2a3   :  { %v3972_v28 = vmul.f32 -1.442695, %v2144_v56  ;;  %v6248_v17 = vld [vmem:[#allocation6 + $0x110] ss:$12 sps:$4 sm:$0xff]  }
 0x2a4   :  { %5034 = vpow2.f32 %v3971_v21  ;;  %v6253_v23 = vld [vmem:[#allocation6 + $0x124] ss:$12 sps:$4 sm:$0xff]  }
 0x2a5   :  { %5036 = vpow2.f32 %v3972_v28  ;;  %v7137_v24 = vld [vmem:[#allocation65_spill] sm:$0xff] }
 0x2aa   :  { %v5033_v26 = vpop.eup %5032 }
 0x2ab   :  { %v2131_v38 = vmul.f32 %v5033_v26, %v2130_v31  ;;  %v7138_v26 = vld [vmem:[#allocation66_spill] sm:$0xff] }
 0x2ad   :  { %v6206_v27 = vadd.f32 %v2132_v42, %v2131_v38 }
 0x2ae   :  { %v5035_v4 = vpop.eup %5034 }
 0x2af   :  { %v2141_v57 = vadd.f32 1.0, %v5035_v4  ;;  %v2184_v43 = vpack.c.bf16 %v6206_v27, %v6206_v27  ;;  %v5037_v1 = vpop.eup %5036 }
 0x2b0   :  { %v2148_v36 = vadd.f32 1.0, %v5037_v1 }
 0x2b1   :  { %5038 = vrcp.f32 %v2141_v57  ;;  %2218 = vmatmul.mubr.bf16.vlgmr.msra.gmra.mrb[60].mxu0 %v2184_v43  ;;  %4487 = vmatmul.mubr.bf16.vlgmr.msra.gmra.mrb[48].mxu1 %v2184_v43 }
 0x2b2   :  { %2268 = vmatpush1.bf16.msra.mxu0 %v6210_v58  ;;  %4491 = vmatpush3.bf16.msra.mxu1 %v6213_v30  ;;  %5040 = vrcp.f32 %v2148_v36  ;;  %v6259_v36 = vld [vmem:[#allocation6 + $0x120] ss:$12 sps:$4 sm:$0xff]  }
 0x2b3   :  { %2269 = vmatprep.subr.bf16.mxu0 %v6216_v50  ;;  %4492 = vmatprep.subr.bf16.mxu1 %v7100_v34 }
 0x2b4   :  { %2299 = vmatprep.mubr.bf16.mxu0 %v7054_v32  ;;  %4506 = vmatprep.mubr.msk.bf16.mxu1 %vm5376_vm0, %v7100_v34 }
 0x2b6   :  { %2270 = vmatpush1.bf16.msra.mxu0 %v6223_v29  ;;  %4493 = vmatpush3.bf16.msra.mxu1 %v6226_v53 }
 0x2b7   :  { %2271 = vmatprep.subr.bf16.mxu0 %v6229_v33  ;;  %4494 = vmatprep.subr.bf16.mxu1 %v7100_v34 }
 0x2ba   :  { %2272 = vmatpush1.bf16.msra.mxu0 %v6234_v44  ;;  %4495 = vmatpush3.bf16.msra.mxu1 %v6237_v60 }
 0x2bb   :  { %v5039_v0 = vpop.eup %5038  ;;  %2273 = vmatprep.subr.bf16.mxu0 %v6240_v46  ;;  %4496 = vmatprep.subr.bf16.mxu1 %v7100_v34 }
 0x2bc   :  { %v2152_v47 = vmul.f32 %v5039_v0, %v2151_v54  ;;  %v6262_v54 = vld [vmem:[#allocation6 + $0x128] ss:$12 sps:$4 sm:$0xff]  }
 0x2bd   :  { %v6265_v0 = vld [vmem:[#allocation6 + $0x13c] ss:$12 sps:$4 sm:$0xff]  }
 0x2be   :  { %v2153_v56 = vadd.f32 %v2152_v47, %v7136_v39  ;;  %2274 = vmatpush1.bf16.msra.mxu0 %v6245_v40  ;;  %4497 = vmatpush3.bf16.msra.mxu1 %v6248_v17  ;;  %v5041_v47 = vpop.eup %5040  ;;  %v6269_v39 = vld [vmem:[#allocation6 + $0x138] ss:$12 sps:$4 sm:$0xff]  }
 0x2bf   :  { %v2062_v18 = vpop.f32.mrb[56].mxu0  ;;  %v6251_v21 = vpop.f32.mrb[44].mxu1  ;;  %2275 = vmatprep.subr.bf16.mxu0 %v6253_v23  ;;  %4498 = vmatprep.subr.bf16.mxu1 %v7100_v34 }
 0x2c0   :  { %5042 = vtanh.f32 %v2153_v56  ;;  %v2162_v25 = vadd.f32 %v2062_v18, %v7137_v24  ;;  %v2064_v28 = vpop.f32.mrb[57].mxu0  ;;  %v4468_v31 = vpop.f32.mrb[45].mxu1  ;;  %v6272_v56 = vld [vmem:[#allocation6 + $0x140] ss:$12 sps:$4 sm:$0xff]  }
 0x2c1   :  { %v2169_v38 = vadd.f32 %v2064_v28, %v7138_v26  ;;  %v2066_v42 = vpop.f32.mrb[58].mxu0  ;;  %v2106_v4 = vpop.f32.mrb[46].mxu1  ;;  %v6275_v24 = vld [vmem:[#allocation6 + $0x154] ss:$12 sps:$4 sm:$0xff]   ;;  %v6279_v31 = vld [vmem:[#allocation6 + $0x150] ss:$12 sps:$4 sm:$0xff]  }
 0x2c2   :  { %v3973_v57 = vmul.f32 -1.442695, %v2162_v25  ;;  %v2067_v43 = vpop.f32.mrb[59].mxu0  ;;  %v4469_v1 = vpop.f32.mrb[47].mxu1  ;;  %2276 = vmatpush1.bf16.msra.mxu0 %v6259_v36  ;;  %4499 = vmatpush3.bf16.msra.mxu1 %v6262_v54  ;;  %v2155_v25 = vsub.f32 1.0, %v5041_v47  ;;  %7139 = vst [vmem:[#allocation23_spill] sm:$0xff] %v6279_v31  ;;  %v2157_v4 = vmul.f32 %v5041_v47, %v6062_v15 }
 0x2c3   :  { %2277 = vmatprep.subr.bf16.mxu0 %v6265_v0  ;;  %4500 = vmatprep.subr.bf16.mxu1 %v7100_v34  ;;  %v3974_v18 = vmul.f32 -1.442695, %v2169_v38  ;;  %v6282_v26 = vld [vmem:[#allocation6 + $0x158] ss:$12 sps:$4 sm:$0xff]   ;;  %v6292_v1 = vld [vmem:[#allocation6 + $0x168] ss:$12 sps:$4 sm:$0xff]  }
 0x2c4   :  { %5044 = vpow2.f32 %v3973_v57  ;;  %7140 = vst [vmem:[#allocation25_spill] sm:$0xff] %v6282_v26  ;;  %v6285_v42 = vld [vmem:[#allocation6 + $0x16c] ss:$12 sps:$4 sm:$0xff]   ;;  %v6307_v47 = vld [vmem:[#allocation6 + $0x188] ss:$12 sps:$4 sm:$0xff]  }
 0x2c5   :  { %5046 = vpow2.f32 %v3974_v18  ;;  %7141 = vst [vmem:[#allocation28_spill] sm:$0xff] %v6285_v42  ;;  %v6304_v15 = vld [vmem:[#allocation6 + $0x180] ss:$12 sps:$4 sm:$0xff]   ;;  %7142 = vst [vmem:[#allocation12_spill] sm:$0xff] %v6307_v47 }
 0x2c6   :  { %2278 = vmatpush1.bf16.msra.mxu0 %v6269_v39  ;;  %4501 = vmatpush3.bf16.msra.mxu1 %v6272_v56 }
 0x2c7   :  { %2279 = vmatprep.subr.bf16.mxu0 %v6275_v24  ;;  %4502 = vmatprep.subr.bf16.mxu1 %v7100_v34 }
 0x2ca   :  { %v5043_v28 = vpop.eup %5042  ;;  %2280 = vmatpush1.bf16.msra.mxu0 %v6279_v31  ;;  %4503 = vmatpush3.bf16.msra.mxu1 %v6282_v26  ;;  %v6295_v31 = vld [vmem:[#allocation6 + $0x170] ss:$12 sps:$4 sm:$0xff]  }
 0x2cb   :  { %2281 = vmatprep.subr.bf16.mxu0 %v6285_v42  ;;  %4504 = vmatprep.subr.bf16.mxu1 %v7100_v34  ;;  %v2156_v38 = vmul.f32 %v5043_v28, %v2155_v25  ;;  %v6300_v26 = vld [vmem:[#allocation6 + $0x184] ss:$12 sps:$4 sm:$0xff]   ;;  %v6310_v25 = vld [vmem:[#allocation6 + $0x19c] ss:$12 sps:$4 sm:$0xff]  }
 0x2cc   :  { %7143 = vst [vmem:[#allocation29_spill] sm:$0xff] %v6310_v25 }
 0x2cd   :  { %v6290_v57 = vadd.f32 %v2157_v4, %v2156_v38  ;;  %v6320_v38 = vld [vmem:[#allocation6 + $0x1a0] ss:$12 sps:$4 sm:$0xff]  }
 0x2ce   :  { %v5045_v43 = vpop.eup %5044  ;;  %2282 = vmatpush1.bf16.msra.mxu0 %v6292_v1  ;;  %4505 = vmatpush3.bf16.msra.mxu1 %v6295_v31  ;;  %7145 = vst [vmem:[#allocation37_spill] sm:$0xff] %v6320_v38  ;;  %v6323_v4 = vld [vmem:[#allocation6 + $0x1b4] ss:$12 sps:$4 sm:$0xff]  }
 0x2cf   :  { %v2166_v18 = vadd.f32 1.0, %v5045_v43  ;;  %v2266_v42 = vpack.c.bf16 %v6290_v57, %v6290_v57  ;;  %2349 = vmatprep.subr.bf16.mxu0 %v6300_v26  ;;  %4510 = vmatprep.subr.bf16.mxu1 %v7100_v34  ;;  %v5047_v28 = vpop.eup %5046  ;;  %7146 = vst [vmem:[#allocation50_spill] sm:$0xff] %v6323_v4 }
 0x2d0   :  { %v2173_v43 = vadd.f32 1.0, %v5047_v28 }
 0x2d1   :  { %5048 = vrcp.f32 %v2166_v18  ;;  %2300 = vmatmul.mubr.bf16.vlgmr.msra.gmra.mrb[64].mxu0 %v2266_v42  ;;  %4507 = vmatmul.mubr.bf16.vlgmr.msra.gmra.mrb[52].mxu1 %v2266_v42  ;;  %v6317_v42 = vld [vmem:[#allocation6 + $0x198] ss:$12 sps:$4 sm:$0xff]   ;;  %v2176_v18 = vadd.f32 %v6080_v20, %v6251_v21  ;;  %v6340_v21 = vld [vmem:[#allocation6 + $0x1c8] ss:$12 sps:$4 sm:$0xff]  }
 0x2d2   :  { %2350 = vmatpush1.bf16.msra.mxu0 %v6304_v15  ;;  %4511 = vmatpush3.bf16.msra.mxu1 %v6307_v47  ;;  %7144 = vst [vmem:[#allocation30_spill] sm:$0xff] %v6317_v42  ;;  %v6332_v47 = vld [vmem:[#allocation6 + $0x1b8] ss:$12 sps:$4 sm:$0xff]   ;;  %5050 = vrcp.f32 %v2173_v43  ;;  %7150 = vst [vmem:[#allocation66_spill] sm:$0xff] %v6340_v21 }
 0x2d3   :  { %2351 = vmatprep.subr.bf16.mxu0 %v6310_v25  ;;  %4512 = vmatprep.subr.bf16.mxu1 %v7100_v34  ;;  %v6329_v25 = vld [vmem:[#allocation6 + $0x1b0] ss:$12 sps:$4 sm:$0xff]   ;;  %7148 = vst [vmem:[#allocation56_spill] sm:$0xff] %v6332_v47  ;;  %v6360_v43 = vld [vmem:[#allocation6 + $0x1f8] ss:$12 sps:$4 sm:$0xff]  }
 0x2d4   :  { %2381 = vmatprep.mubr.bf16.mxu0 %v7054_v32  ;;  %4526 = vmatprep.mubr.msk.bf16.mxu1 %vm5376_vm0, %v7100_v34  ;;  %7147 = vst [vmem:[#allocation51_spill] sm:$0xff] %v6329_v25  ;;  %7156 = vst [vmem:[#allocation78_spill] sm:$0xff] %v6360_v43 }
 0x2d6   :  { %2352 = vmatpush1.bf16.msra.mxu0 %v6317_v42  ;;  %4513 = vmatpush3.bf16.msra.mxu1 %v6320_v38  ;;  %v6335_v38 = vld [vmem:[#allocation6 + $0x1cc] ss:$12 sps:$4 sm:$0xff]  }
 0x2d7   :  { %2353 = vmatprep.subr.bf16.mxu0 %v6323_v4  ;;  %4514 = vmatprep.subr.bf16.mxu1 %v7100_v34  ;;  %7149 = vst [vmem:[#allocation65_spill] sm:$0xff] %v6335_v38 }
 0x2da   :  { %2354 = vmatpush1.bf16.msra.mxu0 %v6329_v25  ;;  %4515 = vmatpush3.bf16.msra.mxu1 %v6332_v47  ;;  %v6343_v25 = vld [vmem:[#allocation6 + $0x1d0] ss:$12 sps:$4 sm:$0xff]  }
 0x2db   :  { %v5049_v42 = vpop.eup %5048  ;;  %2355 = vmatprep.subr.bf16.mxu0 %v6335_v38  ;;  %4516 = vmatprep.subr.bf16.mxu1 %v7100_v34  ;;  %7151 = vst [vmem:[#allocation73_spill] sm:$0xff] %v6343_v25  ;;  %v6346_v47 = vld [vmem:[#allocation6 + $0x1e4] ss:$12 sps:$4 sm:$0xff]   ;;  %v6350_v38 = vld [vmem:[#allocation6 + $0x1e0] ss:$12 sps:$4 sm:$0xff]  }
 0x2dc   :  { %v2177_v4 = vmul.f32 %v5049_v42, %v2176_v18  ;;  %7152 = vst [vmem:[#allocation74_spill] sm:$0xff] %v6346_v47  ;;  %7153 = vst [vmem:[#allocation75_spill] sm:$0xff] %v6350_v38  ;;  %v6356_v42 = vld [vmem:[#allocation6 + $0x1fc] ss:$12 sps:$4 sm:$0xff]   ;;  %v6363_v18 = vld [vmem:[#allocation6 + $0x200] ss:$12 sps:$4 sm:$0xff]  }
 0x2dd   :  { %7155 = vst [vmem:[#allocation77_spill] sm:$0xff] %v6356_v42  ;;  %7157 = vst [vmem:[#allocation79_spill] sm:$0xff] %v6363_v18 }
 0x2de   :  { %v2178_v28 = vadd.f32 %v2177_v4, %v5999_v52  ;;  %2356 = vmatpush1.bf16.msra.mxu0 %v6340_v21  ;;  %4517 = vmatpush3.bf16.msra.mxu1 %v6343_v25  ;;  %v6353_v52 = vld [vmem:[#allocation6 + $0x1e8] ss:$12 sps:$4 sm:$0xff]   ;;  %v5051_v4 = vpop.eup %5050 }
 0x2df   :  { %2357 = vmatprep.subr.bf16.mxu0 %v6346_v47  ;;  %4518 = vmatprep.subr.bf16.mxu1 %v7100_v34  ;;  %7154 = vst [vmem:[#allocation76_spill] sm:$0xff] %v6353_v52  ;;  %v6373_v47 = vld [vmem:[#allocation6 + $0x218] ss:$12 sps:$4 sm:$0xff]   ;;  %v6383_v21 = vld [vmem:[#allocation6 + $0x228] ss:$12 sps:$4 sm:$0xff]  }
 0x2e0   :  { %5052 = vtanh.f32 %v2178_v28  ;;  %v6366_v28 = vld [vmem:[#allocation6 + $0x214] ss:$12 sps:$4 sm:$0xff]   ;;  %7160 = vst [vmem:[#allocation82_spill] sm:$0xff] %v6373_v47 }
 0x2e1   :  { %7158 = vst [vmem:[#allocation80_spill] sm:$0xff] %v6366_v28 }
 0x2e2   :  { %2358 = vmatpush1.bf16.msra.mxu0 %v6350_v38  ;;  %4519 = vmatpush3.bf16.msra.mxu1 %v6353_v52  ;;  %v2180_v52 = vsub.f32 1.0, %v5051_v4 }
 0x2e3   :  { %2359 = vmatprep.subr.bf16.mxu0 %v6356_v42  ;;  %4520 = vmatprep.subr.bf16.mxu1 %v7100_v34  ;;  %v6370_v42 = vld [vmem:[#allocation6 + $0x210] ss:$12 sps:$4 sm:$0xff]  }
 0x2e4   :  { %7159 = vst [vmem:[#allocation81_spill] sm:$0xff] %v6370_v42 }
 0x2e6   :  { %2360 = vmatpush1.bf16.msra.mxu0 %v6360_v43  ;;  %4521 = vmatpush3.bf16.msra.mxu1 %v6363_v18  ;;  %v6376_v43 = vld [vmem:[#allocation6 + $0x22c] ss:$12 sps:$4 sm:$0xff]  }
 0x2e7   :  { %2361 = vmatprep.subr.bf16.mxu0 %v6366_v28  ;;  %4522 = vmatprep.subr.bf16.mxu1 %v7100_v34  ;;  %v2182_v28 = vmul.f32 %v5051_v4, %v6108_v61  ;;  %v6425_v61 = vld [vmem:[#allocation6 + $0xb0] ss:$12 sps:$4 sm:$0xff]  }
 0x2e8   :  { %7161 = vst [vmem:[#allocation83_spill] sm:$0xff] %v6425_v61 }
 0x2ea   :  { %v5053_v38 = vpop.eup %5052  ;;  %2362 = vmatpush1.bf16.msra.mxu0 %v6370_v42  ;;  %4523 = vmatpush3.bf16.msra.mxu1 %v6373_v47  ;;  %v6386_v42 = vld [vmem:[#allocation6 + $0x230] ss:$12 sps:$4 sm:$0xff]  }
 0x2eb   :  { %2363 = vmatprep.subr.bf16.mxu0 %v6376_v43  ;;  %4524 = vmatprep.subr.bf16.mxu1 %v7100_v34  ;;  %v2181_v18 = vmul.f32 %v5053_v38, %v2180_v52  ;;  %v7162_v52 = vld [vmem:[#allocation31_spill] sm:$0xff] }
 0x2ed   :  { %v6381_v25 = vadd.f32 %v2182_v28, %v2181_v18 }
 0x2ee   :  { %2364 = vmatpush1.bf16.msra.mxu0 %v6383_v21  ;;  %4525 = vmatpush3.bf16.msra.mxu1 %v6386_v42 }
 0x2ef   :  { %v2348_v47 = vpack.c.bf16 %v6381_v25, %v6381_v25  ;;  %2506 = vmatprep.subr.bf16.mxu0 %v6114_v51  ;;  %4530 = vmatprep.subr.bf16.mxu1 %v7100_v34 }
 0x2f1   :  { %2382 = vmatmul.mubr.bf16.vlgmr.msra.gmra.mrb[68].mxu0 %v2348_v47  ;;  %4527 = vmatmul.mubr.bf16.vlgmr.msra.gmra.mrb[56].mxu1 %v2348_v47 }
 0x2f2   :  { %2507 = vmatpush1.bf16.msra.mxu0 %v6118_v62  ;;  %4531 = vmatpush3.bf16.msra.mxu1 %v6121_v63 }
 0x2f3   :  { %2508 = vmatprep.subr.bf16.mxu0 %v6124_v7  ;;  %4532 = vmatprep.subr.bf16.mxu1 %v7100_v34 }
 0x2f4   :  { %2538 = vmatprep.mubr.bf16.mxu0 %v7054_v32  ;;  %4546 = vmatprep.mubr.msk.bf16.mxu1 %vm5376_vm0, %v7100_v34 }
 0x2f6   :  { %2509 = vmatpush1.bf16.msra.mxu0 %v6131_v2  ;;  %4533 = vmatpush3.bf16.msra.mxu1 %v6134_v10 }
 0x2f7   :  { %2510 = vmatprep.subr.bf16.mxu0 %v6137_v3  ;;  %4534 = vmatprep.subr.bf16.mxu1 %v7100_v34 }
 0x2fa   :  { %2511 = vmatpush1.bf16.msra.mxu0 %v6141_v35  ;;  %4535 = vmatpush3.bf16.msra.mxu1 %v6144_v5 }
 0x2fb   :  { %2512 = vmatprep.subr.bf16.mxu0 %v6147_v6  ;;  %4536 = vmatprep.subr.bf16.mxu1 %v7100_v34 }
 0x2fe   :  { %2513 = vmatpush1.bf16.msra.mxu0 %v6151_v13  ;;  %4537 = vmatpush3.bf16.msra.mxu1 %v6154_v59 }
 0x2ff   :  { %2514 = vmatprep.subr.bf16.mxu0 %v6157_v49  ;;  %4538 = vmatprep.subr.bf16.mxu1 %v7100_v34 }
 0x302   :  { %2515 = vmatpush1.bf16.msra.mxu0 %v6161_v8  ;;  %4539 = vmatpush3.bf16.msra.mxu1 %v6164_v9 }
 0x303   :  { %2516 = vmatprep.subr.bf16.mxu0 %v6167_v16  ;;  %4540 = vmatprep.subr.bf16.mxu1 %v7100_v34 }
 0x306   :  { %2517 = vmatpush1.bf16.msra.mxu0 %v6171_v41  ;;  %4541 = vmatpush3.bf16.msra.mxu1 %v6174_v11 }
 0x307   :  { %2518 = vmatprep.subr.bf16.mxu0 %v6177_v55  ;;  %4542 = vmatprep.subr.bf16.mxu1 %v7100_v34 }
 0x30a   :  { %2519 = vmatpush1.bf16.msra.mxu0 %v6181_v12  ;;  %4543 = vmatpush3.bf16.msra.mxu1 %v6184_v14  ;;  %v7163_v14 = vld [vmem:[#allocation32_spill] sm:$0xff] }
 0x30b   :  { %2520 = vmatprep.subr.bf16.mxu0 %v6187_v19  ;;  %4544 = vmatprep.subr.bf16.mxu1 %v7100_v34 }
 0x30e   :  { %2521 = vmatpush1.bf16.msra.mxu0 %v6191_v22  ;;  %4545 = vmatpush3.bf16.msra.mxu1 %v6425_v61 }
 0x30f   :  { %2588 = vmatprep.subr.bf16.mxu0 %v6195_v37  ;;  %4550 = vmatprep.subr.bf16.mxu1 %v7100_v34 }
 0x384   :  { %v2219_v47 = vpop.f32.mrb[60].mxu0  ;;  %v2260_v38 = vpop.f32.mrb[48].mxu1 }
 0x385   :  { %v2433_v4 = vadd.f32 %v2219_v47, %v7162_v52  ;;  %v2221_v18 = vpop.f32.mrb[61].mxu0  ;;  %v4488_v28 = vpop.f32.mrb[49].mxu1  ;;  %v2447_v49 = vadd.f32 %v6008_v45, %v2260_v38 }
 0x386   :  { %v2440_v19 = vadd.f32 %v2221_v18, %v7163_v14  ;;  %v2223_v12 = vpop.f32.mrb[62].mxu0  ;;  %v2263_v55 = vpop.f32.mrb[50].mxu1  ;;  %v7164_v28 = vld [vmem:[#allocation34_spill] sm:$0xff] }
 0x387   :  { %v3975_v11 = vmul.f32 -1.442695, %v2433_v4  ;;  %v2224_v22 = vpop.f32.mrb[63].mxu0  ;;  %v4489_v41 = vpop.f32.mrb[51].mxu1 }
 0x388   :  { %v3976_v16 = vmul.f32 -1.442695, %v2440_v19  ;;  %v7165_v22 = vld [vmem:[#allocation52_spill] sm:$0xff] }
 0x389   :  { %5054 = vpow2.f32 %v3975_v11 }
 0x38a   :  { %5056 = vpow2.f32 %v3976_v16  ;;  %v7166_v16 = vld [vmem:[#allocation53_spill] sm:$0xff] }
 0x393   :  { %v5055_v61 = vpop.eup %5054 }
 0x394   :  { %v2437_v37 = vadd.f32 1.0, %v5055_v61  ;;  %v5057_v9 = vpop.eup %5056 }
 0x395   :  { %v2444_v8 = vadd.f32 1.0, %v5057_v9 }
 0x396   :  { %5058 = vrcp.f32 %v2437_v37 }
 0x397   :  { %5060 = vrcp.f32 %v2444_v8 }
 0x3a0   :  { %v5059_v47 = vpop.eup %5058 }
 0x3a1   :  { %v2448_v52 = vmul.f32 %v5059_v47, %v2447_v49  ;;  %v5061_v45 = vpop.eup %5060 }
 0x3a2   :  { %v2451_v8 = vsub.f32 1.0, %v5061_v45 }
 0x3a3   :  { %v2449_v14 = vadd.f32 %v2448_v52, %v7164_v28  ;;  %v2453_v52 = vmul.f32 %v5061_v45, %v6206_v27  ;;  %v7169_v45 = vld [vmem:[#allocation68_spill] sm:$0xff] }
 0x3a4   :  { %v2301_v12 = vpop.f32.mrb[64].mxu0  ;;  %v2342_v55 = vpop.f32.mrb[52].mxu1 }
 0x3a5   :  { %5062 = vtanh.f32 %v2449_v14  ;;  %v2458_v41 = vadd.f32 %v2301_v12, %v7165_v22  ;;  %v2303_v11 = vpop.f32.mrb[65].mxu0  ;;  %v4508_v19 = vpop.f32.mrb[53].mxu1 }
 0x3a6   :  { %v2465_v4 = vadd.f32 %v2303_v11, %v7166_v16  ;;  %v2305_v61 = vpop.f32.mrb[66].mxu0  ;;  %v2345_v37 = vpop.f32.mrb[54].mxu1  ;;  %v7167_v16 = vld [vmem:[#allocation60_spill] sm:$0xff] }
 0x3a7   :  { %v3977_v18 = vmul.f32 -1.442695, %v2458_v41  ;;  %v2306_v9 = vpop.f32.mrb[67].mxu0  ;;  %v4509_v59 = vpop.f32.mrb[55].mxu1  ;;  %v2472_v41 = vadd.f32 %v6031_v48, %v2342_v55  ;;  %v7168_v48 = vld [vmem:[#allocation67_spill] sm:$0xff] }
 0x3a8   :  { %v3978_v49 = vmul.f32 -1.442695, %v2465_v4 }
 0x3a9   :  { %5064 = vpow2.f32 %v3977_v18 }
 0x3aa   :  { %5066 = vpow2.f32 %v3978_v49 }
 0x3af   :  { %v5063_v38 = vpop.eup %5062 }
 0x3b0   :  { %v2452_v47 = vmul.f32 %v5063_v38, %v2451_v8 }
 0x3b2   :  { %v6437_v28 = vadd.f32 %v2453_v52, %v2452_v47 }
 0x3b3   :  { %v5065_v14 = vpop.eup %5064 }
 0x3b4   :  { %v2462_v12 = vadd.f32 1.0, %v5065_v14  ;;  %v2505_v22 = vpack.c.bf16 %v6437_v28, %v6437_v28  ;;  %v5067_v59 = vpop.eup %5066 }
 0x3b5   :  { %v2469_v27 = vadd.f32 1.0, %v5067_v59 }
 0x3b6   :  { %5068 = vrcp.f32 %v2462_v12  ;;  %2539 = vmatmul.mubr.bf16.vlgmr.msra.gmra.mrb[72].mxu0 %v2505_v22  ;;  %4547 = vmatmul.mubr.bf16.vlgmr.msra.gmra.mrb[60].mxu1 %v2505_v22 }
 0x3b7   :  { %2589 = vmatpush1.bf16.msra.mxu0 %v6210_v58  ;;  %4551 = vmatpush3.bf16.msra.mxu1 %v6213_v30  ;;  %5070 = vrcp.f32 %v2469_v27 }
 0x3b8   :  { %2590 = vmatprep.subr.bf16.mxu0 %v6216_v50  ;;  %4552 = vmatprep.subr.bf16.mxu1 %v7100_v34 }
 0x3b9   :  { %2620 = vmatprep.mubr.bf16.mxu0 %v7054_v32  ;;  %4566 = vmatprep.mubr.msk.bf16.mxu1 %vm5376_vm0, %v7100_v34 }
 0x3bb   :  { %2591 = vmatpush1.bf16.msra.mxu0 %v6223_v29  ;;  %4553 = vmatpush3.bf16.msra.mxu1 %v6226_v53 }
 0x3bc   :  { %2592 = vmatprep.subr.bf16.mxu0 %v6229_v33  ;;  %4554 = vmatprep.subr.bf16.mxu1 %v7100_v34 }
 0x3bf   :  { %2593 = vmatpush1.bf16.msra.mxu0 %v6234_v44  ;;  %4555 = vmatpush3.bf16.msra.mxu1 %v6237_v60 }
 0x3c0   :  { %v5069_v11 = vpop.eup %5068  ;;  %2594 = vmatprep.subr.bf16.mxu0 %v6240_v46  ;;  %4556 = vmatprep.subr.bf16.mxu1 %v7100_v34 }
 0x3c1   :  { %v2473_v19 = vmul.f32 %v5069_v11, %v2472_v41  ;;  %v5071_v12 = vpop.eup %5070  ;;  %v7170_v41 = vld [vmem:[#allocation23_spill] sm:$0xff]  ;;  %v7171_v11 = vld [vmem:[#allocation25_spill] sm:$0xff] }
 0x3c2   :  { %v2476_v59 = vsub.f32 1.0, %v5071_v12 }
 0x3c3   :  { %v2474_v4 = vadd.f32 %v2473_v19, %v7167_v16  ;;  %2595 = vmatpush1.bf16.msra.mxu0 %v6245_v40  ;;  %4557 = vmatpush3.bf16.msra.mxu1 %v6248_v17  ;;  %v7172_v19 = vld [vmem:[#allocation28_spill] sm:$0xff] }
 0x3c4   :  { %v2383_v61 = vpop.f32.mrb[68].mxu0  ;;  %v2424_v37 = vpop.f32.mrb[56].mxu1  ;;  %2596 = vmatprep.subr.bf16.mxu0 %v6253_v23  ;;  %4558 = vmatprep.subr.bf16.mxu1 %v7100_v34 }
 0x3c5   :  { %5072 = vtanh.f32 %v2474_v4  ;;  %v2483_v55 = vadd.f32 %v2383_v61, %v7168_v48  ;;  %v2385_v18 = vpop.f32.mrb[69].mxu0  ;;  %v4528_v9 = vpop.f32.mrb[57].mxu1  ;;  %v2478_v4 = vmul.f32 %v5071_v12, %v6290_v57  ;;  %v7173_v57 = vld [vmem:[#allocation12_spill] sm:$0xff]  ;;  %v7180_v12 = vld [vmem:[#allocation65_spill] sm:$0xff] }
 0x3c6   :  { %v2490_v49 = vadd.f32 %v2385_v18, %v7169_v45  ;;  %v2387_v8 = vpop.f32.mrb[70].mxu0  ;;  %v2427_v38 = vpop.f32.mrb[58].mxu1  ;;  %v7174_v9 = vld [vmem:[#allocation29_spill] sm:$0xff] }
 0x3c7   :  { %v3979_v47 = vmul.f32 -1.442695, %v2483_v55  ;;  %v2388_v52 = vpop.f32.mrb[71].mxu0  ;;  %v4529_v14 = vpop.f32.mrb[59].mxu1  ;;  %2597 = vmatpush1.bf16.msra.mxu0 %v6259_v36  ;;  %4559 = vmatpush3.bf16.msra.mxu1 %v6262_v54  ;;  %v7177_v8 = vld [vmem:[#allocation50_spill] sm:$0xff]  ;;  %v2497_v38 = vadd.f32 %v6080_v20, %v2424_v37  ;;  %v7185_v20 = vld [vmem:[#allocation75_spill] sm:$0xff] }
 0x3c8   :  { %2598 = vmatprep.subr.bf16.mxu0 %v6265_v0  ;;  %4560 = vmatprep.subr.bf16.mxu1 %v7100_v34  ;;  %v3980_v22 = vmul.f32 -1.442695, %v2490_v49  ;;  %v7176_v49 = vld [vmem:[#allocation37_spill] sm:$0xff]  ;;  %v7179_v52 = vld [vmem:[#allocation56_spill] sm:$0xff] }
 0x3c9   :  { %5074 = vpow2.f32 %v3979_v47  ;;  %v7178_v47 = vld [vmem:[#allocation51_spill] sm:$0xff]  ;;  %v7186_v37 = vld [vmem:[#allocation76_spill] sm:$0xff] }
 0x3ca   :  { %5076 = vpow2.f32 %v3980_v22 }
 0x3cb   :  { %2599 = vmatpush1.bf16.msra.mxu0 %v6269_v39  ;;  %4561 = vmatpush3.bf16.msra.mxu1 %v6272_v56 }
 0x3cc   :  { %2600 = vmatprep.subr.bf16.mxu0 %v6275_v24  ;;  %4562 = vmatprep.subr.bf16.mxu1 %v7100_v34 }
 0x3cf   :  { %v5073_v27 = vpop.eup %5072  ;;  %2601 = vmatpush1.bf16.msra.mxu0 %v7170_v41  ;;  %4563 = vmatpush3.bf16.msra.mxu1 %v7171_v11 }
 0x3d0   :  { %2602 = vmatprep.subr.bf16.mxu0 %v7172_v19  ;;  %4564 = vmatprep.subr.bf16.mxu1 %v7100_v34  ;;  %v2477_v16 = vmul.f32 %v5073_v27, %v2476_v59  ;;  %v7181_v59 = vld [vmem:[#allocation70_spill] sm:$0xff] }
 0x3d2   :  { %v6477_v61 = vadd.f32 %v2478_v4, %v2477_v16  ;;  %v7182_v16 = vld [vmem:[#allocation66_spill] sm:$0xff]  ;;  %v7183_v4 = vld [vmem:[#allocation73_spill] sm:$0xff] }
 0x3d3   :  { %v5075_v48 = vpop.eup %5074  ;;  %2603 = vmatpush1.bf16.msra.mxu0 %v6292_v1  ;;  %4565 = vmatpush3.bf16.msra.mxu1 %v6295_v31 }
 0x3d4   :  { %v2487_v55 = vadd.f32 1.0, %v5075_v48  ;;  %v2587_v18 = vpack.c.bf16 %v6477_v61, %v6477_v61  ;;  %2670 = vmatprep.subr.bf16.mxu0 %v6300_v26  ;;  %4570 = vmatprep.subr.bf16.mxu1 %v7100_v34  ;;  %v5077_v45 = vpop.eup %5076  ;;  %v7175_v26 = vld [vmem:[#allocation30_spill] sm:$0xff] }
 0x3d5   :  { %v7184_v48 = vld [vmem:[#allocation74_spill] sm:$0xff] }
 0x3d6   :  { %5078 = vrcp.f32 %v2487_v55  ;;  %2621 = vmatmul.mubr.bf16.vlgmr.msra.gmra.mrb[76].mxu0 %v2587_v18  ;;  %4567 = vmatmul.mubr.bf16.vlgmr.msra.gmra.mrb[64].mxu1 %v2587_v18  ;;  %v7187_v55 = vld [vmem:[#allocation77_spill] sm:$0xff] }
 0x3d7   :  { %2671 = vmatpush1.bf16.msra.mxu0 %v6304_v15  ;;  %4571 = vmatpush3.bf16.msra.mxu1 %v7173_v57  ;;  %v2494_v15 = vadd.f32 1.0, %v5077_v45  ;;  %v7188_v57 = vld [vmem:[#allocation78_spill] sm:$0xff]  ;;  %v7190_v45 = vld [vmem:[#allocation80_spill] sm:$0xff] }
 0x3d8   :  { %2672 = vmatprep.subr.bf16.mxu0 %v7174_v9  ;;  %4572 = vmatprep.subr.bf16.mxu1 %v7100_v34  ;;  %v7189_v9 = vld [vmem:[#allocation79_spill] sm:$0xff] }
 0x3d9   :  { %2702 = vmatprep.mubr.bf16.mxu0 %v7054_v32  ;;  %4586 = vmatprep.mubr.msk.bf16.mxu1 %vm5376_vm0, %v7100_v34  ;;  %5080 = vrcp.f32 %v2494_v15  ;;  %v7192_v15 = vld [vmem:[#allocation82_spill] sm:$0xff] }
 0x3db   :  { %2673 = vmatpush1.bf16.msra.mxu0 %v7175_v26  ;;  %4573 = vmatpush3.bf16.msra.mxu1 %v7176_v49 }
 0x3dc   :  { %2674 = vmatprep.subr.bf16.mxu0 %v7177_v8  ;;  %4574 = vmatprep.subr.bf16.mxu1 %v7100_v34  ;;  %v7191_v8 = vld [vmem:[#allocation81_spill] sm:$0xff] }
 0x3df   :  { %2675 = vmatpush1.bf16.msra.mxu0 %v7178_v47  ;;  %4575 = vmatpush3.bf16.msra.mxu1 %v7179_v52 }
 0x3e0   :  { %v5079_v14 = vpop.eup %5078  ;;  %2676 = vmatprep.subr.bf16.mxu0 %v7180_v12  ;;  %4576 = vmatprep.subr.bf16.mxu1 %v7100_v34 }
 0x3e1   :  { %v2498_v22 = vmul.f32 %v5079_v14, %v2497_v38 }
 0x3e3   :  { %v2499_v27 = vadd.f32 %v2498_v22, %v7181_v59  ;;  %2677 = vmatpush1.bf16.msra.mxu0 %v7182_v16  ;;  %4577 = vmatpush3.bf16.msra.mxu1 %v7183_v4  ;;  %v5081_v18 = vpop.eup %5080  ;;  %v7207_v22 = vld [vmem:[#allocation33_spill] sm:$0xff]  ;;  %v7208_v4 = vld [vmem:[#allocation35_spill] sm:$0xff] }
 0x3e4   :  { %2678 = vmatprep.subr.bf16.mxu0 %v7184_v48  ;;  %4578 = vmatprep.subr.bf16.mxu1 %v7100_v34  ;;  %v2501_v26 = vsub.f32 1.0, %v5081_v18  ;;  %v2503_v47 = vmul.f32 %v5081_v18, %v6381_v25  ;;  %v7204_v25 = vld [vmem:[#allocation22_spill] sm:$0xff] }
 0x3e5   :  { %5082 = vtanh.f32 %v2499_v27 }
 0x3e7   :  { %2679 = vmatpush1.bf16.msra.mxu0 %v7185_v20  ;;  %4579 = vmatpush3.bf16.msra.mxu1 %v7186_v37 }
 0x3e8   :  { %2680 = vmatprep.subr.bf16.mxu0 %v7187_v55  ;;  %4580 = vmatprep.subr.bf16.mxu1 %v7100_v34 }
 0x3eb   :  { %2681 = vmatpush1.bf16.msra.mxu0 %v7188_v57  ;;  %4581 = vmatpush3.bf16.msra.mxu1 %v7189_v9 }
 0x3ec   :  { %2682 = vmatprep.subr.bf16.mxu0 %v7190_v45  ;;  %4582 = vmatprep.subr.bf16.mxu1 %v7100_v34 }
 0x3ef   :  { %v5083_v49 = vpop.eup %5082  ;;  %2683 = vmatpush1.bf16.msra.mxu0 %v7191_v8  ;;  %4583 = vmatpush3.bf16.msra.mxu1 %v7192_v15  ;;  %v6567_v15 = vld [vmem:[%s6973_s6] ss:$0 sm:$0xff] }
 0x3f0   :  { %2684 = vmatprep.subr.bf16.mxu0 %v6376_v43  ;;  %4584 = vmatprep.subr.bf16.mxu1 %v7100_v34  ;;  %v2502_v38 = vmul.f32 %v5083_v49, %v2501_v26 }
 0x3f2   :  { %v6519_v52 = vadd.f32 %v2503_v47, %v2502_v38 }
 0x3f3   :  { %2685 = vmatpush1.bf16.msra.mxu0 %v6383_v21  ;;  %4585 = vmatpush3.bf16.msra.mxu1 %v6386_v42  ;;  %v7205_v21 = vld [vmem:[#allocation83_spill] sm:$0xff] }
 0x3f4   :  { %v2669_v14 = vpack.c.bf16 %v6519_v52, %v6519_v52  ;;  %2827 = vmatprep.subr.bf16.mxu0 %v6114_v51  ;;  %4590 = vmatprep.subr.bf16.mxu1 %v7100_v34  ;;  %v7193_v51 = vld [vmem:[#allocation13_spill] sm:$0xff]  ;;  %v7206_v42 = vld [vmem:[#allocation27_spill] sm:$0xff] }
 0x3f6   :  { %2703 = vmatmul.mubr.bf16.vlgmr.msra.gmra.mrb[80].mxu0 %v2669_v14  ;;  %4587 = vmatmul.mubr.bf16.vlgmr.msra.gmra.mrb[68].mxu1 %v2669_v14 }
 0x3f7   :  { %2828 = vmatpush1.bf16.msra.mxu0 %v6118_v62  ;;  %4591 = vmatpush3.bf16.msra.mxu1 %v6121_v63  ;;  %v7194_v62 = vld [vmem:[#allocation14_spill] sm:$0xff]  ;;  %v7195_v63 = vld [vmem:[#allocation15_spill] sm:$0xff] }
 0x3f8   :  { %2829 = vmatprep.subr.bf16.mxu0 %v6124_v7  ;;  %4592 = vmatprep.subr.bf16.mxu1 %v7100_v34  ;;  %v7196_v7 = vld [vmem:[#allocation21_spill] sm:$0xff] }
 0x3f9   :  { %2859 = vmatprep.mubr.bf16.mxu0 %v7054_v32  ;;  %4606 = vmatprep.mubr.msk.bf16.mxu1 %vm5376_vm0, %v7100_v34 }
 0x3fb   :  { %2830 = vmatpush1.bf16.msra.mxu0 %v6131_v2  ;;  %4593 = vmatpush3.bf16.msra.mxu1 %v6134_v10  ;;  %v7197_v2 = vld [vmem:[#allocation16_spill] sm:$0xff]  ;;  %v7198_v10 = vld [vmem:[#allocation17_spill] sm:$0xff] }
 0x3fc   :  { %2831 = vmatprep.subr.bf16.mxu0 %v6137_v3  ;;  %4594 = vmatprep.subr.bf16.mxu1 %v7100_v34  ;;  %v7199_v3 = vld [vmem:[#allocation24_spill] sm:$0xff] }
 0x3ff   :  { %2832 = vmatpush1.bf16.msra.mxu0 %v6141_v35  ;;  %4595 = vmatpush3.bf16.msra.mxu1 %v6144_v5  ;;  %v7200_v35 = vld [vmem:[#allocation18_spill] sm:$0xff]  ;;  %v7201_v5 = vld [vmem:[#allocation19_spill] sm:$0xff] }
 0x400   :  { %2833 = vmatprep.subr.bf16.mxu0 %v6147_v6  ;;  %4596 = vmatprep.subr.bf16.mxu1 %v7100_v34  ;;  %v7202_v6 = vld [vmem:[#allocation26_spill] sm:$0xff] }
 0x403   :  { %2834 = vmatpush1.bf16.msra.mxu0 %v6151_v13  ;;  %4597 = vmatpush3.bf16.msra.mxu1 %v7193_v51  ;;  %v7203_v13 = vld [vmem:[#allocation20_spill] sm:$0xff] }
 0x404   :  { %2835 = vmatprep.subr.bf16.mxu0 %v7194_v62  ;;  %4598 = vmatprep.subr.bf16.mxu1 %v7100_v34  ;;  %v7209_v51 = vld [vmem:[#allocation36_spill] sm:$0xff] }
 0x407   :  { %2836 = vmatpush1.bf16.msra.mxu0 %v7195_v63  ;;  %4599 = vmatpush3.bf16.msra.mxu1 %v7196_v7 }
 0x408   :  { %2837 = vmatprep.subr.bf16.mxu0 %v7197_v2  ;;  %4600 = vmatprep.subr.bf16.mxu1 %v7100_v34  ;;  %v7210_v2 = vld [vmem:[#allocation54_spill] sm:$0xff] }
 0x40b   :  { %2838 = vmatpush1.bf16.msra.mxu0 %v7198_v10  ;;  %4601 = vmatpush3.bf16.msra.mxu1 %v7199_v3 }
 0x40c   :  { %2839 = vmatprep.subr.bf16.mxu0 %v7200_v35  ;;  %4602 = vmatprep.subr.bf16.mxu1 %v7100_v34 }
 0x40f   :  { %2840 = vmatpush1.bf16.msra.mxu0 %v7201_v5  ;;  %4603 = vmatpush3.bf16.msra.mxu1 %v7202_v6  ;;  %v7211_v5 = vld [vmem:[#allocation55_spill] sm:$0xff] }
 0x410   :  { %2841 = vmatprep.subr.bf16.mxu0 %v7203_v13  ;;  %4604 = vmatprep.subr.bf16.mxu1 %v7100_v34 }
 0x413   :  { %2842 = vmatpush1.bf16.msra.mxu0 %v7204_v25  ;;  %4605 = vmatpush3.bf16.msra.mxu1 %v7205_v21 }
 0x414   :  { %2909 = vmatprep.subr.bf16.mxu0 %v7206_v42  ;;  %4610 = vmatprep.subr.bf16.mxu1 %v7100_v34 }
 0x489   :  { %v2540_v43 = vpop.f32.mrb[72].mxu0  ;;  %v2581_v12 = vpop.f32.mrb[60].mxu1 }
 0x48a   :  { %v2754_v59 = vadd.f32 %v2540_v43, %v7207_v22  ;;  %v2542_v27 = vpop.f32.mrb[73].mxu0  ;;  %v4548_v16 = vpop.f32.mrb[61].mxu1  ;;  %v2768_v38 = vadd.f32 %v6567_v15, %v2581_v12 }
 0x48b   :  { %v2761_v48 = vadd.f32 %v2542_v27, %v7208_v4  ;;  %v2544_v20 = vpop.f32.mrb[74].mxu0  ;;  %v2584_v37 = vpop.f32.mrb[62].mxu1 }
 0x48c   :  { %v3981_v55 = vmul.f32 -1.442695, %v2754_v59  ;;  %v2545_v18 = vpop.f32.mrb[75].mxu0  ;;  %v4549_v57 = vpop.f32.mrb[63].mxu1 }
 0x48d   :  { %v3982_v9 = vmul.f32 -1.442695, %v2761_v48 }
 0x48e   :  { %5084 = vpow2.f32 %v3981_v55 }
 0x48f   :  { %5086 = vpow2.f32 %v3982_v9 }
 0x498   :  { %v5085_v45 = vpop.eup %5084 }
 0x499   :  { %v2758_v26 = vadd.f32 1.0, %v5085_v45  ;;  %v5087_v49 = vpop.eup %5086 }
 0x49a   :  { %v2765_v8 = vadd.f32 1.0, %v5087_v49  ;;  %v7214_v49 = vld [vmem:[#allocation71_spill] sm:$0xff] }
 0x49b   :  { %5088 = vrcp.f32 %v2758_v26 }
 0x49c   :  { %5090 = vrcp.f32 %v2765_v8 }
 0x4a5   :  { %v5089_v47 = vpop.eup %5088 }
 0x4a6   :  { %v2769_v14 = vmul.f32 %v5089_v47, %v2768_v38  ;;  %v5091_v12 = vpop.eup %5090 }
 0x4a7   :  { %v2772_v27 = vsub.f32 1.0, %v5091_v12  ;;  %v2774_v48 = vmul.f32 %v5091_v12, %v6437_v28  ;;  %v6669_v12 = vld [vmem:[#allocation6 + $0x48] ss:$12 sps:$4 sm:$0xff]  }
 0x4a8   :  { %v2770_v62 = vadd.f32 %v2769_v14, %v7209_v51 }
 0x4a9   :  { %v2622_v63 = vpop.f32.mrb[76].mxu0  ;;  %v2663_v7 = vpop.f32.mrb[64].mxu1 }
 0x4aa   :  { %5092 = vtanh.f32 %v2770_v62  ;;  %v2779_v10 = vadd.f32 %v2622_v63, %v7210_v2  ;;  %v2624_v3 = vpop.f32.mrb[77].mxu0  ;;  %v4568_v35 = vpop.f32.mrb[65].mxu1  ;;  %v6650_v2 = vld [vmem:[#allocation6 + $0x34] ss:$12 sps:$4 sm:$0xff]  }
 0x4ab   :  { %v2786_v6 = vadd.f32 %v2624_v3, %v7211_v5  ;;  %v2626_v13 = vpop.f32.mrb[78].mxu0  ;;  %v2666_v25 = vpop.f32.mrb[66].mxu1  ;;  %v5255_v3 = vld [vmem:[%s6973_s6 + $0x2] ss:$0 sm:$0xff]  ;;  %v6658_v5 = vld [vmem:[#allocation6 + $0x30] ss:$12 sps:$4 sm:$0xff]  }
 0x4ac   :  { %v3983_v42 = vmul.f32 -1.442695, %v2779_v10  ;;  %v2627_v43 = vpop.f32.mrb[79].mxu0  ;;  %v4569_v22 = vpop.f32.mrb[67].mxu1  ;;  %v6664_v25 = vld [vmem:[#allocation6 + $0x4c] ss:$12 sps:$4 sm:$0xff]  }
 0x4ad   :  { %v3984_v59 = vmul.f32 -1.442695, %v2786_v6  ;;  %v6661_v6 = vld [vmem:[#allocation6 + $0x38] ss:$12 sps:$4 sm:$0xff]  }
 0x4ae   :  { %5094 = vpow2.f32 %v3983_v42  ;;  %v7215_v43 = vld [vmem:[#allocation72_spill] sm:$0xff] }
 0x4af   :  { %5096 = vpow2.f32 %v3984_v59  ;;  %v6672_v59 = vld [vmem:[#allocation6 + $0x50] ss:$12 sps:$4 sm:$0xff]  }
 0x4b4   :  { %v5093_v16 = vpop.eup %5092 }
 0x4b5   :  { %v2773_v4 = vmul.f32 %v5093_v16, %v2772_v27  ;;  %v6675_v27 = vld [vmem:[#allocation6 + $0x64] ss:$12 sps:$4 sm:$0xff]   ;;  %v6679_v16 = vld [vmem:[#allocation6 + $0x60] ss:$12 sps:$4 sm:$0xff]  }
 0x4b7   :  { %v6574_v20 = vadd.f32 %v2774_v48, %v2773_v4  ;;  %v6682_v4 = vld [vmem:[#allocation6 + $0x68] ss:$12 sps:$4 sm:$0xff]  }
 0x4b8   :  { %v5095_v37 = vpop.eup %5094  ;;  %v6685_v48 = vld [vmem:[#allocation6 + $0x7c] ss:$12 sps:$4 sm:$0xff]  }
 0x4b9   :  { %v2783_v55 = vadd.f32 1.0, %v5095_v37  ;;  %v2826_v18 = vpack.c.bf16 %v6574_v20, %v6574_v20  ;;  %v5097_v28 = vpop.eup %5096 }
 0x4bb   :  { %5098 = vrcp.f32 %v2783_v55  ;;  %2860 = vmatmul.mubr.bf16.vlgmr.msra.gmra.mrb[84].mxu0 %v2826_v18  ;;  %4607 = vmatmul.mubr.bf16.vlgmr.msra.gmra.mrb[72].mxu1 %v2826_v18  ;;  %v6689_v55 = vld [vmem:[#allocation6 + $0x78] ss:$12 sps:$4 sm:$0xff]   ;;  %v6692_v18 = vld [vmem:[#allocation6 + $0x80] ss:$12 sps:$4 sm:$0xff]  }
 0x4bc   :  { %2910 = vmatpush1.bf16.msra.mxu0 %v6210_v58  ;;  %4611 = vmatpush3.bf16.msra.mxu1 %v6213_v30  ;;  %v2790_v58 = vadd.f32 1.0, %v5097_v28  ;;  %v6592_v30 = vld [vmem:[%s6973_s6 + $0x1] ss:$0 sm:$0xff] }
 0x4bd   :  { %2911 = vmatprep.subr.bf16.mxu0 %v6216_v50  ;;  %4612 = vmatprep.subr.bf16.mxu1 %v7100_v34  ;;  %v2793_v50 = vadd.f32 %v6592_v30, %v2663_v7  ;;  %v6647_v7 = vld [vmem:[#allocation6 + $0x20] ss:$12 sps:$4 sm:$0xff]  }
 0x4be   :  { %2941 = vmatprep.mubr.bf16.mxu0 %v7054_v32  ;;  %4626 = vmatprep.mubr.msk.bf16.mxu1 %vm5376_vm0, %v7100_v34  ;;  %5100 = vrcp.f32 %v2790_v58  ;;  %v6695_v28 = vld [vmem:[#allocation6 + $0x94] ss:$12 sps:$4 sm:$0xff]  }
 0x4c0   :  { %2912 = vmatpush1.bf16.msra.mxu0 %v6223_v29  ;;  %4613 = vmatpush3.bf16.msra.mxu1 %v6226_v53  ;;  %v7212_v53 = vld [vmem:[#allocation62_spill] sm:$0xff] }
 0x4c1   :  { %2913 = vmatprep.subr.bf16.mxu0 %v6229_v33  ;;  %4614 = vmatprep.subr.bf16.mxu1 %v7100_v34 }
 0x4c4   :  { %2914 = vmatpush1.bf16.msra.mxu0 %v6234_v44  ;;  %4615 = vmatpush3.bf16.msra.mxu1 %v6237_v60  ;;  %v7213_v44 = vld [vmem:[#allocation69_spill] sm:$0xff] }
 0x4c5   :  { %v5099_v57 = vpop.eup %5098  ;;  %2915 = vmatprep.subr.bf16.mxu0 %v6240_v46  ;;  %4616 = vmatprep.subr.bf16.mxu1 %v7100_v34 }
 0x4c6   :  { %v2794_v29 = vmul.f32 %v5099_v57, %v2793_v50  ;;  %v6699_v57 = vld [vmem:[#allocation6 + $0x90] ss:$12 sps:$4 sm:$0xff]  }
 0x4c8   :  { %v2795_v33 = vadd.f32 %v2794_v29, %v7212_v53  ;;  %2916 = vmatpush1.bf16.msra.mxu0 %v6245_v40  ;;  %4617 = vmatpush3.bf16.msra.mxu1 %v6248_v17  ;;  %v5101_v17 = vpop.eup %5100  ;;  %v6702_v29 = vld [vmem:[#allocation6 + $0x98] ss:$12 sps:$4 sm:$0xff]  }
 0x4c9   :  { %v2704_v9 = vpop.f32.mrb[80].mxu0  ;;  %v6602_v45 = vpop.f32.mrb[68].mxu1  ;;  %2917 = vmatprep.subr.bf16.mxu0 %v6253_v23  ;;  %4618 = vmatprep.subr.bf16.mxu1 %v7100_v34  ;;  %v2797_v62 = vsub.f32 1.0, %v5101_v17  ;;  %v6705_v53 = vld [vmem:[#allocation6 + $0xac] ss:$12 sps:$4 sm:$0xff]  }
 0x4ca   :  { %5102 = vtanh.f32 %v2795_v33  ;;  %v2804_v60 = vadd.f32 %v2704_v9, %v7213_v44  ;;  %v2706_v46 = vpop.f32.mrb[81].mxu0  ;;  %v4588_v26 = vpop.f32.mrb[69].mxu1  ;;  %v2818_v35 = vadd.f32 %v5255_v3, %v6602_v45  ;;  %v6712_v44 = vld [vmem:[#allocation6 + $0xa8] ss:$12 sps:$4 sm:$0xff]   ;;  %v7218_v3 = vld [vmem:[#allocation43_spill] sm:$0xff] }
 0x4cb   :  { %v2811_v8 = vadd.f32 %v2706_v46, %v7214_v49  ;;  %v2708_v38 = vpop.f32.mrb[82].mxu0  ;;  %v2748_v47 = vpop.f32.mrb[70].mxu1  ;;  %v7216_v49 = vld [vmem:[#allocation38_spill] sm:$0xff] }
 0x4cc   :  { %v3985_v14 = vmul.f32 -1.442695, %v2804_v60  ;;  %v2709_v40 = vpop.f32.mrb[83].mxu0  ;;  %v4589_v51 = vpop.f32.mrb[71].mxu1  ;;  %2918 = vmatpush1.bf16.msra.mxu0 %v6259_v36  ;;  %4619 = vmatpush3.bf16.msra.mxu1 %v6262_v54  ;;  %v2799_v54 = vmul.f32 %v5101_v17, %v6477_v61  ;;  %v6644_v61 = vld [vmem:[#allocation6 + $0x18] ss:$12 sps:$4 sm:$0xff]  }
 0x4cd   :  { %2919 = vmatprep.subr.bf16.mxu0 %v6265_v0  ;;  %4620 = vmatprep.subr.bf16.mxu1 %v7100_v34  ;;  %v3986_v23 = vmul.f32 -1.442695, %v2811_v8  ;;  %v5272_v60 = vld [vmem:[#allocation6 + $0xc4] ss:$12 sps:$4 sm:$0xff]  }
 0x4ce   :  { %5104 = vpow2.f32 %v3985_v14  ;;  %v7217_v14 = vld [vmem:[#allocation39_spill] sm:$0xff] }
 0x4cf   :  { %5106 = vpow2.f32 %v3986_v23 }
 0x4d0   :  { %2920 = vmatpush1.bf16.msra.mxu0 %v6269_v39  ;;  %4621 = vmatpush3.bf16.msra.mxu1 %v6272_v56 }
 0x4d1   :  { %2921 = vmatprep.subr.bf16.mxu0 %v6275_v24  ;;  %4622 = vmatprep.subr.bf16.mxu1 %v7100_v34 }
 0x4d4   :  { %v5103_v63 = vpop.eup %5102  ;;  %2922 = vmatpush1.bf16.msra.mxu0 %v7170_v41  ;;  %4623 = vmatpush3.bf16.msra.mxu1 %v7171_v11  ;;  %v6627_v41 = vld [vmem:[#allocation6 + $0x4] ss:$12 sps:$4 sm:$0xff]   ;;  %v6631_v11 = vld [vmem:[#allocation6] ss:$12 sps:$4 sm:$0xff]  }
 0x4d5   :  { %2923 = vmatprep.subr.bf16.mxu0 %v7172_v19  ;;  %4624 = vmatprep.subr.bf16.mxu1 %v7100_v34  ;;  %v2798_v36 = vmul.f32 %v5103_v63, %v2797_v62 }
 0x4d7   :  { %v6621_v0 = vadd.f32 %v2799_v54, %v2798_v36 }
 0x4d8   :  { %v5105_v39 = vpop.eup %5104  ;;  %2924 = vmatpush1.bf16.msra.mxu0 %v6292_v1  ;;  %4625 = vmatpush3.bf16.msra.mxu1 %v6295_v31  ;;  %v6634_v1 = vld [vmem:[#allocation6 + $0x8] ss:$12 sps:$4 sm:$0xff]  }
 0x4d9   :  { %v2808_v56 = vadd.f32 1.0, %v5105_v39  ;;  %v2908_v24 = vpack.c.bf16 %v6621_v0, %v6621_v0  ;;  %3041 = vmatprep.subr.bf16.mxu0 %v6627_v41  ;;  %4630 = vmatprep.subr.bf16.mxu1 %v7100_v34  ;;  %v6637_v31 = vld [vmem:[#allocation6 + $0x1c] ss:$12 sps:$4 sm:$0xff]   ;;  %v5107_v19 = vpop.eup %5106 }
 0x4da   :  { %v2815_v10 = vadd.f32 1.0, %v5107_v19 }
 0x4db   :  { %5108 = vrcp.f32 %v2808_v56  ;;  %2942 = vmatmul.mubr.bf16.vlgmr.msra.gmra.mrb[88].mxu0 %v2908_v24  ;;  %4627 = vmatmul.mubr.bf16.vlgmr.msra.gmra.mrb[76].mxu1 %v2908_v24 }
 0x4dc   :  { %3042 = vmatpush1.bf16.msra.mxu0 %v6631_v11  ;;  %4631 = vmatpush3.bf16.msra.mxu1 %v6634_v1  ;;  %5110 = vrcp.f32 %v2815_v10 }
 0x4dd   :  { %3043 = vmatprep.subr.bf16.mxu0 %v6637_v31  ;;  %4632 = vmatprep.subr.bf16.mxu1 %v7100_v34 }
 0x4de   :  { %3073 = vmatprep.mubr.bf16.mxu0 %v7054_v32  ;;  %4646 = vmatprep.mubr.msk.bf16.mxu1 %vm5376_vm0, %v7100_v34 }
 0x4e0   :  { %3044 = vmatpush1.bf16.msra.mxu0 %v6644_v61  ;;  %4633 = vmatpush3.bf16.msra.mxu1 %v6647_v7 }
 0x4e1   :  { %3045 = vmatprep.subr.bf16.mxu0 %v6650_v2  ;;  %4634 = vmatprep.subr.bf16.mxu1 %v7100_v34 }
 0x4e4   :  { %3046 = vmatpush1.bf16.msra.mxu0 %v6658_v5  ;;  %4635 = vmatpush3.bf16.msra.mxu1 %v6661_v6 }
 0x4e5   :  { %v5109_v13 = vpop.eup %5108  ;;  %3047 = vmatprep.subr.bf16.mxu0 %v6664_v25  ;;  %4636 = vmatprep.subr.bf16.mxu1 %v7100_v34 }
 0x4e6   :  { %v2819_v42 = vmul.f32 %v5109_v13, %v2818_v35  ;;  %v5111_v37 = vpop.eup %5110 }
 0x4e7   :  { %v2822_v58 = vsub.f32 1.0, %v5111_v37  ;;  %v2824_v9 = vmul.f32 %v5111_v37, %v6519_v52 }
 0x4e8   :  { %v2820_v22 = vadd.f32 %v2819_v42, %v7215_v43  ;;  %3048 = vmatpush1.bf16.msra.mxu0 %v6669_v12  ;;  %4637 = vmatpush3.bf16.msra.mxu1 %v6672_v59  ;;  %v7219_v43 = vld [vmem:[#allocation57_spill] sm:$0xff] }
 0x4e9   :  { %3049 = vmatprep.subr.bf16.mxu0 %v6675_v27  ;;  %4638 = vmatprep.subr.bf16.mxu1 %v7100_v34 }
 0x4ea   :  { %5112 = vtanh.f32 %v2820_v22 }
 0x4ec   :  { %3050 = vmatpush1.bf16.msra.mxu0 %v6679_v16  ;;  %4639 = vmatpush3.bf16.msra.mxu1 %v6682_v4 }
 0x4ed   :  { %3051 = vmatprep.subr.bf16.mxu0 %v6685_v48  ;;  %4640 = vmatprep.subr.bf16.mxu1 %v7100_v34 }
 0x4f0   :  { %3052 = vmatpush1.bf16.msra.mxu0 %v6689_v55  ;;  %4641 = vmatpush3.bf16.msra.mxu1 %v6692_v18 }
 0x4f1   :  { %3053 = vmatprep.subr.bf16.mxu0 %v6695_v28  ;;  %4642 = vmatprep.subr.bf16.mxu1 %v7100_v34 }
 0x4f4   :  { %v5113_v50 = vpop.eup %5112  ;;  %3054 = vmatpush1.bf16.msra.mxu0 %v6699_v57  ;;  %4643 = vmatpush3.bf16.msra.mxu1 %v6702_v29 }
 0x4f5   :  { %3055 = vmatprep.subr.bf16.mxu0 %v6705_v53  ;;  %4644 = vmatprep.subr.bf16.mxu1 %v7100_v34  ;;  %v2823_v33 = vmul.f32 %v5113_v50, %v2822_v58  ;;  %v7220_v50 = vld [vmem:[#allocation58_spill] sm:$0xff] }
 0x4f7   :  { %v6710_v45 = vadd.f32 %v2824_v9, %v2823_v33 }
 0x4f8   :  { %3056 = vmatpush1.bf16.msra.mxu0 %v6712_v44  ;;  %4645 = vmatpush3.bf16.msra.mxu1 %v7205_v21 }
 0x4f9   :  { %3123 = vmatprep.subr.bf16.mxu0 %v5272_v60  ;;  %4650 = vmatprep.subr.bf16.mxu1 %v7100_v34 }
 0x58e   :  { %v2861_v46 = vpop.f32.mrb[84].mxu0  ;;  %v2902_v26 = vpop.f32.mrb[72].mxu1 }
 0x58f   :  { %v2993_v8 = vadd.f32 %v2861_v46, %v7216_v49  ;;  %v2863_v38 = vpop.f32.mrb[85].mxu0  ;;  %v4608_v47 = vpop.f32.mrb[73].mxu1  ;;  %v3007_v24 = vadd.f32 %v6567_v15, %v2902_v26 }
 0x590   :  { %v3000_v52 = vadd.f32 %v2863_v38, %v7217_v14  ;;  %v2865_v40 = vpop.f32.mrb[86].mxu0  ;;  %v2905_v51 = vpop.f32.mrb[74].mxu1 }
 0x591   :  { %v3987_v17 = vmul.f32 -1.442695, %v2993_v8  ;;  %v2866_v23 = vpop.f32.mrb[87].mxu0  ;;  %v4609_v62 = vpop.f32.mrb[75].mxu1 }
 0x592   :  { %v3988_v63 = vmul.f32 -1.442695, %v3000_v52 }
 0x593   :  { %5114 = vpow2.f32 %v3987_v17 }
 0x594   :  { %5116 = vpow2.f32 %v3988_v63  ;;  %v5273_v63 = vld [vmem:[#allocation6 + $0xc0] ss:$12 sps:$4 sm:$0xff]  }
 0x59d   :  { %v5115_v36 = vpop.eup %5114 }
 0x59e   :  { %v2997_v54 = vadd.f32 1.0, %v5115_v36  ;;  %v5117_v39 = vpop.eup %5116  ;;  %v5274_v36 = vld [vmem:[#allocation6 + $0xc8] ss:$12 sps:$4 sm:$0xff]  }
 0x59f   :  { %v3004_v56 = vadd.f32 1.0, %v5117_v39  ;;  %v5276_v39 = vld [vmem:[#allocation6 + $0xd8] ss:$12 sps:$4 sm:$0xff]  }
 0x5a0   :  { %5118 = vrcp.f32 %v2997_v54  ;;  %v5275_v54 = vld [vmem:[#allocation6 + $0xdc] ss:$12 sps:$4 sm:$0xff]  }
 0x5a1   :  { %5120 = vrcp.f32 %v3004_v56  ;;  %v5277_v56 = vld [vmem:[#allocation6 + $0xe0] ss:$12 sps:$4 sm:$0xff]  }
 0x5aa   :  { %v5119_v19 = vpop.eup %5118 }
 0x5ab   :  { %v3008_v10 = vmul.f32 %v5119_v19, %v3007_v24  ;;  %v5121_v26 = vpop.eup %5120  ;;  %v5278_v24 = vld [vmem:[#allocation6 + $0xf4] ss:$12 sps:$4 sm:$0xff]  }
 0x5ac   :  { %v3011_v47 = vsub.f32 1.0, %v5121_v26  ;;  %v3013_v40 = vmul.f32 %v5121_v26, %v6574_v20  ;;  %v5289_v26 = vld [vmem:[#allocation6 + $0x140] ss:$12 sps:$4 sm:$0xff]  }
 0x5ad   :  { %v3009_v35 = vadd.f32 %v3008_v10, %v7218_v3  ;;  %v5279_v3 = vld [vmem:[#allocation6 + $0xf0] ss:$12 sps:$4 sm:$0xff]  }
 0x5ae   :  { %v2943_v13 = vpop.f32.mrb[88].mxu0  ;;  %v2984_v42 = vpop.f32.mrb[76].mxu1 }
 0x5af   :  { %5122 = vtanh.f32 %v3009_v35  ;;  %v3018_v22 = vadd.f32 %v2943_v13, %v7219_v43  ;;  %v2945_v37 = vpop.f32.mrb[89].mxu0  ;;  %v4628_v58 = vpop.f32.mrb[77].mxu1  ;;  %v3032_v10 = vadd.f32 %v6592_v30, %v2984_v42  ;;  %v5280_v35 = vld [vmem:[#allocation6 + $0xf8] ss:$12 sps:$4 sm:$0xff]   ;;  %v5285_v42 = vld [vmem:[#allocation6 + $0x120] ss:$12 sps:$4 sm:$0xff]  }
 0x5b0   :  { %v3025_v33 = vadd.f32 %v2945_v37, %v7220_v50  ;;  %v2947_v9 = vpop.f32.mrb[90].mxu0  ;;  %v2987_v60 = vpop.f32.mrb[78].mxu1  ;;  %v5281_v43 = vld [vmem:[#allocation6 + $0x10c] ss:$12 sps:$4 sm:$0xff]   ;;  %v5282_v50 = vld [vmem:[#allocation6 + $0x108] ss:$12 sps:$4 sm:$0xff]  }
 0x5b1   :  { %v3989_v46 = vmul.f32 -1.442695, %v3018_v22  ;;  %v2948_v49 = vpop.f32.mrb[91].mxu0  ;;  %v4629_v8 = vpop.f32.mrb[79].mxu1  ;;  %v7221_v37 = vld [vmem:[#allocation63_spill] sm:$0xff] }
 0x5b2   :  { %v3990_v38 = vmul.f32 -1.442695, %v3025_v33  ;;  %v5283_v33 = vld [vmem:[#allocation6 + $0x110] ss:$12 sps:$4 sm:$0xff]   ;;  %v5286_v60 = vld [vmem:[#allocation6 + $0x128] ss:$12 sps:$4 sm:$0xff]  }
 0x5b3   :  { %5124 = vpow2.f32 %v3989_v46  ;;  %v5284_v9 = vld [vmem:[#allocation6 + $0x124] ss:$12 sps:$4 sm:$0xff]   ;;  %v5287_v46 = vld [vmem:[#allocation6 + $0x13c] ss:$12 sps:$4 sm:$0xff]  }
 0x5b4   :  { %5126 = vpow2.f32 %v3990_v38  ;;  %v5288_v8 = vld [vmem:[#allocation6 + $0x138] ss:$12 sps:$4 sm:$0xff]   ;;  %v5290_v38 = vld [vmem:[#allocation6 + $0x154] ss:$12 sps:$4 sm:$0xff]  }
 0x5b9   :  { %v5123_v14 = vpop.eup %5122 }
 0x5ba   :  { %v3012_v52 = vmul.f32 %v5123_v14, %v3011_v47 }
 0x5bc   :  { %v6724_v51 = vadd.f32 %v3013_v40, %v3012_v52  ;;  %v5291_v52 = vld [vmem:[#allocation6 + $0x150] ss:$12 sps:$4 sm:$0xff]   ;;  %v5292_v40 = vld [vmem:[#allocation6 + $0x158] ss:$12 sps:$4 sm:$0xff]  }
 0x5bd   :  { %v5125_v17 = vpop.eup %5124 }
 0x5be   :  { %v3022_v23 = vadd.f32 1.0, %v5125_v17  ;;  %v3040_v62 = vpack.c.bf16 %v6724_v51, %v6724_v51  ;;  %v5127_v20 = vpop.eup %5126  ;;  %v5293_v17 = vld [vmem:[#allocation6 + $0x16c] ss:$12 sps:$4 sm:$0xff]  }
 0x5bf   :  { %v3029_v19 = vadd.f32 1.0, %v5127_v20 }
 0x5c0   :  { %5128 = vrcp.f32 %v3022_v23  ;;  %3074 = vmatmul.mubr.bf16.vlgmr.msra.gmra.mrb[92].mxu0 %v3040_v62  ;;  %4647 = vmatmul.mubr.bf16.vlgmr.msra.gmra.mrb[80].mxu1 %v3040_v62 }
 0x5c1   :  { %3124 = vmatpush1.bf16.msra.mxu0 %v5273_v63  ;;  %4651 = vmatpush3.bf16.msra.mxu1 %v5274_v36  ;;  %5130 = vrcp.f32 %v3029_v19  ;;  %v5294_v36 = vld [vmem:[#allocation6 + $0x168] ss:$12 sps:$4 sm:$0xff]  }
 0x5c2   :  { %3125 = vmatprep.subr.bf16.mxu0 %v5275_v54  ;;  %4652 = vmatprep.subr.bf16.mxu1 %v7100_v34  ;;  %v5295_v54 = vld [vmem:[#allocation6 + $0x170] ss:$12 sps:$4 sm:$0xff]  }
 0x5c3   :  { %3155 = vmatprep.mubr.bf16.mxu0 %v7054_v32  ;;  %4666 = vmatprep.mubr.msk.bf16.mxu1 %vm5376_vm0, %v7100_v34 }
 0x5c5   :  { %3126 = vmatpush1.bf16.msra.mxu0 %v5276_v39  ;;  %4653 = vmatpush3.bf16.msra.mxu1 %v5277_v56  ;;  %v7222_v56 = vld [vmem:[#allocation40_spill] sm:$0xff] }
 0x5c6   :  { %3127 = vmatprep.subr.bf16.mxu0 %v5278_v24  ;;  %4654 = vmatprep.subr.bf16.mxu1 %v7100_v34 }
 0x5c9   :  { %3128 = vmatpush1.bf16.msra.mxu0 %v5279_v3  ;;  %4655 = vmatpush3.bf16.msra.mxu1 %v5280_v35  ;;  %v7223_v3 = vld [vmem:[#allocation42_spill] sm:$0xff] }
 0x5ca   :  { %v5129_v13 = vpop.eup %5128  ;;  %3129 = vmatprep.subr.bf16.mxu0 %v5281_v43  ;;  %4656 = vmatprep.subr.bf16.mxu1 %v7100_v34 }
 0x5cb   :  { %v3033_v22 = vmul.f32 %v5129_v13, %v3032_v10  ;;  %v5131_v49 = vpop.eup %5130 }
 0x5cc   :  { %v3036_v47 = vsub.f32 1.0, %v5131_v49  ;;  %v3038_v62 = vmul.f32 %v5131_v49, %v6621_v0  ;;  %v7224_v49 = vld [vmem:[#allocation45_spill] sm:$0xff] }
 0x5cd   :  { %v3034_v58 = vadd.f32 %v3033_v22, %v7221_v37  ;;  %3130 = vmatpush1.bf16.msra.mxu0 %v5282_v50  ;;  %4657 = vmatpush3.bf16.msra.mxu1 %v5283_v33 }
 0x5ce   :  { %3131 = vmatprep.subr.bf16.mxu0 %v5284_v9  ;;  %4658 = vmatprep.subr.bf16.mxu1 %v7100_v34 }
 0x5cf   :  { %5132 = vtanh.f32 %v3034_v58 }
 0x5d1   :  { %3132 = vmatpush1.bf16.msra.mxu0 %v5285_v42  ;;  %4659 = vmatpush3.bf16.msra.mxu1 %v5286_v60 }
 0x5d2   :  { %3133 = vmatprep.subr.bf16.mxu0 %v5287_v46  ;;  %4660 = vmatprep.subr.bf16.mxu1 %v7100_v34 }
 0x5d5   :  { %3134 = vmatpush1.bf16.msra.mxu0 %v5288_v8  ;;  %4661 = vmatpush3.bf16.msra.mxu1 %v5289_v26 }
 0x5d6   :  { %3135 = vmatprep.subr.bf16.mxu0 %v5290_v38  ;;  %4662 = vmatprep.subr.bf16.mxu1 %v7100_v34 }
 0x5d9   :  { %v5133_v14 = vpop.eup %5132  ;;  %3136 = vmatpush1.bf16.msra.mxu0 %v5291_v52  ;;  %4663 = vmatpush3.bf16.msra.mxu1 %v5292_v40 }
 0x5da   :  { %3137 = vmatprep.subr.bf16.mxu0 %v5293_v17  ;;  %4664 = vmatprep.subr.bf16.mxu1 %v7100_v34  ;;  %v3037_v23 = vmul.f32 %v5133_v14, %v3036_v47  ;;  %v7225_v47 = vld [vmem:[#allocation59_spill] sm:$0xff]  ;;  %v7226_v17 = vld [vmem:[#allocation61_spill] sm:$0xff] }
 0x5dc   :  { %v6741_v63 = vadd.f32 %v3038_v62, %v3037_v23 }
 0x5dd   :  { %3138 = vmatpush1.bf16.msra.mxu0 %v5294_v36  ;;  %4665 = vmatpush3.bf16.msra.mxu1 %v5295_v54 }
 0x5de   :  { %v3122_v20 = vpack.c.bf16 %v6741_v63, %v6741_v63  ;;  %3255 = vmatprep.subr.bf16.mxu0 %v6627_v41  ;;  %4670 = vmatprep.subr.bf16.mxu1 %v7100_v34 }
 0x5e0   :  { %3156 = vmatmul.mubr.bf16.vlgmr.msra.gmra.mrb[96].mxu0 %v3122_v20  ;;  %4667 = vmatmul.mubr.bf16.vlgmr.msra.gmra.mrb[84].mxu1 %v3122_v20 }
 0x5e1   :  { %3256 = vmatpush1.bf16.msra.mxu0 %v6631_v11  ;;  %4671 = vmatpush3.bf16.msra.mxu1 %v6634_v1 }
 0x5e2   :  { %3257 = vmatprep.subr.bf16.mxu0 %v6637_v31  ;;  %4672 = vmatprep.subr.bf16.mxu1 %v7100_v34 }
 0x5e3   :  { %3287 = vmatprep.mubr.bf16.mxu0 %v7054_v32  ;;  %4686 = vmatprep.mubr.msk.bf16.mxu1 %vm5376_vm0, %v7100_v34 }
 0x5e5   :  { %3258 = vmatpush1.bf16.msra.mxu0 %v6644_v61  ;;  %4673 = vmatpush3.bf16.msra.mxu1 %v6647_v7 }
 0x5e6   :  { %3259 = vmatprep.subr.bf16.mxu0 %v6650_v2  ;;  %4674 = vmatprep.subr.bf16.mxu1 %v7100_v34 }
 0x5e9   :  { %3260 = vmatpush1.bf16.msra.mxu0 %v6658_v5  ;;  %4675 = vmatpush3.bf16.msra.mxu1 %v6661_v6 }
 0x5ea   :  { %3261 = vmatprep.subr.bf16.mxu0 %v6664_v25  ;;  %4676 = vmatprep.subr.bf16.mxu1 %v7100_v34 }
 0x5ed   :  { %3262 = vmatpush1.bf16.msra.mxu0 %v6669_v12  ;;  %4677 = vmatpush3.bf16.msra.mxu1 %v6672_v59 }
 0x5ee   :  { %3263 = vmatprep.subr.bf16.mxu0 %v6675_v27  ;;  %4678 = vmatprep.subr.bf16.mxu1 %v7100_v34 }
 0x5f1   :  { %3264 = vmatpush1.bf16.msra.mxu0 %v6679_v16  ;;  %4679 = vmatpush3.bf16.msra.mxu1 %v6682_v4 }
 0x5f2   :  { %3265 = vmatprep.subr.bf16.mxu0 %v6685_v48  ;;  %4680 = vmatprep.subr.bf16.mxu1 %v7100_v34 }
 0x5f5   :  { %3266 = vmatpush1.bf16.msra.mxu0 %v6689_v55  ;;  %4681 = vmatpush3.bf16.msra.mxu1 %v6692_v18 }
 0x5f6   :  { %3267 = vmatprep.subr.bf16.mxu0 %v6695_v28  ;;  %4682 = vmatprep.subr.bf16.mxu1 %v7100_v34 }
 0x5f9   :  { %3268 = vmatpush1.bf16.msra.mxu0 %v6699_v57  ;;  %4683 = vmatpush3.bf16.msra.mxu1 %v6702_v29 }
 0x5fa   :  { %3269 = vmatprep.subr.bf16.mxu0 %v6705_v53  ;;  %4684 = vmatprep.subr.bf16.mxu1 %v7100_v34 }
 0x5fd   :  { %3270 = vmatpush1.bf16.msra.mxu0 %v6712_v44  ;;  %4685 = vmatpush3.bf16.msra.mxu1 %v7205_v21 }
 0x5fe   :  { %3362 = vmatprep.subr.bf16.mxu0 %v6627_v41  ;;  %4690 = vmatprep.subr.bf16.mxu1 %v7100_v34 }
 0x693   :  { %v3075_v0 = vpop.f32.mrb[92].mxu0  ;;  %v3116_v39 = vpop.f32.mrb[80].mxu1 }
 0x694   :  { %v3207_v24 = vadd.f32 %v3075_v0, %v7222_v56  ;;  %v3077_v19 = vpop.f32.mrb[93].mxu0  ;;  %v4648_v10 = vpop.f32.mrb[81].mxu1  ;;  %v3221_v42 = vadd.f32 %v6567_v15, %v3116_v39 }
 0x695   :  { %v3214_v35 = vadd.f32 %v3077_v19, %v7223_v3  ;;  %v3079_v13 = vpop.f32.mrb[94].mxu0  ;;  %v3119_v43 = vpop.f32.mrb[82].mxu1 }
 0x696   :  { %v3991_v22 = vmul.f32 -1.442695, %v3207_v24  ;;  %v3080_v37 = vpop.f32.mrb[95].mxu0  ;;  %v4649_v58 = vpop.f32.mrb[83].mxu1 }
 0x697   :  { %v3992_v50 = vmul.f32 -1.442695, %v3214_v35 }
 0x698   :  { %5134 = vpow2.f32 %v3991_v22 }
 0x699   :  { %5136 = vpow2.f32 %v3992_v50 }
 0x6a2   :  { %v5135_v21 = vpop.eup %5134 }
 0x6a3   :  { %v3211_v41 = vadd.f32 1.0, %v5135_v21  ;;  %v5137_v33 = vpop.eup %5136 }
 0x6a4   :  { %v3218_v9 = vadd.f32 1.0, %v5137_v33 }
 0x6a5   :  { %5138 = vrcp.f32 %v3211_v41 }
 0x6a6   :  { %5140 = vrcp.f32 %v3218_v9 }
 0x6af   :  { %v5139_v60 = vpop.eup %5138 }
 0x6b0   :  { %v3222_v46 = vmul.f32 %v5139_v60, %v3221_v42  ;;  %v5141_v39 = vpop.eup %5140 }
 0x6b1   :  { %v3225_v24 = vsub.f32 1.0, %v5141_v39  ;;  %v3227_v3 = vmul.f32 %v5141_v39, %v6724_v51  ;;  %v4978_v39 = vld [vmem:[%s6974_s7 + $0x80] sm:$0xff]  }
 0x6b2   :  { %v3223_v8 = vadd.f32 %v3222_v46, %v7224_v49  ;;  %v7230_v46 = vld [vmem:[#allocation41_spill] sm:$0xff] }
 0x6b3   :  { %v3157_v26 = vpop.f32.mrb[96].mxu0  ;;  %v3198_v38 = vpop.f32.mrb[84].mxu1 }
 0x6b4   :  { %5142 = vtanh.f32 %v3223_v8  ;;  %v3232_v14 = vadd.f32 %v3157_v26, %v7225_v47  ;;  %v3159_v52 = vpop.f32.mrb[97].mxu0  ;;  %v4668_v40 = vpop.f32.mrb[85].mxu1 }
 0x6b5   :  { %v3239_v23 = vadd.f32 %v3159_v52, %v7226_v17  ;;  %v3161_v62 = vpop.f32.mrb[98].mxu0  ;;  %v3201_v36 = vpop.f32.mrb[86].mxu1  ;;  %v4970_v40 = vld [vmem:[%s6974_s7 + $0x40] sm:$0xff]   ;;  %v4971_v17 = vld [vmem:[%s6974_s7 + $0x48] sm:$0xff]  }
 0x6b6   :  { %v3993_v54 = vmul.f32 -1.442695, %v3232_v14  ;;  %v3162_v20 = vpop.f32.mrb[99].mxu0  ;;  %v4669_v0 = vpop.f32.mrb[87].mxu1  ;;  %v4973_v62 = vld [vmem:[%s6974_s7 + $0x58] sm:$0xff]   ;;  %v4974_v36 = vld [vmem:[%s6974_s7 + $0x60] sm:$0xff]  }
 0x6b7   :  { %v3994_v56 = vmul.f32 -1.442695, %v3239_v23  ;;  %v4972_v23 = vld [vmem:[%s6974_s7 + $0x50] sm:$0xff]   ;;  %v4977_v0 = vld [vmem:[%s6974_s7 + $0x78] sm:$0xff]  }
 0x6b8   :  { %5144 = vpow2.f32 %v3993_v54  ;;  %v4975_v54 = vld [vmem:[%s6974_s7 + $0x68] sm:$0xff]   ;;  %v4976_v20 = vld [vmem:[%s6974_s7 + $0x70] sm:$0xff]  }
 0x6b9   :  { %5146 = vpow2.f32 %v3994_v56 }
 0x6be   :  { %v5143_v19 = vpop.eup %5142 }
 0x6bf   :  { %v3226_v10 = vmul.f32 %v5143_v19, %v3225_v24  ;;  %v4979_v24 = vld [vmem:[%s6974_s7 + $0x88] sm:$0xff]   ;;  %v4980_v19 = vld [vmem:[%s6974_s7 + $0x90] sm:$0xff]  }
 0x6c1   :  { %v6789_v35 = vadd.f32 %v3227_v3, %v3226_v10  ;;  %v4981_v10 = vld [vmem:[%s6974_s7 + $0x98] sm:$0xff]   ;;  %v4982_v3 = vld [vmem:[%s6974_s7 + $0xa0] sm:$0xff]  }
 0x6c2   :  { %v5145_v13 = vpop.eup %5144 }
 0x6c3   :  { %v3236_v43 = vadd.f32 1.0, %v5145_v13  ;;  %v3254_v22 = vpack.c.bf16 %v6789_v35, %v6789_v35  ;;  %v5147_v51 = vpop.eup %5146  ;;  %v4984_v13 = vld [vmem:[%s6974_s7 + $0xb0] sm:$0xff]  }
 0x6c5   :  { %5148 = vrcp.f32 %v3236_v43  ;;  %3288 = vmatmul.mubr.bf16.vlgmr.msra.gmra.mrb[100].mxu0 %v3254_v22  ;;  %4687 = vmatmul.mubr.bf16.vlgmr.msra.gmra.mrb[88].mxu1 %v3254_v22  ;;  %v4985_v43 = vld [vmem:[%s6974_s7 + $0xb8] sm:$0xff]   ;;  %v3679_v22 = vpack.c.bf16 %v6710_v45, %v6710_v45 }
 0x6c6   :  { %3363 = vmatpush1.bf16.msra.mxu0 %v6631_v11  ;;  %4691 = vmatpush3.bf16.msra.mxu1 %v6634_v1  ;;  %v3243_v11 = vadd.f32 1.0, %v5147_v51  ;;  %v3246_v1 = vadd.f32 %v6592_v30, %v3198_v38  ;;  %v4986_v51 = vld [vmem:[%s6974_s7] sm:$0xff]   ;;  %v4989_v45 = vld [vmem:[%s6974_s7 + $0x18] sm:$0xff]  }
 0x6c7   :  { %3364 = vmatprep.subr.bf16.mxu0 %v6637_v31  ;;  %4692 = vmatprep.subr.bf16.mxu1 %v7100_v34 }
 0x6c8   :  { %3394 = vmatprep.mubr.bf16.mxu0 %v7054_v32  ;;  %4706 = vmatprep.mubr.msk.bf16.mxu1 %vm5376_vm0, %v7100_v34  ;;  %5150 = vrcp.f32 %v3243_v11  ;;  %v4987_v11 = vld [vmem:[%s6974_s7 + $0x8] sm:$0xff]  }
 0x6ca   :  { %3365 = vmatpush1.bf16.msra.mxu0 %v6644_v61  ;;  %4693 = vmatpush3.bf16.msra.mxu1 %v6647_v7  ;;  %v7227_v61 = vld [vmem:[#allocation64_spill] sm:$0xff] }
 0x6cb   :  { %3366 = vmatprep.subr.bf16.mxu0 %v6650_v2  ;;  %4694 = vmatprep.subr.bf16.mxu1 %v7100_v34 }
 0x6ce   :  { %3367 = vmatpush1.bf16.msra.mxu0 %v6658_v5  ;;  %4695 = vmatpush3.bf16.msra.mxu1 %v6661_v6 }
 0x6cf   :  { %v5149_v32 = vpop.eup %5148  ;;  %3368 = vmatprep.subr.bf16.mxu0 %v6664_v25  ;;  %4696 = vmatprep.subr.bf16.mxu1 %v7100_v34 }
 0x6d0   :  { %v3247_v31 = vmul.f32 %v5149_v32, %v3246_v1  ;;  %v4988_v1 = vld [vmem:[%s6974_s7 + $0x10] sm:$0xff]   ;;  %v4990_v32 = vld [vmem:[%s6974_s7 + $0x20] sm:$0xff]  }
 0x6d2   :  { %v3248_v7 = vadd.f32 %v3247_v31, %v7227_v61  ;;  %3369 = vmatpush1.bf16.msra.mxu0 %v6669_v12  ;;  %4697 = vmatpush3.bf16.msra.mxu1 %v6672_v59  ;;  %v5151_v30 = vpop.eup %5150  ;;  %v5296_v59 = vld [vmem:[#allocation6 + $0xb0] ss:$12 sps:$4 sm:$0xff]   ;;  %v4991_v31 = vld [vmem:[%s6974_s7 + $0x28] sm:$0xff]  }
 0x6d3   :  { %3370 = vmatprep.subr.bf16.mxu0 %v6675_v27  ;;  %4698 = vmatprep.subr.bf16.mxu1 %v7100_v34  ;;  %v3250_v2 = vsub.f32 1.0, %v5151_v30  ;;  %v3252_v25 = vmul.f32 %v5151_v30, %v6741_v63  ;;  %v4992_v61 = vld [vmem:[%s6974_s7 + $0x30] sm:$0xff]  }
 0x6d4   :  { %5152 = vtanh.f32 %v3248_v7  ;;  %v4993_v7 = vld [vmem:[%s6974_s7 + $0x38] sm:$0xff]  }
 0x6d6   :  { %3371 = vmatpush1.bf16.msra.mxu0 %v6679_v16  ;;  %4699 = vmatpush3.bf16.msra.mxu1 %v6682_v4  ;;  %v7228_v4 = vld [vmem:[#allocation46_spill] sm:$0xff] }
 0x6d7   :  { %3372 = vmatprep.subr.bf16.mxu0 %v6685_v48  ;;  %4700 = vmatprep.subr.bf16.mxu1 %v7100_v34 }
 0x6da   :  { %3373 = vmatpush1.bf16.msra.mxu0 %v6689_v55  ;;  %4701 = vmatpush3.bf16.msra.mxu1 %v6692_v18 }
 0x6db   :  { %3374 = vmatprep.subr.bf16.mxu0 %v6695_v28  ;;  %4702 = vmatprep.subr.bf16.mxu1 %v7100_v34  ;;  %v7229_v28 = vld [vmem:[#allocation47_spill] sm:$0xff] }
 0x6de   :  { %v5153_v5 = vpop.eup %5152  ;;  %3375 = vmatpush1.bf16.msra.mxu0 %v6699_v57  ;;  %4703 = vmatpush3.bf16.msra.mxu1 %v6702_v29 }
 0x6df   :  { %3376 = vmatprep.subr.bf16.mxu0 %v6705_v53  ;;  %4704 = vmatprep.subr.bf16.mxu1 %v7100_v34  ;;  %v3251_v6 = vmul.f32 %v5153_v5, %v3250_v2  ;;  %v7231_v5 = vld [vmem:[#allocation48_spill] sm:$0xff] }
 0x6e1   :  { %v6827_v12 = vadd.f32 %v3252_v25, %v3251_v6 }
 0x6e2   :  { %3377 = vmatpush1.bf16.msra.mxu0 %v6712_v44  ;;  %4705 = vmatpush3.bf16.msra.mxu1 %v5296_v59  ;;  %v7232_v59 = vld [vmem:[#allocation49_spill] sm:$0xff] }
 0x6e3   :  { %4710 = vmatprep.subr.bf16.mxu0 %v7100_v34  ;;  %4730 = vmatprep.subr.bf16.mxu1 %v7100_v34  ;;  %v3485_v56 = vpack.c.bf16 %v6827_v12, %v6827_v12 }
 0x798   :  { %v3289_v27 = vpop.f32.mrb[100].mxu0  ;;  %v3330_v16 = vpop.f32.mrb[88].mxu1 }
 0x799   :  { %v3339_v48 = vadd.f32 %v3289_v27, %v7228_v4  ;;  %v3291_v55 = vpop.f32.mrb[101].mxu0  ;;  %v4688_v18 = vpop.f32.mrb[89].mxu1  ;;  %v3353_v9 = vadd.f32 %v6567_v15, %v3330_v16 }
 0x79a   :  { %v3346_v57 = vadd.f32 %v3291_v55, %v7229_v28  ;;  %v3293_v29 = vpop.f32.mrb[102].mxu0  ;;  %v3333_v53 = vpop.f32.mrb[90].mxu1 }
 0x79b   :  { %v3995_v63 = vmul.f32 -1.442695, %v3339_v48  ;;  %v3294_v37 = vpop.f32.mrb[103].mxu0  ;;  %v4689_v58 = vpop.f32.mrb[91].mxu1 }
 0x79c   :  { %v3996_v44 = vmul.f32 -1.442695, %v3346_v57 }
 0x79d   :  { %5154 = vpow2.f32 %v3995_v63  ;;  %v5297_v63 = vld [vmem:[%s6973_s6] ss:$0 sm:$0xff] }
 0x79e   :  { %5156 = vpow2.f32 %v3996_v44 }
 0x7a7   :  { %v5155_v50 = vpop.eup %5154 }
 0x7a8   :  { %v3343_v21 = vadd.f32 1.0, %v5155_v50  ;;  %v5157_v41 = vpop.eup %5156  ;;  %v7233_v50 = vld [vmem:[#allocation44_spill] sm:$0xff] }
 0x7a9   :  { %v3350_v33 = vadd.f32 1.0, %v5157_v41 }
 0x7aa   :  { %5158 = vrcp.f32 %v3343_v21 }
 0x7ab   :  { %5160 = vrcp.f32 %v3350_v33 }
 0x7b4   :  { %v5159_v42 = vpop.eup %5158 }
 0x7b5   :  { %v3354_v60 = vmul.f32 %v5159_v42, %v3353_v9  ;;  %v5161_v8 = vpop.eup %5160 }
 0x7b6   :  { %v3357_v26 = vsub.f32 1.0, %v5161_v8  ;;  %v3359_v14 = vmul.f32 %v5161_v8, %v6789_v35  ;;  %v4983_v35 = vld [vmem:[%s6974_s7 + $0xa8] sm:$0xff]  }
 0x7b7   :  { %v3355_v49 = vadd.f32 %v3354_v60, %v7230_v46 }
 0x7b9   :  { %5162 = vtanh.f32 %v3355_v49 }
 0x7c3   :  { %v5163_v38 = vpop.eup %5162 }
 0x7c4   :  { %v3358_v47 = vmul.f32 %v5163_v38, %v3357_v26 }
 0x7c6   :  { %v6837_v52 = vadd.f32 %v3359_v14, %v3358_v47 }
 0x7c8   :  { %v3361_v15 = vpack.c.bf16 %v6837_v52, %v6837_v52 }
 0x7ca   :  { %3395 = vmatmul.mubr.bf16.vlgmr.msra.gmra.mrb[104].mxu0 %v3361_v15  ;;  %4707 = vmatmul.mubr.bf16.vlgmr.msra.gmra.mrb[92].mxu1 %v3361_v15 }
 0x7cb   :  { %4711 = vmatpush3.bf16.msra.mxu0 %v4970_v40  ;;  %4726 = vmatprep.mubr.msk.bf16.mxu0 %vm5376_vm0, %v7100_v34 }
 0x7cc   :  { %4712 = vmatprep.subr.bf16.mxu0 %v7100_v34  ;;  %4746 = vmatprep.mubr.msk.bf16.mxu1 %vm5376_vm0, %v7100_v34 }
 0x7cd   :  { %4731 = vmatpush3.bf16.msra.mxu1 %v4986_v51 }
 0x7ce   :  { %4732 = vmatprep.subr.bf16.mxu1 %v7100_v34 }
 0x7cf   :  { %4713 = vmatpush3.bf16.msra.mxu0 %v4971_v17 }
 0x7d0   :  { %4714 = vmatprep.subr.bf16.mxu0 %v7100_v34 }
 0x7d1   :  { %4733 = vmatpush3.bf16.msra.mxu1 %v4987_v11 }
 0x7d2   :  { %4734 = vmatprep.subr.bf16.mxu1 %v7100_v34 }
 0x7d3   :  { %4715 = vmatpush3.bf16.msra.mxu0 %v4972_v23 }
 0x7d4   :  { %4716 = vmatprep.subr.bf16.mxu0 %v7100_v34 }
 0x7d5   :  { %4735 = vmatpush3.bf16.msra.mxu1 %v4988_v1 }
 0x7d6   :  { %4736 = vmatprep.subr.bf16.mxu1 %v7100_v34 }
 0x7d7   :  { %4717 = vmatpush3.bf16.msra.mxu0 %v4973_v62 }
 0x7d8   :  { %4718 = vmatprep.subr.bf16.mxu0 %v7100_v34 }
 0x7d9   :  { %4737 = vmatpush3.bf16.msra.mxu1 %v4989_v45 }
 0x7da   :  { %4738 = vmatprep.subr.bf16.mxu1 %v7100_v34 }
 0x7db   :  { %4719 = vmatpush3.bf16.msra.mxu0 %v4974_v36 }
 0x7dc   :  { %4720 = vmatprep.subr.bf16.mxu0 %v7100_v34 }
 0x7dd   :  { %4739 = vmatpush3.bf16.msra.mxu1 %v4990_v32 }
 0x7de   :  { %4740 = vmatprep.subr.bf16.mxu1 %v7100_v34 }
 0x7df   :  { %4721 = vmatpush3.bf16.msra.mxu0 %v4975_v54  ;;  %v4055_v54 = vld [vmem:[%s6975_s8] ss:$0 sm:$0xff] }
 0x7e0   :  { %4722 = vmatprep.subr.bf16.mxu0 %v7100_v34 }
 0x7e1   :  { %4741 = vmatpush3.bf16.msra.mxu1 %v4991_v31 }
 0x7e2   :  { %4742 = vmatprep.subr.bf16.mxu1 %v7100_v34 }
 0x7e3   :  { %4723 = vmatpush3.bf16.msra.mxu0 %v4976_v20 }
 0x7e4   :  { %4724 = vmatprep.subr.bf16.mxu0 %v7100_v34 }
 0x7e5   :  { %4743 = vmatpush3.bf16.msra.mxu1 %v4992_v61 }
 0x7e6   :  { %4744 = vmatprep.subr.bf16.mxu1 %v7100_v34 }
 0x7e7   :  { %4725 = vmatpush3.bf16.msra.mxu0 %v4977_v0 }
 0x7e8   :  { %4750 = vmatprep.subr.bf16.mxu0 %v7100_v34 }
 0x7e9   :  { %4745 = vmatpush3.bf16.msra.mxu1 %v4993_v7 }
 0x7ea   :  { %4727 = vmatmul.mubr.bf16.vlgmr.msra.gmra.mrb[108].mxu0 %v3485_v56 }
 0x7eb   :  { %4751 = vmatpush3.bf16.msra.mxu0 %v4978_v39  ;;  %4766 = vmatprep.mubr.msk.bf16.mxu0 %vm5376_vm0, %v7100_v34 }
 0x7ec   :  { %4752 = vmatprep.subr.bf16.mxu0 %v7100_v34 }
 0x7ef   :  { %4753 = vmatpush3.bf16.msra.mxu0 %v4979_v24 }
 0x7f0   :  { %4754 = vmatprep.subr.bf16.mxu0 %v7100_v34 }
 0x7f3   :  { %4755 = vmatpush3.bf16.msra.mxu0 %v4980_v19 }
 0x7f4   :  { %4756 = vmatprep.subr.bf16.mxu0 %v7100_v34 }
 0x7f7   :  { %4757 = vmatpush3.bf16.msra.mxu0 %v4981_v10 }
 0x7f8   :  { %4758 = vmatprep.subr.bf16.mxu0 %v7100_v34 }
 0x7fb   :  { %4759 = vmatpush3.bf16.msra.mxu0 %v4982_v3 }
 0x7fc   :  { %4760 = vmatprep.subr.bf16.mxu0 %v7100_v34 }
 0x7ff   :  { %4761 = vmatpush3.bf16.msra.mxu0 %v4983_v35 }
 0x800   :  { %4762 = vmatprep.subr.bf16.mxu0 %v7100_v34 }
 0x803   :  { %4763 = vmatpush3.bf16.msra.mxu0 %v4984_v13 }
 0x804   :  { %4764 = vmatprep.subr.bf16.mxu0 %v7100_v34 }
 0x807   :  { %4765 = vmatpush3.bf16.msra.mxu0 %v4985_v43 }
 0x80a   :  { %4767 = vmatmul.mubr.bf16.vlgmr.msra.gmra.mrb[112].mxu0 %v3679_v22 }
 0x89d   :  { %v3396_v30 = vpop.f32.mrb[104].mxu0  ;;  %v3437_v2 = vpop.f32.mrb[92].mxu1 }
 0x89e   :  { %v3446_v6 = vadd.f32 %v3396_v30, %v7231_v5  ;;  %v3398_v25 = vpop.f32.mrb[105].mxu0  ;;  %v4708_v12 = vpop.f32.mrb[93].mxu1  ;;  %v3460_v37 = vadd.f32 %v5297_v63, %v3437_v2 }
 0x89f   :  { %v3453_v27 = vadd.f32 %v3398_v25, %v7232_v59  ;;  %v3400_v16 = vpop.f32.mrb[106].mxu0  ;;  %v3440_v4 = vpop.f32.mrb[94].mxu1 }
 0x8a0   :  { %v3997_v48 = vmul.f32 -1.442695, %v3446_v6  ;;  %v3401_v55 = vpop.f32.mrb[107].mxu0  ;;  %v4709_v18 = vpop.f32.mrb[95].mxu1 }
 0x8a1   :  { %v3998_v28 = vmul.f32 -1.442695, %v3453_v27 }
 0x8a2   :  { %5164 = vpow2.f32 %v3997_v48 }
 0x8a3   :  { %5166 = vpow2.f32 %v3998_v28 }
 0x8ac   :  { %v5165_v57 = vpop.eup %5164 }
 0x8ad   :  { %v3450_v29 = vadd.f32 1.0, %v5165_v57  ;;  %v5167_v34 = vpop.eup %5166 }
 0x8ae   :  { %v3457_v53 = vadd.f32 1.0, %v5167_v34 }
 0x8af   :  { %5168 = vrcp.f32 %v3450_v29 }
 0x8b0   :  { %5170 = vrcp.f32 %v3457_v53 }
 0x8b9   :  { %v5169_v58 = vpop.eup %5168 }
 0x8ba   :  { %v3461_v44 = vmul.f32 %v5169_v58, %v3460_v37  ;;  %v5171_v60 = vpop.eup %5170 }
 0x8bb   :  { %v3464_v46 = vsub.f32 1.0, %v5171_v60  ;;  %v3466_v26 = vmul.f32 %v5171_v60, %v6837_v52 }
 0x8bc   :  { %v3462_v21 = vadd.f32 %v3461_v44, %v7233_v50 }
 0x8bd   :  { %v3585_v41 = vpop.f32.mrb[108].mxu0 }
 0x8be   :  { %5172 = vtanh.f32 %v3462_v21  ;;  %v4728_v33 = vpop.f32.mrb[109].mxu0 }
 0x8bf   :  { %v3588_v9 = vpop.f32.mrb[110].mxu0 }
 0x8c0   :  { %v4729_v42 = vpop.f32.mrb[111].mxu0 }
 0x8c8   :  { %v5173_v49 = vpop.eup %5172 }
 0x8c9   :  { %v3465_v8 = vmul.f32 %v5173_v49, %v3464_v46 }
 0x8cb   :  { %v3467_v38 = vadd.f32 %v3466_v26, %v3465_v8 }
 0x8cd   :  { %v3468_v47 = vpack.c.bf16 %v3467_v38, %v3467_v38 }
 0x8cf   :  { %4747 = vmatmul.mubr.bf16.vlgmr.msra.gmra.mrb[96].mxu1 %v3468_v47 }
 0x8dd   :  { %v3779_v14 = vpop.f32.mrb[112].mxu0 }
 0x8de   :  { %v4768_v40 = vpop.f32.mrb[113].mxu0 }
 0x8df   :  { %v3782_v15 = vpop.f32.mrb[114].mxu0 }
 0x8e0   :  { %v4769_v17 = vpop.f32.mrb[115].mxu0 }
 0x9a2   :  { %v3673_v23 = vpop.f32.mrb[96].mxu1 }
 0x9a3   :  { %v3674_v62 = vadd.f32 %v3673_v23, %v3585_v41  ;;  %v4748_v36 = vpop.f32.mrb[97].mxu1 }
 0x9a4   :  { %v3676_v20 = vpop.f32.mrb[98].mxu1 }
 0x9a5   :  { %v3785_v0 = vadd.f32 %v3779_v14, %v3674_v62  ;;  %v4749_v39 = vpop.f32.mrb[99].mxu1 }
 0x9a7   :  { %v3793_v52 = vadd.f32 %v4055_v54, %v3785_v0 }
 0x9a9   :  { %3795 = vst.msk [vmem:[#allocation8] sm:$0x3] %vm3794_vm1, %v3793_v52 }
 0x9aa   :  { %5353 = shalt.err (!%p5350_p6)
}
 0x9ab   :  { %s5354_s8 = scalar_lea.hbm %s6976_s9, 32 }
 0x9ac   :  { %p5355_p7 = scmp.ne.s32.totalorder %s6976_s9, %s5354_s8  ;;  %p5358_p8 = scmp.lt.u32.totalorder %s5354_s8, %s6976_s9 }
 0x9ae   :  { %p5360_p9 = pnand %p5358_p8, %p5355_p7 }
 0x9b0   :  { %5363 = shalt.err (!%p5360_p9)
}
 0x9b1   :  { %3805 = dma.vmem_to_hbm [thread:$0]  %s3803_s4, 32, %s6976_s9, [#allocation5]  }
 0x9b2   :  { %5368 = dma.done.wait [#allocation5], 32  }
 0x9b3   :  { %5369 = vsyncadd [#allocation5], 4294967264 }
 0x9b4   :  { %3809 = vsyncpa [#allocation4], 1 }
 0x9b5   :  { %3810 = vsyncpa [#allocation7], 1 }
 0x9b6   :  { %3811 = vsyncpa [#allocation5], 1 }

</bundles_post_ra>
